<compile_context>
chip_gen: v7x
topology: tpu7x:2x2x1
jax: 0.10.0
libtpu: 0.0.40
codegen_flags: <defaults>
</compile_context>

<pallas_src>
import functools

import jax
import jax.numpy as jnp
from jax.experimental import pallas as pl
from jax.experimental.pallas import tpu as pltpu

DROPOUT_P = 0.2


def mha_kernel(x_ref, wqkv_ref, wp_ref, bp_ref, *rest,
               num_heads, scale, mxu_dtype, keep_scale):
    if keep_scale is not None:
        drop_ref, o_ref = rest
    else:
        (o_ref,) = rest

    Bb, T, C = x_ref.shape
    hs = C // num_heads
    rows = Bb * T

    # ---- Fused QKV projection: one lane-dense (rows, C) @ (C, 3C) MXU matmul.
    x2 = x_ref[...].reshape(rows, C).astype(mxu_dtype)
    qkv = jnp.dot(x2, wqkv_ref[...], preferred_element_type=jnp.float32)  # (rows, 3C) f32

    # Fold the n_embed**-0.5 scale into q (fewer VALU ops than scaling scores).
    q = (qkv[:, :C] * scale).astype(mxu_dtype)
    k = qkv[:, C:2 * C].astype(mxu_dtype)
    v = qkv[:, 2 * C:].astype(mxu_dtype)

    # Causal mask built once from iota (no (T, T) HBM buffer / DMA).
    row_id = jax.lax.broadcasted_iota(jnp.int32, (T, T), 0)
    col_id = jax.lax.broadcasted_iota(jnp.int32, (T, T), 1)
    causal = (col_id <= row_id)[None, :, :]                # (1, T, T)

    if keep_scale is not None:
        drop = drop_ref[...]                               # (Bb, H, T, T) int8

    head_outs = []
    for h in range(num_heads):                             # static unroll, H small
        lo, hi = h * hs, (h + 1) * hs
        q_h = q[:, lo:hi].reshape(Bb, T, hs)
        k_h = k[:, lo:hi].reshape(Bb, T, hs)
        v_h = v[:, lo:hi].reshape(Bb, T, hs)

        # scores: (Bb, T, T), batched over the sequence dim.
        s = jnp.einsum("btd,bsd->bts", q_h, k_h,
                       preferred_element_type=jnp.float32)
        s = jnp.where(causal, s, -jnp.inf)

        # softmax over keys in f32; divide moved to the EUP slot.
        s = s - s.max(axis=-1, keepdims=True)
        p = jnp.exp(s)
        p = p * pl.reciprocal(p.sum(axis=-1, keepdims=True), approx=True)

        if keep_scale is not None:
            # int8 keep mask (0/1); 1/(1-p) rescale is a compile-time constant.
            p = p * (drop[:, h].astype(jnp.float32) * keep_scale)

        o_h = jnp.einsum("bts,bsd->btd", p.astype(mxu_dtype), v_h,
                         preferred_element_type=jnp.float32)   # (Bb, T, hs)
        head_outs.append(o_h.reshape(rows, hs))

    # ---- Lane-contiguous head concat -> single (rows, C) @ (C, C) output proj.
    head_cat = jnp.concatenate(head_outs, axis=-1).astype(mxu_dtype)  # (rows, C)
    y = jnp.dot(head_cat, wp_ref[...], preferred_element_type=jnp.float32)
    y = y + bp_ref[...].astype(jnp.float32)

    o_ref[...] = y.reshape(Bb, T, C).astype(o_ref.dtype)


def _pick_block_b(B, T, target_rows=256):
    """Largest batch block whose rows fit ~target_rows, preferring grid >= 2."""
    divisors = [d for d in range(1, B + 1) if B % d == 0]
    ok = [d for d in divisors if d * T <= target_rows]
    if not ok:
        return 1
    pref = [d for d in ok if B // d >= 2]
    return max(pref) if pref else max(ok)


def multi_head_attention(x, packed_params, *, num_heads, dropout_rng=None,
                         training=False, dropout_p=DROPOUT_P,
                         mxu_dtype=jnp.bfloat16, block_b=None):
    """x: (B, T, C).  packed_params = (wqkv, wp, bp):
         wqkv: (C, 3C)  -- [Wq^T | Wk^T | Wv^T], head-major columns inside each C block
         wp:   (C, C)   -- proj.weight.T
         bp:   (1, C)   -- proj.bias
    """
    wqkv, wp, bp = packed_params
    B, T, C = x.shape
    H = num_heads
    assert C % H == 0
    assert wqkv.shape == (C, 3 * C) and wp.shape == (C, C) and bp.shape == (1, C)

    if block_b is None:
        block_b = _pick_block_b(B, T)
    assert B % block_b == 0
    grid = (B // block_b,)

    scale = float(C) ** -0.5
    keep_scale = None

    # Weights stored / DMA'd in the MXU dtype (halves resident-weight traffic
    # for bf16); bias & accumulation stay f32.
    args = [x, wqkv.astype(mxu_dtype), wp.astype(mxu_dtype), bp]
    in_specs = [
        pl.BlockSpec((block_b, T, C), lambda i: (i, 0, 0)),   # x tile
        pl.BlockSpec((C, 3 * C), lambda i: (0, 0)),           # fused QKV weight (resident)
        pl.BlockSpec((C, C), lambda i: (0, 0)),               # proj weight (resident)
        pl.BlockSpec((1, C), lambda i: (0, 0)),               # proj bias
    ]

    if training and dropout_p > 0.0:
        assert dropout_rng is not None
        keep = jax.random.bernoulli(dropout_rng, 1.0 - dropout_p, (B, H, T, T))
        args.append(keep.astype(jnp.int8))                    # int8: 4x less DMA than f32
        in_specs.append(pl.BlockSpec((block_b, H, T, T), lambda i: (i, 0, 0, 0)))
        keep_scale = 1.0 / (1.0 - dropout_p)

    kernel = functools.partial(mha_kernel, num_heads=H, scale=scale,
                               mxu_dtype=mxu_dtype, keep_scale=keep_scale)

    # --- VMEM budget from the actual working set (no artificial floor, capped
    #     well below v7x's 64 MiB per-TC VMEM).
    x_isz = jnp.dtype(x.dtype).itemsize
    w_isz = jnp.dtype(mxu_dtype).itemsize
    rows = block_b * T
    est = (
        2 * 2 * rows * C * x_isz                 # x + out tiles, double-buffered
        + 2 * (3 * C * C + C * C) * w_isz        # wqkv + wp (default double-buffered)
        + 2 * C * x_isz                          # bias
        + rows * 3 * C * (4 + w_isz)             # qkv f32 + mxu-dtype copies
        + 4 * block_b * T * T * 4                # per-head score / softmax temps
        + 2 * rows * C * 4                       # head concat + projected output
    )
    if keep_scale is not None:
        est += 2 * block_b * H * T * T + block_b * T * T * 4
    vmem_limit = int(min(4 * est + (4 << 20), 48 << 20))

    return pl.pallas_call(
        kernel,
        out_shape=jax.ShapeDtypeStruct((B, T, C), x.dtype),
        grid=grid,
        in_specs=in_specs,
        out_specs=pl.BlockSpec((block_b, T, C), lambda i: (i, 0, 0)),
        compiler_params=pltpu.CompilerParams(
            dimension_semantics=("parallel",),
            vmem_limit_bytes=vmem_limit,
        ),
    )(*args)


def init_params(key, n_embed, num_heads, dtype=jnp.float32):
    """torch.nn.Linear-style init: U(-1/sqrt(fan_in), 1/sqrt(fan_in)), fan_in=n_embed.
    Returns per-head wq/wk/wv (H, C, hs) = per-head Linear weights transposed,
    wp (C, C) = proj.weight.T, bp (1, C)."""
    hs = n_embed // num_heads
    kq, kk, kv, kpw, kpb = jax.random.split(key, 5)
    lim = 1.0 / (n_embed ** 0.5)
    wq = jax.random.uniform(kq, (num_heads, n_embed, hs), dtype, -lim, lim)
    wk = jax.random.uniform(kk, (num_heads, n_embed, hs), dtype, -lim, lim)
    wv = jax.random.uniform(kv, (num_heads, n_embed, hs), dtype, -lim, lim)
    wp = jax.random.uniform(kpw, (n_embed, n_embed), dtype, -lim, lim)
    bp = jax.random.uniform(kpb, (1, n_embed), dtype, -lim, lim)
    return wq, wk, wv, wp, bp


def pack_params(wq, wk, wv, wp, bp):
    """Pack per-head weights into the fused kernel layout (head-major columns,
    matching the torch.cat([h(x) for h in heads], dim=-1) concat order)."""
    H, C, hs = wq.shape

    def head_major(w):                       # (H, C, hs) -> (C, H*hs)
        return jnp.transpose(w, (1, 0, 2)).reshape(C, H * hs)

    wqkv = jnp.concatenate([head_major(wq), head_major(wk), head_major(wv)], axis=1)
    return wqkv, wp, bp


def mha_reference(x, wq, wk, wv, wp, bp):
    """Pure-JAX f32 reference (eval mode, dropout = identity), matching bigram.py."""
    B, T, C = x.shape
    q = jnp.einsum("btc,hcs->bhts", x, wq)
    k = jnp.einsum("btc,hcs->bhts", x, wk)
    v = jnp.einsum("btc,hcs->bhts", x, wv)
    wei = jnp.einsum("bhts,bhks->bhtk", q, k) * (C ** -0.5)
    mask = jnp.tril(jnp.ones((T, T), dtype=bool))
    wei = jnp.where(mask, wei, -jnp.inf)
    wei = jax.nn.softmax(wei, axis=-1)
    out = jnp.einsum("bhtk,bhks->bhts", wei, v)            # (B, H, T, hs)
    out = out.transpose(0, 2, 1, 3).reshape(B, T, C)       # head-major concat
    return out @ wp + bp


if __name__ == "__main__":
    # Small shapes consistent with the module: batch=4, seq=64, n_embed=128,
    # num_heads=4 (head_size=32).  block_b=2 -> 128 rows per step, grid=2.
    B, T, N_EMBED, NUM_HEADS = 4, 64, 128, 4
    key = jax.random.PRNGKey(0)
    kx, kp, kd = jax.random.split(key, 3)

    x = jax.random.normal(kx, (B, T, N_EMBED), dtype=jnp.float32)
    wq, wk, wv, wp, bp = init_params(kp, N_EMBED, NUM_HEADS)
    packed = pack_params(wq, wk, wv, wp, bp)

    ref = mha_reference(x, wq, wk, wv, wp, bp)

    # Strict correctness check: f32 MXU path (eval mode, matching module.eval()).
    y32 = jax.block_until_ready(
        multi_head_attention(x, packed, num_heads=NUM_HEADS, mxu_dtype=jnp.float32))
    assert y32.shape == (B, T, N_EMBED)
    assert jnp.allclose(y32, ref, atol=1e-2, rtol=1e-2), \
        float(jnp.max(jnp.abs(y32 - ref)))

    # Fast path: bf16 MXU operands, f32 accumulation/softmax (default).
    ybf = jax.block_until_ready(
        multi_head_attention(x, packed, num_heads=NUM_HEADS))
    assert ybf.shape == (B, T, N_EMBED)
    assert jnp.allclose(ybf, ref, atol=5e-2, rtol=5e-2), \
        float(jnp.max(jnp.abs(ybf - ref)))

    # Training path: attention-weight dropout via host-generated int8 keep mask.
    yt = jax.block_until_ready(
        multi_head_attention(x, packed, num_heads=NUM_HEADS,
                             dropout_rng=kd, training=True))
    assert yt.shape == (B, T, N_EMBED)
    assert bool(jnp.all(jnp.isfinite(yt)))

    print("KERNEL_OK")
</pallas_src>

<mosaic_0001>
module attributes {stable_mosaic.version = 11 : i64} {
  func.func @mha_kernel(%arg0: i32, %arg1: memref<2x64x128xf32, #tpu.memory_space<vmem>>, %arg2: memref<128x384xf32, #tpu.memory_space<vmem>>, %arg3: memref<128x128xf32, #tpu.memory_space<vmem>>, %arg4: memref<1x128xf32, #tpu.memory_space<vmem>>, %arg5: memref<2x64x128xf32, #tpu.memory_space<vmem>>) attributes {dimension_semantics = [#tpu.dimension_semantics<parallel>], iteration_bounds = array<i64: 2>, scalar_prefetch = 0 : i64, scratch_operands = 0 : i64, tpu.core_type = #tpu.core_type<tc>, window_params = [{transform_indices = @transform_0, window_bounds = array<i64: 2, 64, 128>}, {pipeline_mode = #tpu.pipeline_mode<synchronous>, transform_indices = @transform_1, window_bounds = array<i64: 128, 384>}, {pipeline_mode = #tpu.pipeline_mode<synchronous>, transform_indices = @transform_2, window_bounds = array<i64: 128, 128>}, {pipeline_mode = #tpu.pipeline_mode<synchronous>, transform_indices = @transform_3, window_bounds = array<i64: 1, 128>}, {transform_indices = @transform_4, window_bounds = array<i64: 2, 64, 128>}]} {
    %c0 = arith.constant 0 : index
    %c0_0 = arith.constant 0 : index
    %c0_1 = arith.constant 0 : index
    %0 = vector.load %arg1[%c0, %c0_0, %c0_1] : memref<2x64x128xf32, #tpu.memory_space<vmem>>, vector<2x64x128xf32>
    %1 = vector.shape_cast %0 : vector<2x64x128xf32> to vector<128x128xf32>
    %c0_2 = arith.constant 0 : index
    %c0_3 = arith.constant 0 : index
    %2 = vector.load %arg2[%c0_2, %c0_3] : memref<128x384xf32, #tpu.memory_space<vmem>>, vector<128x384xf32>
    %cst = arith.constant dense<0.000000e+00> : vector<128x384xf32>
    %3 = tpu.matmul %1, %2, %cst {dimension_numbers = #tpu.dot_dimension_numbers<[1], [0], [0], [1], [0, 0, 1, 1], [], []>} : vector<128x128xf32>, vector<128x384xf32>, vector<128x384xf32> -> vector<128x384xf32>
    %4 = vector.extract_strided_slice %3 {offsets = [0, 0], sizes = [128, 128], strides = [1, 1]} : vector<128x384xf32> to vector<128x128xf32>
    %cst_4 = arith.constant 0.0883883461 : f32
    %5 = vector.broadcast %cst_4 : f32 to vector<128x128xf32>
    %6 = arith.mulf %4, %5 : vector<128x128xf32>
    %7 = vector.extract_strided_slice %3 {offsets = [0, 128], sizes = [128, 128], strides = [1, 1]} : vector<128x384xf32> to vector<128x128xf32>
    %8 = vector.extract_strided_slice %3 {offsets = [0, 256], sizes = [128, 128], strides = [1, 1]} : vector<128x384xf32> to vector<128x128xf32>
    %9 = tpu.iota {dimensions = array<i32: 0>} : vector<64x64xi32>
    %10 = tpu.iota {dimensions = array<i32: 1>} : vector<64x64xi32>
    %11 = arith.cmpi sle, %10, %9 : vector<64x64xi32>
    %12 = vector.shape_cast %11 : vector<64x64xi1> to vector<1x64x64xi1>
    %13 = vector.extract_strided_slice %6 {offsets = [0, 0], sizes = [128, 32], strides = [1, 1]} : vector<128x128xf32> to vector<128x32xf32>
    %14 = vector.shape_cast %13 : vector<128x32xf32> to vector<2x64x32xf32>
    %15 = vector.extract_strided_slice %7 {offsets = [0, 0], sizes = [128, 32], strides = [1, 1]} : vector<128x128xf32> to vector<128x32xf32>
    %16 = vector.shape_cast %15 : vector<128x32xf32> to vector<2x64x32xf32>
    %17 = vector.extract_strided_slice %8 {offsets = [0, 0], sizes = [128, 32], strides = [1, 1]} : vector<128x128xf32> to vector<128x32xf32>
    %18 = vector.shape_cast %17 : vector<128x32xf32> to vector<2x64x32xf32>
    "tpu.trace_start"() <{level = 10 : i32, message = "btd,bsd->bts"}> : () -> ()
    %cst_5 = arith.constant dense<0.000000e+00> : vector<2x64x64xf32>
    %19 = tpu.matmul %14, %16, %cst_5 {dimension_numbers = #tpu.dot_dimension_numbers<[2], [2], [1], [1], [0, 0, 0, 1, 1, 1], [0], [0]>} : vector<2x64x32xf32>, vector<2x64x32xf32>, vector<2x64x64xf32> -> vector<2x64x64xf32>
    %cst_6 = arith.constant 0xFF800000 : f32
    "tpu.trace_stop"() : () -> ()
    %20 = vector.shape_cast %12 : vector<1x64x64xi1> to vector<1x64x64xi1>
    %21 = vector.broadcast %20 : vector<1x64x64xi1> to vector<2x64x64xi1>
    %22 = vector.broadcast %cst_6 : f32 to vector<2x64x64xf32>
    %23 = arith.select %21, %19, %22 : vector<2x64x64xi1>, vector<2x64x64xf32>
    %cst_7 = arith.constant dense<0xFF800000> : vector<2x64xf32>
    %24 = vector.multi_reduction <maximumf>, %23, %cst_7 [2] : vector<2x64x64xf32> to vector<2x64xf32>
    %25 = vector.shape_cast %24 : vector<2x64xf32> to vector<2x64x1xf32>
    %26 = vector.broadcast %25 : vector<2x64x1xf32> to vector<2x64x64xf32>
    %27 = arith.subf %23, %26 : vector<2x64x64xf32>
    %28 = math.exp %27 : vector<2x64x64xf32>
    %cst_8 = arith.constant dense<0.000000e+00> : vector<2x64xf32>
    %29 = vector.multi_reduction <add>, %28, %cst_8 [2] : vector<2x64x64xf32> to vector<2x64xf32>
    %30 = vector.shape_cast %29 : vector<2x64xf32> to vector<2x64x1xf32>
    %31 = tpu.reciprocal %30 {approx = true} : vector<2x64x1xf32> -> vector<2x64x1xf32>
    %32 = vector.broadcast %31 : vector<2x64x1xf32> to vector<2x64x64xf32>
    %33 = arith.mulf %28, %32 : vector<2x64x64xf32>
    "tpu.trace_start"() <{level = 10 : i32, message = "bts,bsd->btd"}> : () -> ()
    %cst_9 = arith.constant dense<0.000000e+00> : vector<2x64x32xf32>
    %34 = tpu.matmul %33, %18, %cst_9 {dimension_numbers = #tpu.dot_dimension_numbers<[2], [1], [1], [2], [0, 0, 0, 1, 1, 2], [0], [0]>} : vector<2x64x64xf32>, vector<2x64x32xf32>, vector<2x64x32xf32> -> vector<2x64x32xf32>
    "tpu.trace_stop"() : () -> ()
    %35 = vector.shape_cast %34 : vector<2x64x32xf32> to vector<128x32xf32>
    %36 = vector.extract_strided_slice %6 {offsets = [0, 32], sizes = [128, 32], strides = [1, 1]} : vector<128x128xf32> to vector<128x32xf32>
    %37 = vector.shape_cast %36 : vector<128x32xf32> to vector<2x64x32xf32>
    %38 = vector.extract_strided_slice %7 {offsets = [0, 32], sizes = [128, 32], strides = [1, 1]} : vector<128x128xf32> to vector<128x32xf32>
    %39 = vector.shape_cast %38 : vector<128x32xf32> to vector<2x64x32xf32>
    %40 = vector.extract_strided_slice %8 {offsets = [0, 32], sizes = [128, 32], strides = [1, 1]} : vector<128x128xf32> to vector<128x32xf32>
    %41 = vector.shape_cast %40 : vector<128x32xf32> to vector<2x64x32xf32>
    "tpu.trace_start"() <{level = 10 : i32, message = "btd,bsd->bts"}> : () -> ()
    %cst_10 = arith.constant dense<0.000000e+00> : vector<2x64x64xf32>
    %42 = tpu.matmul %37, %39, %cst_10 {dimension_numbers = #tpu.dot_dimension_numbers<[2], [2], [1], [1], [0, 0, 0, 1, 1, 1], [0], [0]>} : vector<2x64x32xf32>, vector<2x64x32xf32>, vector<2x64x64xf32> -> vector<2x64x64xf32>
    %cst_11 = arith.constant 0xFF800000 : f32
    "tpu.trace_stop"() : () -> ()
    %43 = vector.shape_cast %12 : vector<1x64x64xi1> to vector<1x64x64xi1>
    %44 = vector.broadcast %43 : vector<1x64x64xi1> to vector<2x64x64xi1>
    %45 = vector.broadcast %cst_11 : f32 to vector<2x64x64xf32>
    %46 = arith.select %44, %42, %45 : vector<2x64x64xi1>, vector<2x64x64xf32>
    %cst_12 = arith.constant dense<0xFF800000> : vector<2x64xf32>
    %47 = vector.multi_reduction <maximumf>, %46, %cst_12 [2] : vector<2x64x64xf32> to vector<2x64xf32>
    %48 = vector.shape_cast %47 : vector<2x64xf32> to vector<2x64x1xf32>
    %49 = vector.broadcast %48 : vector<2x64x1xf32> to vector<2x64x64xf32>
    %50 = arith.subf %46, %49 : vector<2x64x64xf32>
    %51 = math.exp %50 : vector<2x64x64xf32>
    %cst_13 = arith.constant dense<0.000000e+00> : vector<2x64xf32>
    %52 = vector.multi_reduction <add>, %51, %cst_13 [2] : vector<2x64x64xf32> to vector<2x64xf32>
    %53 = vector.shape_cast %52 : vector<2x64xf32> to vector<2x64x1xf32>
    %54 = tpu.reciprocal %53 {approx = true} : vector<2x64x1xf32> -> vector<2x64x1xf32>
    %55 = vector.broadcast %54 : vector<2x64x1xf32> to vector<2x64x64xf32>
    %56 = arith.mulf %51, %55 : vector<2x64x64xf32>
    "tpu.trace_start"() <{level = 10 : i32, message = "bts,bsd->btd"}> : () -> ()
    %cst_14 = arith.constant dense<0.000000e+00> : vector<2x64x32xf32>
    %57 = tpu.matmul %56, %41, %cst_14 {dimension_numbers = #tpu.dot_dimension_numbers<[2], [1], [1], [2], [0, 0, 0, 1, 1, 2], [0], [0]>} : vector<2x64x64xf32>, vector<2x64x32xf32>, vector<2x64x32xf32> -> vector<2x64x32xf32>
    "tpu.trace_stop"() : () -> ()
    %58 = vector.shape_cast %57 : vector<2x64x32xf32> to vector<128x32xf32>
    %59 = vector.extract_strided_slice %6 {offsets = [0, 64], sizes = [128, 32], strides = [1, 1]} : vector<128x128xf32> to vector<128x32xf32>
    %60 = vector.shape_cast %59 : vector<128x32xf32> to vector<2x64x32xf32>
    %61 = vector.extract_strided_slice %7 {offsets = [0, 64], sizes = [128, 32], strides = [1, 1]} : vector<128x128xf32> to vector<128x32xf32>
    %62 = vector.shape_cast %61 : vector<128x32xf32> to vector<2x64x32xf32>
    %63 = vector.extract_strided_slice %8 {offsets = [0, 64], sizes = [128, 32], strides = [1, 1]} : vector<128x128xf32> to vector<128x32xf32>
    %64 = vector.shape_cast %63 : vector<128x32xf32> to vector<2x64x32xf32>
    "tpu.trace_start"() <{level = 10 : i32, message = "btd,bsd->bts"}> : () -> ()
    %cst_15 = arith.constant dense<0.000000e+00> : vector<2x64x64xf32>
    %65 = tpu.matmul %60, %62, %cst_15 {dimension_numbers = #tpu.dot_dimension_numbers<[2], [2], [1], [1], [0, 0, 0, 1, 1, 1], [0], [0]>} : vector<2x64x32xf32>, vector<2x64x32xf32>, vector<2x64x64xf32> -> vector<2x64x64xf32>
    %cst_16 = arith.constant 0xFF800000 : f32
    "tpu.trace_stop"() : () -> ()
    %66 = vector.shape_cast %12 : vector<1x64x64xi1> to vector<1x64x64xi1>
    %67 = vector.broadcast %66 : vector<1x64x64xi1> to vector<2x64x64xi1>
    %68 = vector.broadcast %cst_16 : f32 to vector<2x64x64xf32>
    %69 = arith.select %67, %65, %68 : vector<2x64x64xi1>, vector<2x64x64xf32>
    %cst_17 = arith.constant dense<0xFF800000> : vector<2x64xf32>
    %70 = vector.multi_reduction <maximumf>, %69, %cst_17 [2] : vector<2x64x64xf32> to vector<2x64xf32>
    %71 = vector.shape_cast %70 : vector<2x64xf32> to vector<2x64x1xf32>
    %72 = vector.broadcast %71 : vector<2x64x1xf32> to vector<2x64x64xf32>
    %73 = arith.subf %69, %72 : vector<2x64x64xf32>
    %74 = math.exp %73 : vector<2x64x64xf32>
    %cst_18 = arith.constant dense<0.000000e+00> : vector<2x64xf32>
    %75 = vector.multi_reduction <add>, %74, %cst_18 [2] : vector<2x64x64xf32> to vector<2x64xf32>
    %76 = vector.shape_cast %75 : vector<2x64xf32> to vector<2x64x1xf32>
    %77 = tpu.reciprocal %76 {approx = true} : vector<2x64x1xf32> -> vector<2x64x1xf32>
    %78 = vector.broadcast %77 : vector<2x64x1xf32> to vector<2x64x64xf32>
    %79 = arith.mulf %74, %78 : vector<2x64x64xf32>
    "tpu.trace_start"() <{level = 10 : i32, message = "bts,bsd->btd"}> : () -> ()
    %cst_19 = arith.constant dense<0.000000e+00> : vector<2x64x32xf32>
    %80 = tpu.matmul %79, %64, %cst_19 {dimension_numbers = #tpu.dot_dimension_numbers<[2], [1], [1], [2], [0, 0, 0, 1, 1, 2], [0], [0]>} : vector<2x64x64xf32>, vector<2x64x32xf32>, vector<2x64x32xf32> -> vector<2x64x32xf32>
    "tpu.trace_stop"() : () -> ()
    %81 = vector.shape_cast %80 : vector<2x64x32xf32> to vector<128x32xf32>
    %82 = vector.extract_strided_slice %6 {offsets = [0, 96], sizes = [128, 32], strides = [1, 1]} : vector<128x128xf32> to vector<128x32xf32>
    %83 = vector.shape_cast %82 : vector<128x32xf32> to vector<2x64x32xf32>
    %84 = vector.extract_strided_slice %7 {offsets = [0, 96], sizes = [128, 32], strides = [1, 1]} : vector<128x128xf32> to vector<128x32xf32>
    %85 = vector.shape_cast %84 : vector<128x32xf32> to vector<2x64x32xf32>
    %86 = vector.extract_strided_slice %8 {offsets = [0, 96], sizes = [128, 32], strides = [1, 1]} : vector<128x128xf32> to vector<128x32xf32>
    %87 = vector.shape_cast %86 : vector<128x32xf32> to vector<2x64x32xf32>
    "tpu.trace_start"() <{level = 10 : i32, message = "btd,bsd->bts"}> : () -> ()
    %cst_20 = arith.constant dense<0.000000e+00> : vector<2x64x64xf32>
    %88 = tpu.matmul %83, %85, %cst_20 {dimension_numbers = #tpu.dot_dimension_numbers<[2], [2], [1], [1], [0, 0, 0, 1, 1, 1], [0], [0]>} : vector<2x64x32xf32>, vector<2x64x32xf32>, vector<2x64x64xf32> -> vector<2x64x64xf32>
    %cst_21 = arith.constant 0xFF800000 : f32
    "tpu.trace_stop"() : () -> ()
    %89 = vector.shape_cast %12 : vector<1x64x64xi1> to vector<1x64x64xi1>
    %90 = vector.broadcast %89 : vector<1x64x64xi1> to vector<2x64x64xi1>
    %91 = vector.broadcast %cst_21 : f32 to vector<2x64x64xf32>
    %92 = arith.select %90, %88, %91 : vector<2x64x64xi1>, vector<2x64x64xf32>
    %cst_22 = arith.constant dense<0xFF800000> : vector<2x64xf32>
    %93 = vector.multi_reduction <maximumf>, %92, %cst_22 [2] : vector<2x64x64xf32> to vector<2x64xf32>
    %94 = vector.shape_cast %93 : vector<2x64xf32> to vector<2x64x1xf32>
    %95 = vector.broadcast %94 : vector<2x64x1xf32> to vector<2x64x64xf32>
    %96 = arith.subf %92, %95 : vector<2x64x64xf32>
    %97 = math.exp %96 : vector<2x64x64xf32>
    %cst_23 = arith.constant dense<0.000000e+00> : vector<2x64xf32>
    %98 = vector.multi_reduction <add>, %97, %cst_23 [2] : vector<2x64x64xf32> to vector<2x64xf32>
    %99 = vector.shape_cast %98 : vector<2x64xf32> to vector<2x64x1xf32>
    %100 = tpu.reciprocal %99 {approx = true} : vector<2x64x1xf32> -> vector<2x64x1xf32>
    %101 = vector.broadcast %100 : vector<2x64x1xf32> to vector<2x64x64xf32>
    %102 = arith.mulf %97, %101 : vector<2x64x64xf32>
    "tpu.trace_start"() <{level = 10 : i32, message = "bts,bsd->btd"}> : () -> ()
    %cst_24 = arith.constant dense<0.000000e+00> : vector<2x64x32xf32>
    %103 = tpu.matmul %102, %87, %cst_24 {dimension_numbers = #tpu.dot_dimension_numbers<[2], [1], [1], [2], [0, 0, 0, 1, 1, 2], [0], [0]>} : vector<2x64x64xf32>, vector<2x64x32xf32>, vector<2x64x32xf32> -> vector<2x64x32xf32>
    "tpu.trace_stop"() : () -> ()
    %104 = vector.shape_cast %103 : vector<2x64x32xf32> to vector<128x32xf32>
    %105 = tpu.concatenate %35, %58, %81, %104 in 1 : vector<128x32xf32>, vector<128x32xf32>, vector<128x32xf32>, vector<128x32xf32> -> vector<128x128xf32>
    %c0_25 = arith.constant 0 : index
    %c0_26 = arith.constant 0 : index
    %106 = vector.load %arg3[%c0_25, %c0_26] : memref<128x128xf32, #tpu.memory_space<vmem>>, vector<128x128xf32>
    %cst_27 = arith.constant dense<0.000000e+00> : vector<128x128xf32>
    %107 = tpu.matmul %105, %106, %cst_27 {dimension_numbers = #tpu.dot_dimension_numbers<[1], [0], [0], [1], [0, 0, 1, 1], [], []>} : vector<128x128xf32>, vector<128x128xf32>, vector<128x128xf32> -> vector<128x128xf32>
    %c0_28 = arith.constant 0 : index
    %c0_29 = arith.constant 0 : index
    %108 = vector.load %arg4[%c0_28, %c0_29] : memref<1x128xf32, #tpu.memory_space<vmem>>, vector<1x128xf32>
    %109 = vector.broadcast %108 : vector<1x128xf32> to vector<128x128xf32>
    %110 = arith.addf %107, %109 : vector<128x128xf32>
    %111 = vector.shape_cast %110 : vector<128x128xf32> to vector<2x64x128xf32>
    %c0_30 = arith.constant 0 : index
    %c0_31 = arith.constant 0 : index
    %c0_32 = arith.constant 0 : index
    %112 = vector.load %arg5[%c0_30, %c0_31, %c0_32] : memref<2x64x128xf32, #tpu.memory_space<vmem>>, vector<2x64x128xf32>
    tpu.vector_store %arg5[%c0_30, %c0_31, %c0_32], %111 {strides = array<i32>} : memref<2x64x128xf32, #tpu.memory_space<vmem>>, vector<2x64x128xf32>,
    return
  }
  func.func @transform_0(%arg0: i32) -> (i32, i32, i32) {
    %c0_i32 = arith.constant 0 : i32
    %c0_i32_0 = arith.constant 0 : i32
    %c0_i32_1 = arith.constant 0 : i32
    return %arg0, %c0_i32, %c0_i32_0 : i32, i32, i32
  }
  func.func @transform_1(%arg0: i32) -> (i32, i32) {
    %c0_i32 = arith.constant 0 : i32
    %c0_i32_0 = arith.constant 0 : i32
    %c0_i32_1 = arith.constant 0 : i32
    return %c0_i32, %c0_i32_0 : i32, i32
  }
  func.func @transform_2(%arg0: i32) -> (i32, i32) {
    %c0_i32 = arith.constant 0 : i32
    %c0_i32_0 = arith.constant 0 : i32
    %c0_i32_1 = arith.constant 0 : i32
    return %c0_i32, %c0_i32_0 : i32, i32
  }
  func.func @transform_3(%arg0: i32) -> (i32, i32) {
    %c0_i32 = arith.constant 0 : i32
    %c0_i32_0 = arith.constant 0 : i32
    %c0_i32_1 = arith.constant 0 : i32
    return %c0_i32, %c0_i32_0 : i32, i32
  }
  func.func @transform_4(%arg0: i32) -> (i32, i32, i32) {
    %c0_i32 = arith.constant 0 : i32
    %c0_i32_0 = arith.constant 0 : i32
    %c0_i32_1 = arith.constant 0 : i32
    return %arg0, %c0_i32, %c0_i32_0 : i32, i32, i32
  }
}

</mosaic_0001>

<bundles_post_ra>
// kernel: tpu_custom_call.1
= control target key start
LH: loop header
LB: loop body
LE: loop exit
PB: predicated region body
PF: predicated region fallthrough
CT: control target
= control target key end

     0   :  { %9 = vsyncpa [#allocation3], 0  ;;  %s8914_s0 = inlined_call_operand.hbm [shape: f32[4,64,128], index: 0, kind: input, shape index: {}]   ;;  %s8915_s1 = inlined_call_operand.hbm [shape: f32[128,384], index: 1, kind: input, shape index: {}]   ;;  %s8916_s2 = inlined_call_operand.hbm [shape: f32[128,128], index: 2, kind: input, shape index: {}]   ;;  %s8917_s3 = inlined_call_operand.vmem [shape: f32[1,128], index: 3, kind: input, shape index: {}]   ;;  %s8918_s4 = inlined_call_operand.hbm [shape: f32[4,64,128], index: 4, kind: output, shape index: {}]  }
   0x1   :  { %11 = vsyncpa [#allocation3 + $0x1], 0 }
   0x2   :  { %12 = vsyncpa [#allocation6], 0 }
   0x3   :  { %13 = vsyncpa [#allocation4], 0 }
   0x4   :  { %15 = vsyncpa [#allocation4 + $0x1], 0  ;;  %s6902_s15 = smov 0   ;;  %s6904_s16 = smov 0  }
   0x5   :  { %s6906_s17 = smov 0   ;;  %s6908_s18 = smov 0  }
   0x6 LB: > { %s6923_s19 = sadd.s32 4294967295, %s6861_s18   ;;  %s4483_s20 = sadd.s32 4294967294, %s6861_s18   ;;  %s6861_s18 = sphi %s6908_s18, %s9094_s18   ;;  %s6857_s17 = sphi %s6906_s17, %s9093_s17   ;;  %s6853_s16 = sphi %s6904_s16, %s9092_s16   ;;  %s6849_s15 = sphi %s6902_s15, %s9091_s15  }
   0x7   : > { %p41_p0 = scmp.ne.s32.totalorder %s6853_s16, %s6849_s15  ;;  %p8919_p1 = scmp.eq.s32.totalorder %s6923_s19, 0 }
   0x8   : > { %p134_p3 = scmp.eq.s32.totalorder %s4483_s20, 1  ;;  %p4484_p5 = scmp.ge.s32.totalorder %s6861_s18, 1 }
   0x9   : > { %p6932_p4 = por %p8919_p1, %p41_p0  ;;  %p141_p7 = scmp.lt.s32.totalorder %s6861_s18, 3 }
   0xa   : > { %p6937_p6 = por %p134_p3, %p41_p0  ;;  %s6863_s24 = smov [#allocation5]  }
   0xb   : > { %s8954_s21 = scalar_select %p6932_p4, 1, 0 }
   0xc   : > { %s8955_s22 = scalar_select %p6937_p6, 1, 0 }
   0xd   : > { %p6942_p8 = pnand %p4484_p5, %p141_p7  ;;  %s153_s25 = sshll.u32 %s6863_s24, 4  ;;  %s6946_s25 = int_to_ptr.vmem [resolvable:$true] %s153_s25 }
   0xe   : > { %s6864_s27 = smov [#allocation7]   ;;  %s6705_s5 = scalar_lea.hbm %s8915_s1, 6144 }
   0xf   : > { %p6024_p9 = pneg %p6942_p8  ;;  %s166_s28 = sshll.u32 %s6864_s27, 4  ;;  %s6957_s28 = int_to_ptr.vmem [resolvable:$true] %s166_s28 }
  0x10   : > { %p6706_p12 = scmp.ne.s32.totalorder %s8915_s1, %s6705_s5  ;;  %p6712_p5 = scmp.lt.u32.totalorder %s6705_s5, %s8915_s1 }
  0x11   : > { %p6953_p11 = pnand %p6024_p9, %p8919_p1 }
  0x13   : > { %p6707_p13 = pneg %p6953_p11 }
  0x15   : > { %p6708_p0 = pnand %p6707_p13, %p6706_p12 }
  0x17   : > { %p6709_p3 = pneg %p6708_p0 }
  0x19   : > { %p6714_p7 = pnand %p6712_p5, %p6709_p3 }
  0x1b   : > { %6717 = shalt.err (!%p6714_p7)
}
  0x1c   : > { %s6718_s10 = scalar_lea.vmem %s6946_s25, 6144  ;;  %p6726_p2 = scmp.lt.s32.totalorder %s6946_s25, %s6946_s25 }
  0x1d   : > { %p6719_p9 = scmp.ne.s32.totalorder %s6946_s25, %s6718_s10  ;;  %p6727_p12 = scmp.lt.s32.totalorder %s6718_s10, %s6718_s10 }
  0x1f   : > { %p6721_p10 = pnand %p6719_p9, %p6707_p13  ;;  %p6728_p0 = por %p6727_p12, %p6726_p2 }
  0x21   : > { %p6722_p1 = pneg %p6721_p10 }
  0x23   : > { %p6729_p6 = pnand %p6728_p0, %p6722_p1 }
  0x25   : > { %6732 = shalt.err (!%p6729_p6)
}
  0x26   : > { %s6865_s11 = smov 384   ;;  %s6866_s12 = smov 24  }
  0x27   : > { %6027 = dma.hbm_to_vmem [thread:$0]  (!%p6953_p11), %s8915_s1, 6144, %s6946_s25, [#allocation6], %s6865_s11, %s6865_s11, %s6866_s12  }
  0x28   : > { %s6733_s27 = scalar_lea.hbm %s8916_s2, 2048 }
  0x29   : > { %p6734_p2 = scmp.ne.s32.totalorder %s8916_s2, %s6733_s27  ;;  %p6740_p10 = scmp.lt.u32.totalorder %s6733_s27, %s8916_s2 }
  0x2b   : > { %p6736_p1 = pnand %p6734_p2, %p6707_p13 }
  0x2d   : > { %p6737_p6 = pneg %p6736_p1 }
  0x2f   : > { %p6742_p3 = pnand %p6740_p10, %p6737_p6 }
  0x31   : > { %6745 = shalt.err (!%p6742_p3)
}
  0x32   : > { %s6746_s25 = scalar_lea.vmem %s6957_s28, 2048  ;;  %p6754_p12 = scmp.lt.s32.totalorder %s6957_s28, %s6957_s28 }
  0x33   : > { %p6747_p5 = scmp.ne.s32.totalorder %s6957_s28, %s6746_s25  ;;  %p6755_p0 = scmp.lt.s32.totalorder %s6746_s25, %s6746_s25 }
  0x35   : > { %p6749_p7 = pnand %p6747_p5, %p6707_p13  ;;  %p6756_p2 = por %p6755_p0, %p6754_p12 }
  0x37   : > { %p6750_p9 = pneg %p6749_p7 }
  0x39   : > { %p6757_p1 = pnand %p6756_p2, %p6750_p9 }
  0x3b   : > { %6760 = shalt.err (!%p6757_p1)
}
  0x3c   : > { %s6867_s7 = smov 128   ;;  %s6868_s8 = smov 8  }
  0x3d   : > { %6030 = dma.hbm_to_vmem [thread:$0]  (!%p6953_p11), %s8916_s2, 2048, %s6957_s28, [#allocation6], %s6867_s7, %s6867_s7, %s6868_s8  }
  0x3e   : > { %s7015_s11 = sadd.s32 1, %s6861_s18   ;;  %s28_s13 = sadd.s32 1, %s6857_s17 }
  0x3f   : > { %s25_s12 = ssub.s32 %s6861_s18, %s7015_s11  ;;  %p35_p6 = scmp.ne.s32.totalorder %s6857_s17, %s6853_s16 }
  0x40   : > { %p26_p13 = scmp.eq.s32.totalorder %s25_s12, 0  ;;  %p36_p10 = scmp.eq.s32.totalorder %s6861_s18, 0 }
  0x41   : > { %p8958_p5 = scmp.eq.s32.totalorder %s6923_s19, 1  ;;  %p6041_p9 = scmp.lt.s32.totalorder %s6861_s18, 2 }
  0x42   : > { %s7024_s14 = scalar_select %p26_p13, %s6857_s17, %s28_s13  }
  0x43   : > { %p37_p3 = por %p36_p10, %p35_p6  ;;  %p7028_p7 = por %p8958_p5, %p35_p6 }
  0x44   : > { %s183_s20 = sand.u32 1, %s6857_s17   ;;  %s4697_s28 = sshll.u32 %s6861_s18, 11 }
  0x45   : > { %s8959_s26 = scalar_select %p7028_p7, 1, 0 }
  0x46   : > { %s4488_s24 = sshll.u32 %s183_s20, 7  ;;  %s7038_s30 = scalar_lea.hbm %s8914_s0, %s4697_s28 }
  0x47   : > { %s187_s5 = scalar_lea.vmem [#allocation2], %s4488_s24  ;;  %p7042_p11 = pnand %p6041_p9, %p37_p3 }
  0x48   : > { %s195_s6 = sshll.u32 %s187_s5, 4  ;;  %s7046_s9 = scalar_lea.sflag [#allocation3], %s183_s20  ;;  %s7040_s6 = int_to_ptr.vmem [resolvable:$true] %s195_s6 }
  0x49   : > { %s6761_s10 = scalar_lea.hbm %s7038_s30, 2048  ;;  %p6763_p0 = pneg %p7042_p11 }
  0x4a   : > { %p6762_p12 = scmp.ne.s32.totalorder %s7038_s30, %s6761_s10  ;;  %s6766_s24 = scalar_lea.hbm %s8914_s0, 4096 }
  0x4b   : > { %p6767_p13 = scmp.lt.u32.totalorder %s7038_s30, %s8914_s0  ;;  %p6768_p6 = scmp.lt.u32.totalorder %s6766_s24, %s6761_s10 }
  0x4c   : > { %p6764_p2 = pnand %p6763_p0, %p6762_p12  ;;  %p6770_p3 = scmp.lt.u32.totalorder %s6761_s10, %s7038_s30 }
  0x4d   : > { %p6769_p10 = por %p6768_p6, %p6767_p13 }
  0x4e   : > { %p6765_p1 = pneg %p6764_p2 }
  0x4f   : > { %p6771_p5 = por %p6770_p3, %p6769_p10 }
  0x51   : > { %p6772_p9 = pnand %p6771_p5, %p6765_p1 }
  0x53   : > { %6775 = shalt.err (!%p6772_p9)
}
  0x54   : > { %s6776_s20 = scalar_lea.vmem %s7040_s6, 2048  ;;  %s6869_s29 = smov [#allocation2]  }
  0x55   : > { %p6777_p12 = scmp.ne.s32.totalorder %s7040_s6, %s6776_s20  ;;  %s6781_s5 = sshll.u32 %s6869_s29, 4  ;;  %s6782_s5 = int_to_ptr.vmem [resolvable:$false] %s6781_s5 }
  0x56   : > { %s6783_s12 = scalar_lea.vmem %s6782_s5, 4096  ;;  %p6784_p4 = scmp.lt.s32.totalorder %s7040_s6, %s6782_s5 }
  0x57   : > { %p6779_p2 = pnand %p6777_p12, %p6763_p0  ;;  %p6785_p13 = scmp.lt.s32.totalorder %s6783_s12, %s6776_s20 }
  0x59   : > { %p6780_p7 = pneg %p6779_p2  ;;  %p6786_p6 = por %p6785_p13, %p6784_p4 }
  0x5b   : > { %p6787_p10 = pnand %p6786_p6, %p6780_p7 }
  0x5d   : > { %6790 = shalt.err (!%p6787_p10)
}
  0x5e   : > { %6034 = dma.hbm_to_vmem [thread:$0]  (!%p7042_p11), %s7038_s30, 2048, %s7040_s6, %s7046_s9, %s6867_s7, %s6867_s7, %s6868_s8  }
  0x5f   : > { %207 = sbr.rel (%p6942_p8) target bundleno = 3665 (0xe51), region = 36 }
  0x66   : > { %s7080_s10 = sand.u32 1, %s6853_s16   ;;  %p8961_p4 = scmp.ne.s32.totalorder %s8954_s21, 0 }
  0x67   : > { %s4493_s13 = sshll.u32 %s7080_s10, 7  ;;  %s210_s24 = scalar_lea.sflag [#allocation3], %s7080_s10 }
  0x68   : > { %s7086_s25 = scalar_lea.vmem [#allocation2], %s4493_s13 }
  0x69   : > { %6836 = dma.done.wait (%p8961_p4), %s210_s24, 2048  }
  0x6a   : > { %6838 = vsyncadd (%p8961_p4), %s210_s24, 4294965248  ;;  %p8962_p7 = scmp.eq.s32.totalorder %s6923_s19, 0 }
  0x6c   : > { %6840 = dma.done.wait (%p8962_p7), [#allocation6], 8192   ;;  %p8963_p8 = pmov %p8962_p7 }
  0x6d   : > { %v6870_v0 = vmov 0.0   ;;  %v265_v1 = vld [vmem:[#allocation5 + $0x8] sm:$0xff]  ;;  %v268_v2 = vld [vmem:[#allocation5 + $0x20] sm:$0xff]  ;;  %v267_v5 = vld [vmem:[#allocation5 + $0x18] sm:$0xff]  ;;  %vm653_vm0 = vcmask 261120   ;;  %vm992_vm3 = vcmask 523264  }
  0x6e   : > { %6842 = vsyncadd (%p8963_p8), [#allocation6], 4294959104  ;;  %376 = vmatprep.mubr.f32.mxu0 %v6870_v0  ;;  %424 = vmatprep.mubr.f32.mxu1 %v6870_v0  ;;  %v264_v3 = vld [vmem:[#allocation5] sm:$0xff]  ;;  %v5580_v4 = vpack.c.bf16 %v268_v2, %v265_v1  ;;  %v271_v6 = vld [vmem:[#allocation5 + $0x38] sm:$0xff]  ;;  %s6871_s21 = smov 96   ;;  %s6872_s23 = smov 64  }
  0x6f   : > { %v274_v7 = vld [vmem:[#allocation5 + $0x50] sm:$0xff]  ;;  %v5582_v8 = vpack.c.bf16 %v267_v5, %v264_v3  ;;  %v273_v11 = vld [vmem:[#allocation5 + $0x48] sm:$0xff]  ;;  %v280_v13 = vld [vmem:[#allocation5 + $0x80] sm:$0xff]  ;;  %s6873_s7 = smov 32   ;;  %vm4175_vm11 = vcmask 785408   ;;  %s8845_s6 = scalar_lea.vmem [#allocation8], %s4493_s13 }
  0x70   : > { %v5584_v9 = vpack.c.bf16 %v274_v7, %v271_v6  ;;  %v270_v10 = vld [vmem:[#allocation5 + $0x30] sm:$0xff]  ;;  %v277_v12 = vld [vmem:[#allocation5 + $0x68] sm:$0xff]  ;;  %5581 = vmatprep.subr.bf16.mxu0 %v5580_v4  ;;  %5996 = vmatprep.subr.bf16.mxu1 %v5580_v4  ;;  %v276_v16 = vld [vmem:[#allocation5 + $0x60] sm:$0xff]  ;;  %s4699_s9 = sshll.u32 %s6923_s19, 11  ;;  %s4391_s28 = sshll.u32 %s8845_s6, 4  ;;  %s8868_s28 = int_to_ptr.vmem [resolvable:$true] %s4391_s28 }
  0x71   : > { %5583 = vmatpush1.bf16.msra.mxu0 %v5582_v8  ;;  %6004 = vmatpush1.bf16.msra.mxu1 %v5582_v8  ;;  %v5586_v14 = vpack.c.bf16 %v273_v11, %v270_v10  ;;  %v5588_v15 = vpack.c.bf16 %v280_v13, %v277_v12  ;;  %v279_v17 = vld [vmem:[#allocation5 + $0x78] sm:$0xff]  ;;  %v286_v19 = vld [vmem:[#allocation5 + $0xb0] sm:$0xff]  ;;  %v285_v23 = vld [vmem:[#allocation5 + $0xa8] sm:$0xff]  ;;  %s8866_s29 = scalar_lea.hbm %s8918_s4, %s4699_s9  ;;  %s4377_s5 = scalar_lea.sflag [#allocation4], %s7080_s10 }
  0x72   : > { %5585 = vmatprep.subr.bf16.mxu0 %v5584_v9  ;;  %5997 = vmatprep.subr.bf16.mxu1 %v5584_v9  ;;  %v283_v18 = vld [vmem:[#allocation5 + $0x98] sm:$0xff]  ;;  %v5590_v20 = vpack.c.bf16 %v279_v17, %v276_v16  ;;  %v282_v22 = vld [vmem:[#allocation5 + $0x90] sm:$0xff]  ;;  %v289_v24 = vld [vmem:[#allocation5 + $0xc8] sm:$0xff]  ;;  %s6791_s19 = scalar_lea.vmem %s8868_s28, 2048  ;;  %p9088_p0 = scmp.ne.s32.totalorder %s8959_s26, 0 }
  0x73   : > { %v5592_v21 = vpack.c.bf16 %v286_v19, %v283_v18  ;;  %v292_v25 = vld [vmem:[#allocation5 + $0xe0] sm:$0xff]  ;;  %v5594_v26 = vpack.c.bf16 %v285_v23, %v282_v22  ;;  %v291_v29 = vld [vmem:[#allocation5 + $0xd8] sm:$0xff]  ;;  %v298_v31 = vld [vmem:[#allocation5 + $0x110] sm:$0xff]  ;;  %p6792_p11 = scmp.ne.s32.totalorder %s8868_s28, %s6791_s19  ;;  %s6874_s12 = smov [#allocation8]  }
  0x74   : > { %v5596_v27 = vpack.c.bf16 %v292_v25, %v289_v24  ;;  %v288_v28 = vld [vmem:[#allocation5 + $0xc0] sm:$0xff]  ;;  %v295_v30 = vld [vmem:[#allocation5 + $0xf8] sm:$0xff]  ;;  %v294_v34 = vld [vmem:[#allocation5 + $0xf0] sm:$0xff]  ;;  %s6795_s13 = sshll.u32 %s6874_s12, 4  ;;  %s6796_s13 = int_to_ptr.vmem [resolvable:$false] %s6795_s13 }
  0x75   : > { %5587 = vmatpush1.bf16.msra.mxu0 %v5586_v14  ;;  %6005 = vmatpush1.bf16.msra.mxu1 %v5586_v14  ;;  %v5598_v32 = vpack.c.bf16 %v291_v29, %v288_v28  ;;  %v5600_v33 = vpack.c.bf16 %v298_v31, %v295_v30  ;;  %v297_v35 = vld [vmem:[#allocation5 + $0x108] sm:$0xff]  ;;  %v304_v37 = vld [vmem:[#allocation5 + $0x140] sm:$0xff]  ;;  %v303_v41 = vld [vmem:[#allocation5 + $0x138] sm:$0xff]  ;;  %p6793_p1 = pnand %p6792_p11, %p9088_p0  ;;  %s6797_s24 = scalar_lea.vmem %s6796_s13, 4096 }
  0x76   : > { %5589 = vmatprep.subr.bf16.mxu0 %v5588_v15  ;;  %5998 = vmatprep.subr.bf16.mxu1 %v5588_v15  ;;  %v301_v36 = vld [vmem:[#allocation5 + $0x128] sm:$0xff]  ;;  %v5602_v38 = vpack.c.bf16 %v297_v35, %v294_v34  ;;  %v300_v40 = vld [vmem:[#allocation5 + $0x120] sm:$0xff]  ;;  %v307_v42 = vld [vmem:[#allocation5 + $0x158] sm:$0xff]  ;;  %p6798_p5 = scmp.lt.s32.totalorder %s8868_s28, %s6796_s13  ;;  %p6799_p9 = scmp.lt.s32.totalorder %s6797_s24, %s6791_s19 }
  0x77   : > { %v5604_v39 = vpack.c.bf16 %v304_v37, %v301_v36  ;;  %v310_v43 = vld [vmem:[#allocation5 + $0x170] sm:$0xff]  ;;  %v5606_v44 = vpack.c.bf16 %v303_v41, %v300_v40  ;;  %v309_v47 = vld [vmem:[#allocation5 + $0x168] sm:$0xff]  ;;  %v272_v52 = vld [vmem:[#allocation5 + $0x40] sm:$0xff]  ;;  %p6794_p3 = pneg %p6793_p1 }
  0x78   : > { %v5608_v45 = vpack.c.bf16 %v310_v43, %v307_v42  ;;  %v306_v46 = vld [vmem:[#allocation5 + $0x150] sm:$0xff]  ;;  %v269_v49 = vld [vmem:[#allocation5 + $0x28] sm:$0xff]  ;;  %v275_v53 = vld [vmem:[#allocation5 + $0x58] sm:$0xff]  ;;  %p6800_p12 = por %p6799_p9, %p6798_p5 }
  0x79   : > { %5591 = vmatpush1.bf16.msra.mxu0 %v5590_v20  ;;  %6006 = vmatpush1.bf16.msra.mxu1 %v5590_v20  ;;  %v266_v48 = vld [vmem:[#allocation5 + $0x10] sm:$0xff]  ;;  %v5610_v50 = vpack.c.bf16 %v309_v47, %v306_v46  ;;  %v7099_v54 = vld [vmem:[%s7086_s25] sm:$0xff]  ;;  %v5616_v56 = vpack.c.bf16 %v275_v53, %v272_v52  ;;  %v281_v58 = vld [vmem:[#allocation5 + $0x88] sm:$0xff] }
  0x7a   : > { %5593 = vmatprep.subr.bf16.mxu0 %v5592_v21  ;;  %5999 = vmatprep.subr.bf16.mxu1 %v5592_v21  ;;  %v5612_v51 = vpack.c.bf16 %v269_v49, %v266_v48  ;;  %v7102_v55 = vld [vmem:[%s7086_s25 + $0x40] sm:$0xff]  ;;  %v278_v57 = vld [vmem:[#allocation5 + $0x70] sm:$0xff]  ;;  %v7109_v59 = vld [vmem:[%s7086_s25 + $0x8] sm:$0xff]  ;;  %p6801_p2 = pnand %p6800_p12, %p6794_p3 }
  0x7b   : > { %v7112_v60 = vld [vmem:[%s7086_s25 + $0x48] sm:$0xff]  ;;  %v5620_v61 = vpack.c.bf16 %v281_v58, %v278_v57  ;;  %v284_v62 = vld [vmem:[#allocation5 + $0xa0] sm:$0xff]  ;;  %v287_v63 = vld [vmem:[#allocation5 + $0xb8] sm:$0xff] }
  0x7c   : > { %v250_v1 = vld [vmem:[%s7086_s25 + $0x10] sm:$0xff]  ;;  %v5624_v3 = vpack.c.bf16 %v287_v63, %v284_v62  ;;  %v293_v5 = vld [vmem:[#allocation5 + $0xe8] sm:$0xff]  ;;  %v251_v6 = vld [vmem:[%s7086_s25 + $0x18] sm:$0xff] }
  0x7d   : > { %5595 = vmatpush1.bf16.msra.mxu0 %v5594_v26  ;;  %6007 = vmatpush1.bf16.msra.mxu1 %v5594_v26  ;;  %v7120_v2 = vld [vmem:[%s7086_s25 + $0x50] sm:$0xff]  ;;  %v259_v7 = vld [vmem:[%s7086_s25 + $0x58] sm:$0xff]  ;;  %v296_v9 = vld [vmem:[#allocation5 + $0x100] sm:$0xff] }
  0x7e   : > { %5597 = vmatprep.subr.bf16.mxu0 %v5596_v27  ;;  %6000 = vmatprep.subr.bf16.mxu1 %v5596_v27  ;;  %v290_v4 = vld [vmem:[#allocation5 + $0xd0] sm:$0xff]  ;;  %v299_v10 = vld [vmem:[#allocation5 + $0x118] sm:$0xff]  ;;  %v252_v11 = vld [vmem:[%s7086_s25 + $0x20] sm:$0xff] }
  0x7f   : > { %v5628_v8 = vpack.c.bf16 %v293_v5, %v290_v4  ;;  %v260_v12 = vld [vmem:[%s7086_s25 + $0x60] sm:$0xff]  ;;  %v5632_v13 = vpack.c.bf16 %v299_v10, %v296_v9  ;;  %v302_v14 = vld [vmem:[#allocation5 + $0x130] sm:$0xff]  ;;  %v305_v15 = vld [vmem:[#allocation5 + $0x148] sm:$0xff] }
  0x80   : > { %v253_v16 = vld [vmem:[%s7086_s25 + $0x28] sm:$0xff]  ;;  %v5636_v18 = vpack.c.bf16 %v305_v15, %v302_v14  ;;  %v308_v19 = vld [vmem:[#allocation5 + $0x160] sm:$0xff]  ;;  %v311_v20 = vld [vmem:[#allocation5 + $0x178] sm:$0xff] }
  0x81   : > { %5599 = vmatpush1.bf16.msra.mxu0 %v5598_v32  ;;  %6008 = vmatpush1.bf16.msra.mxu1 %v5598_v32  ;;  %v261_v17 = vld [vmem:[%s7086_s25 + $0x68] sm:$0xff]  ;;  %v254_v21 = vld [vmem:[%s7086_s25 + $0x30] sm:$0xff]  ;;  %v5640_v23 = vpack.c.bf16 %v311_v20, %v308_v19  ;;  %v255_v24 = vld [vmem:[%s7086_s25 + $0x38] sm:$0xff] }
  0x82   : > { %5601 = vmatprep.subr.bf16.mxu0 %v5600_v33  ;;  %6001 = vmatprep.subr.bf16.mxu1 %v5600_v33  ;;  %v262_v22 = vld [vmem:[%s7086_s25 + $0x70] sm:$0xff]  ;;  %v263_v25 = vld [vmem:[%s7086_s25 + $0x78] sm:$0xff]  ;;  %vm7162_vm1 = vmpackc.low %vm653_vm0, %vm653_vm0 }
  0x85   : > { %5603 = vmatpush1.bf16.msra.mxu0 %v5602_v38  ;;  %6009 = vmatpush1.bf16.msra.mxu1 %v5602_v38 }
  0x86   : > { %5605 = vmatprep.subr.bf16.mxu0 %v5604_v39  ;;  %6002 = vmatprep.subr.bf16.mxu1 %v5604_v39 }
  0x89   : > { %5607 = vmatpush1.bf16.msra.mxu0 %v5606_v44  ;;  %6010 = vmatpush1.bf16.msra.mxu1 %v5606_v44 }
  0x8a   : > { %5609 = vmatprep.subr.bf16.mxu0 %v5608_v45  ;;  %6003 = vmatprep.subr.bf16.mxu1 %v5608_v45 }
  0x8d   : > { %5611 = vmatpush1.bf16.msra.mxu0 %v5610_v50  ;;  %6011 = vmatpush1.bf16.msra.mxu1 %v5610_v50 }
  0x8e   : > { %5613 = vmatprep.subr.bf16.mxu1 %v5612_v51 }
  0x90   : > { %377 = vmatmul.mubr.f32.vlgmr.msra.gmra.mrb[0].mxu0 %v7099_v54  ;;  %425 = vmatmul.mubr.f32.vlgmr.msra.gmra.mrb[0].mxu1 %v7102_v55 }
  0x91   : > { %382 = vmatprep.mubr.f32.mxu0 %v6870_v0  ;;  %430 = vmatprep.mubr.f32.mxu1 %v6870_v0 }
  0x92   : > { %5615 = vmatpush3.bf16.msra.mxu1 %v5612_v51 }
  0x93   : > { %5617 = vmatprep.subr.bf16.mxu1 %v5616_v56 }
  0x94   : > { %383 = vmatmul.mubr.f32.gmra.mrb[2].mxu0 %v7109_v59  ;;  %431 = vmatmul.mubr.f32.gmra.mrb[2].mxu1 %v7112_v60 }
  0x95   : > { %388 = vmatprep.mubr.f32.mxu0 %v6870_v0  ;;  %436 = vmatprep.mubr.f32.mxu1 %v6870_v0 }
  0x96   : > { %5619 = vmatpush3.bf16.msra.mxu1 %v5616_v56 }
  0x97   : > { %5621 = vmatprep.subr.bf16.mxu1 %v5620_v61 }
  0x98   : > { %389 = vmatmul.mubr.f32.gmra.mrb[4].mxu0 %v250_v1  ;;  %437 = vmatmul.mubr.f32.gmra.mrb[4].mxu1 %v7120_v2 }
  0x99   : > { %394 = vmatprep.mubr.f32.mxu0 %v6870_v0  ;;  %442 = vmatprep.mubr.f32.mxu1 %v6870_v0 }
  0x9a   : > { %5623 = vmatpush3.bf16.msra.mxu1 %v5620_v61 }
  0x9b   : > { %5625 = vmatprep.subr.bf16.mxu1 %v5624_v3 }
  0x9c   : > { %395 = vmatmul.mubr.f32.gmra.mrb[6].mxu0 %v251_v6  ;;  %443 = vmatmul.mubr.f32.gmra.mrb[6].mxu1 %v259_v7 }
  0x9d   : > { %400 = vmatprep.mubr.f32.mxu0 %v6870_v0  ;;  %448 = vmatprep.mubr.f32.mxu1 %v6870_v0 }
  0x9e   : > { %5627 = vmatpush3.bf16.msra.mxu1 %v5624_v3 }
  0x9f   : > { %5629 = vmatprep.subr.bf16.mxu1 %v5628_v8 }
  0xa0   : > { %401 = vmatmul.mubr.f32.gmra.mrb[8].mxu0 %v252_v11  ;;  %449 = vmatmul.mubr.f32.gmra.mrb[8].mxu1 %v260_v12 }
  0xa1   : > { %406 = vmatprep.mubr.f32.mxu0 %v6870_v0  ;;  %454 = vmatprep.mubr.f32.mxu1 %v6870_v0 }
  0xa2   : > { %5631 = vmatpush3.bf16.msra.mxu1 %v5628_v8 }
  0xa3   : > { %5633 = vmatprep.subr.bf16.mxu1 %v5632_v13 }
  0xa4   : > { %407 = vmatmul.mubr.f32.gmra.mrb[10].mxu0 %v253_v16  ;;  %455 = vmatmul.mubr.f32.gmra.mrb[10].mxu1 %v261_v17 }
  0xa5   : > { %412 = vmatprep.mubr.f32.mxu0 %v6870_v0  ;;  %460 = vmatprep.mubr.f32.mxu1 %v6870_v0 }
  0xa6   : > { %5635 = vmatpush3.bf16.msra.mxu1 %v5632_v13 }
  0xa7   : > { %5637 = vmatprep.subr.bf16.mxu1 %v5636_v18 }
  0xa8   : > { %413 = vmatmul.mubr.f32.gmra.mrb[12].mxu0 %v254_v21  ;;  %461 = vmatmul.mubr.f32.gmra.mrb[12].mxu1 %v262_v22 }
  0xa9   : > { %418 = vmatprep.mubr.f32.mxu0 %v6870_v0  ;;  %466 = vmatprep.mubr.f32.mxu1 %v6870_v0 }
  0xaa   : > { %5639 = vmatpush3.bf16.msra.mxu1 %v5636_v18 }
  0xab   : > { %5641 = vmatprep.subr.bf16.mxu1 %v5640_v23 }
  0xac   : > { %419 = vmatmul.mubr.f32.gmra.mrb[14].mxu0 %v255_v24  ;;  %467 = vmatmul.mubr.f32.gmra.mrb[14].mxu1 %v263_v25 }
  0xad   : > { %5052 = vmatprep.mubr.f32.mxu1 %v7099_v54 }
  0xae   : > { %5643 = vmatpush3.bf16.msra.mxu1 %v5640_v23 }
  0xb1   : > { %5053 = vmatmul.mubr.f32.vlgmr.msra.gmra.mrb[16].mxu1 %v7109_v59 }
  0xb2   : > { %5055 = vmatprep.mubr.f32.mxu1 %v250_v1 }
  0xb5   : > { %5056 = vmatmul.mubr.f32.gmra.mrb[18].mxu1 %v251_v6 }
  0xb6   : > { %5058 = vmatprep.mubr.f32.mxu1 %v252_v11 }
  0xb9   : > { %5059 = vmatmul.mubr.f32.gmra.mrb[20].mxu1 %v253_v16 }
  0xba   : > { %5061 = vmatprep.mubr.f32.mxu1 %v254_v21 }
  0xbd   : > { %5062 = vmatmul.mubr.f32.gmra.mrb[22].mxu1 %v255_v24 }
  0xbe   : > { %5064 = vmatprep.mubr.f32.mxu1 %v7102_v55 }
  0xc1   : > { %5065 = vmatmul.mubr.f32.gmra.mrb[24].mxu1 %v7112_v60 }
  0xc2   : > { %5067 = vmatprep.mubr.f32.mxu1 %v7120_v2 }
  0xc5   : > { %5068 = vmatmul.mubr.f32.gmra.mrb[26].mxu1 %v259_v7 }
  0xc6   : > { %5070 = vmatprep.mubr.f32.mxu1 %v260_v12 }
  0xc9   : > { %5071 = vmatmul.mubr.f32.gmra.mrb[28].mxu1 %v261_v17 }
  0xca   : > { %5073 = vmatprep.mubr.f32.mxu1 %v262_v22 }
  0xcd   : > { %5074 = vmatmul.mubr.f32.gmra.mrb[30].mxu1 %v263_v25 }
 0x163   : > { %v378_v0 = vpop.f32.mrb[0].mxu0  ;;  %v426_v26 = vpop.f32.mrb[0].mxu1 }
 0x164   : > { %v7148_v27 = vmul.f32 0.088388346, %v378_v0  ;;  %v7150_v28 = vmul.f32 0.088388346, %v426_v26  ;;  %v380_v29 = vpop.f32.mrb[1].mxu0  ;;  %v428_v30 = vpop.f32.mrb[1].mxu1 }
 0x166   : > { %5092 = vmatprep.mubr.msk.f32.mxu1 %vm653_vm0, %v7148_v27  ;;  %5120 = vmatprep.mubr.msk.f32.mxu0 %vm653_vm0, %v7150_v28 }
 0x167   : > { %v7156_v31 = vpop.f32.mrb[2].mxu0  ;;  %v7158_v32 = vpop.f32.mrb[2].mxu1 }
 0x168   : > { %v386_v33 = vpop.f32.mrb[3].mxu0  ;;  %v434_v34 = vpop.f32.mrb[3].mxu1  ;;  %v7219_v18 = vmul.f32 0.088388346, %v7156_v31  ;;  %v7222_v19 = vmul.f32 0.088388346, %v7158_v32 }
 0x169   : > { %v7166_v36 = vpack.i.bf16 %v386_v33, %v380_v29  ;;  %v5644_v37 = vpack.c.bf16 %v386_v33, %v380_v29  ;;  %v7168_v38 = vpack.i.bf16 %v434_v34, %v428_v30  ;;  %v5668_v39 = vpack.c.bf16 %v434_v34, %v428_v30 }
 0x16b   : > { %8966 = vst [vmem:[#allocation12_spill] sm:$0xff] %v7166_v36  ;;  %8967 = vst [vmem:[#allocation13_spill] sm:$0xff] %v7168_v38  ;;  %v390_v40 = vpop.f32.mrb[4].mxu0  ;;  %v7170_v41 = vpop.f32.mrb[4].mxu1  ;;  %5646 = vmatprep.subr.msk.bf16.mxu1 %vm7162_vm1, %v5644_v37  ;;  %5670 = vmatprep.subr.msk.bf16.mxu0 %vm7162_vm1, %v5668_v39 }
 0x16c   : > { %v392_v42 = vpop.f32.mrb[5].mxu0  ;;  %v440_v43 = vpop.f32.mrb[5].mxu1  ;;  %5649 = vmatpush3.bf16.xpose.msk.msra.mxu1 %vm7162_vm1, %v5644_v37  ;;  %5673 = vmatpush3.bf16.xpose.msk.msra.mxu0 %vm7162_vm1, %v5668_v39  ;;  %v7224_v21 = vmul.f32 0.088388346, %v390_v40  ;;  %v7229_v24 = vmul.f32 0.088388346, %v7170_v41 }
 0x16f   : > { %v396_v44 = vpop.f32.mrb[6].mxu0  ;;  %v444_v45 = vpop.f32.mrb[6].mxu1 }
 0x170   : > { %v398_v46 = vpop.f32.mrb[7].mxu0  ;;  %v446_v47 = vpop.f32.mrb[7].mxu1  ;;  %v7237_v0 = vmul.f32 0.088388346, %v396_v44  ;;  %v7239_v26 = vmul.f32 0.088388346, %v444_v45 }
 0x171   : > { %v7180_v48 = vpack.i.bf16 %v398_v46, %v392_v42  ;;  %v5650_v49 = vpack.c.bf16 %v398_v46, %v392_v42  ;;  %v7182_v50 = vpack.i.bf16 %v446_v47, %v440_v43  ;;  %v5674_v51 = vpack.c.bf16 %v446_v47, %v440_v43 }
 0x173   : > { %8968 = vst [vmem:[#allocation14_spill] sm:$0xff] %v7180_v48  ;;  %v402_v52 = vpop.f32.mrb[8].mxu0  ;;  %v450_v53 = vpop.f32.mrb[8].mxu1  ;;  %5652 = vmatprep.subr.msk.bf16.mxu1 %vm7162_vm1, %v5650_v49  ;;  %5676 = vmatprep.subr.msk.bf16.mxu0 %vm7162_vm1, %v5674_v51 }
 0x174   : > { %v404_v54 = vpop.f32.mrb[9].mxu0  ;;  %v452_v55 = vpop.f32.mrb[9].mxu1  ;;  %5655 = vmatpush3.bf16.xpose.msk.msra.mxu1 %vm7162_vm1, %v5650_v49  ;;  %5679 = vmatpush3.bf16.xpose.msk.msra.mxu0 %vm7162_vm1, %v5674_v51  ;;  %v7243_v30 = vmul.f32 0.088388346, %v402_v52  ;;  %v7247_v33 = vmul.f32 0.088388346, %v450_v53 }
 0x177   : > { %v408_v56 = vpop.f32.mrb[10].mxu0  ;;  %v456_v57 = vpop.f32.mrb[10].mxu1 }
 0x178   : > { %v410_v58 = vpop.f32.mrb[11].mxu0  ;;  %v458_v59 = vpop.f32.mrb[11].mxu1  ;;  %v7255_v37 = vmul.f32 0.088388346, %v408_v56  ;;  %v7257_v39 = vmul.f32 0.088388346, %v456_v57 }
 0x179   : > { %v7192_v60 = vpack.i.bf16 %v410_v58, %v404_v54  ;;  %v5656_v61 = vpack.c.bf16 %v410_v58, %v404_v54  ;;  %v7194_v62 = vpack.i.bf16 %v458_v59, %v452_v55  ;;  %v5680_v63 = vpack.c.bf16 %v458_v59, %v452_v55 }
 0x17b   : > { %8969 = vst [vmem:[#allocation15_spill] sm:$0xff] %v7192_v60  ;;  %v414_v1 = vpop.f32.mrb[12].mxu0  ;;  %v462_v2 = vpop.f32.mrb[12].mxu1  ;;  %5658 = vmatprep.subr.msk.bf16.mxu1 %vm7162_vm1, %v5656_v61  ;;  %5682 = vmatprep.subr.msk.bf16.mxu0 %vm7162_vm1, %v5680_v63 }
 0x17c   : > { %v416_v3 = vpop.f32.mrb[13].mxu0  ;;  %v464_v4 = vpop.f32.mrb[13].mxu1  ;;  %5661 = vmatpush3.bf16.xpose.msk.msra.mxu1 %vm7162_vm1, %v5656_v61  ;;  %5685 = vmatpush3.bf16.xpose.msk.msra.mxu0 %vm7162_vm1, %v5680_v63  ;;  %v7261_v41 = vmul.f32 0.088388346, %v414_v1  ;;  %v7265_v44 = vmul.f32 0.088388346, %v462_v2 }
 0x17f   : > { %v420_v5 = vpop.f32.mrb[14].mxu0  ;;  %v468_v6 = vpop.f32.mrb[14].mxu1 }
 0x180   : > { %v422_v7 = vpop.f32.mrb[15].mxu0  ;;  %v470_v8 = vpop.f32.mrb[15].mxu1  ;;  %v7273_v46 = vmul.f32 0.088388346, %v420_v5  ;;  %v7277_v49 = vmul.f32 0.088388346, %v468_v6 }
 0x181   : > { %v7204_v9 = vpack.i.bf16 %v422_v7, %v416_v3  ;;  %v5662_v10 = vpack.c.bf16 %v422_v7, %v416_v3  ;;  %v7206_v11 = vpack.i.bf16 %v470_v8, %v464_v4  ;;  %v5686_v12 = vpack.c.bf16 %v470_v8, %v464_v4 }
 0x182   : > { %v634_v4 = vlaneseq }
 0x183   : > { %5664 = vmatprep.subr.msk.bf16.mxu1 %vm7162_vm1, %v5662_v10  ;;  %5688 = vmatprep.subr.msk.bf16.mxu0 %vm7162_vm1, %v5686_v12 }
 0x184   : > { %5667 = vmatpush3.bf16.xpose.msk.msra.mxu1 %vm7162_vm1, %v5662_v10  ;;  %v5054_v13 = vpop.f32.mrb[16].mxu1  ;;  %5691 = vmatpush3.bf16.xpose.msk.msra.mxu0 %vm7162_vm1, %v5686_v12  ;;  %v635_v5 = vshrl.u32 %v634_v4, 7  ;;  %v7300_v7 = vand.u32 127, %v634_v4 }
 0x185   : > { %v539_v14 = vpop.f32.mrb[17].mxu1 }
 0x186   : > { %v7216_v15 = vpack.i.bf16 %v5054_v13, %v539_v14  ;;  %v5692_v16 = vpack.c.bf16 %v5054_v13, %v539_v14  ;;  %v636_v6 = vadd.s32 8, %v635_v5  ;;  %v638_v10 = vadd.s32 24, %v635_v5 }
 0x187   : > { %vm7308_vm4 = vcmp.le.s32.totalorder %v7300_v7, %v635_v5 }
 0x188   : > { %8970 = vst [vmem:[#allocation16_spill] sm:$0xff] %v7216_v15  ;;  %v5057_v17 = vpop.f32.mrb[18].mxu1  ;;  %5693 = vmatprep.subr.bf16.mxu1 %v5692_v16  ;;  %vm7303_vm2 = vcmp.le.s32.totalorder %v7300_v7, %v636_v6  ;;  %vm7323_vm5 = vcmp.le.s32.totalorder %v7300_v7, %v638_v10  ;;  %v639_v10 = vadd.s32 32, %v635_v5 }
 0x189   : > { %v549_v20 = vpop.f32.mrb[19].mxu1 }
 0x18a   : > { %v7226_v22 = vpack.i.bf16 %v5057_v17, %v549_v20  ;;  %v5696_v23 = vpack.c.bf16 %v5057_v17, %v549_v20  ;;  %vm7367_vm7 = vcmp.le.s32.totalorder %v7300_v7, %v639_v10 }
 0x18b   : > { %5093 = vmatmul.mubr.msk.f32.vlgmr.msra.gmra.mrb[32].mxu1 %vm653_vm0, %v7219_v18  ;;  %5121 = vmatmul.mubr.msk.f32.vlgmr.msra.gmra.mrb[16].mxu0 %vm653_vm0, %v7222_v19 }
 0x18c   : > { %8971 = vst [vmem:[#allocation17_spill] sm:$0xff] %v7226_v22  ;;  %5095 = vmatprep.mubr.msk.f32.mxu1 %vm653_vm0, %v7224_v21  ;;  %v5060_v25 = vpop.f32.mrb[20].mxu1  ;;  %5123 = vmatprep.mubr.msk.f32.mxu0 %vm653_vm0, %v7229_v24 }
 0x18d   : > { %5695 = vmatpush3.bf16.msra.mxu1 %v5692_v16  ;;  %v559_v29 = vpop.f32.mrb[21].mxu1 }
 0x18e   : > { %5697 = vmatprep.subr.bf16.mxu1 %v5696_v23  ;;  %v7245_v31 = vpack.i.bf16 %v5060_v25, %v559_v29  ;;  %v5700_v32 = vpack.c.bf16 %v5060_v25, %v559_v29 }
 0x18f   : > { %5096 = vmatmul.mubr.msk.f32.gmra.mrb[34].mxu1 %vm653_vm0, %v7237_v0  ;;  %5124 = vmatmul.mubr.msk.f32.gmra.mrb[18].mxu0 %vm653_vm0, %v7239_v26 }
 0x190   : > { %8972 = vst [vmem:[#allocation18_spill] sm:$0xff] %v7245_v31  ;;  %5098 = vmatprep.mubr.msk.f32.mxu1 %vm653_vm0, %v7243_v30  ;;  %v5063_v34 = vpop.f32.mrb[22].mxu1  ;;  %5126 = vmatprep.mubr.msk.f32.mxu0 %vm653_vm0, %v7247_v33 }
 0x191   : > { %5699 = vmatpush3.bf16.msra.mxu1 %v5696_v23  ;;  %v569_v40 = vpop.f32.mrb[23].mxu1 }
 0x192   : > { %5701 = vmatprep.subr.bf16.mxu1 %v5700_v32  ;;  %v7263_v42 = vpack.i.bf16 %v5063_v34, %v569_v40  ;;  %v5704_v43 = vpack.c.bf16 %v5063_v34, %v569_v40 }
 0x193   : > { %5099 = vmatmul.mubr.msk.f32.gmra.mrb[36].mxu1 %vm653_vm0, %v7255_v37  ;;  %5127 = vmatmul.mubr.msk.f32.gmra.mrb[20].mxu0 %vm653_vm0, %v7257_v39 }
 0x194   : > { %8973 = vst [vmem:[#allocation19_spill] sm:$0xff] %v7263_v42  ;;  %5101 = vmatprep.mubr.msk.f32.mxu1 %vm653_vm0, %v7261_v41  ;;  %v5066_v45 = vpop.f32.mrb[24].mxu1  ;;  %5129 = vmatprep.mubr.msk.f32.mxu0 %vm653_vm0, %v7265_v44 }
 0x195   : > { %5703 = vmatpush3.bf16.msra.mxu1 %v5700_v32  ;;  %v579_v47 = vpop.f32.mrb[25].mxu1 }
 0x196   : > { %5705 = vmatprep.subr.bf16.mxu1 %v5704_v43  ;;  %v7279_v51 = vpack.i.bf16 %v5066_v45, %v579_v47  ;;  %v7281_v52 = vpack.c.bf16 %v5066_v45, %v579_v47 }
 0x197   : > { %5102 = vmatmul.mubr.msk.f32.gmra.mrb[38].mxu1 %vm653_vm0, %v7273_v46  ;;  %5130 = vmatmul.mubr.msk.f32.gmra.mrb[22].mxu0 %vm653_vm0, %v7277_v49 }
 0x198   : > { %8974 = vst [vmem:[#allocation20_spill] sm:$0xff] %v7279_v51  ;;  %v5069_v53 = vpop.f32.mrb[26].mxu1 }
 0x199   : > { %5707 = vmatpush3.bf16.msra.mxu1 %v5704_v43  ;;  %v589_v54 = vpop.f32.mrb[27].mxu1  ;;  %v637_v43 = vadd.s32 16, %v635_v5 }
 0x19a   : > { %5709 = vmatprep.subr.bf16.mxu1 %v7281_v52  ;;  %v7288_v55 = vpack.i.bf16 %v5069_v53, %v589_v54  ;;  %v7294_v1 = vpack.c.bf16 %v5069_v53, %v589_v54 }
 0x19b   : > { %vm7350_vm6 = vcmp.le.s32.totalorder %v7300_v7, %v637_v43 }
 0x19c   : > { %8975 = vst [vmem:[#allocation21_spill] sm:$0xff] %v7288_v55  ;;  %v5072_v56 = vpop.f32.mrb[28].mxu1 }
 0x19d   : > { %v599_v57 = vpop.f32.mrb[29].mxu1 }
 0x19e   : > { %v7290_v58 = vpack.i.bf16 %v5072_v56, %v599_v57  ;;  %v7296_v2 = vpack.c.bf16 %v5072_v56, %v599_v57 }
 0x1a0   : > { %8976 = vst [vmem:[#allocation22_spill] sm:$0xff] %v7290_v58  ;;  %v5075_v59 = vpop.f32.mrb[30].mxu1 }
 0x1a1   : > { %v609_v61 = vpop.f32.mrb[31].mxu1 }
 0x1a2   : > { %v7292_v63 = vpack.i.bf16 %v5075_v59, %v609_v61  ;;  %v7298_v3 = vpack.c.bf16 %v5075_v59, %v609_v61 }
 0x1a4   : > { %8977 = vst [vmem:[#allocation23_spill] sm:$0xff] %v7292_v63  ;;  %v642_v63 = vadd.s32 56, %v635_v5 }
 0x1a6   : > { %vm7406_vm10 = vcmp.le.s32.totalorder %v7300_v7, %v642_v63 }
 0x25e   : > { %v5094_v12 = vpop.f32.mrb[32].mxu1  ;;  %v5122_v16 = vpop.f32.mrb[16].mxu0 }
 0x25f   : > { %v7314_v14 = vsel %vm7303_vm2, %v5094_v12, -inf  ;;  %v768_v17 = vpop.f32.mrb[33].mxu1  ;;  %v7318_v20 = vsel %vm7303_vm2, %v5122_v16, -inf  ;;  %v921_v23 = vpop.f32.mrb[17].mxu0  ;;  %v640_v12 = vadd.s32 40, %v635_v5 }
 0x260   : > { %v996_v25 = vsel %vm992_vm3, %v7314_v14, -inf  ;;  %v7329_v32 = vsel %vm7308_vm4, %v768_v17, -inf  ;;  %v1020_v34 = vsel %vm992_vm3, %v7318_v20, -inf  ;;  %v7343_v59 = vsel %vm7308_vm4, %v921_v23, -inf }
 0x261   : > { %997 = vmax.xlane.f32.xlu0 %v996_v25  ;;  %1021 = vmax.xlane.f32.xlu1 %v1020_v34  ;;  %v993_v56 = vsel %vm992_vm3, %v7329_v32, -inf  ;;  %v1017_v23 = vsel %vm992_vm3, %v7343_v59, -inf  ;;  %vm7372_vm8 = vcmp.le.s32.totalorder %v7300_v7, %v640_v12 }
 0x262   : > { %v5097_v40 = vpop.f32.mrb[34].mxu1  ;;  %v5125_v47 = vpop.f32.mrb[18].mxu0 }
 0x263   : > { %v7335_v45 = vsel %vm7323_vm5, %v5097_v40, -inf  ;;  %v778_v53 = vpop.f32.mrb[35].mxu1  ;;  %v931_v54 = vpop.f32.mrb[19].mxu0  ;;  %v7347_v61 = vsel %vm7323_vm5, %v5125_v47, -inf }
 0x264   : > { %v1002_v57 = vsel %vm992_vm3, %v7335_v45, -inf  ;;  %v7358_v34 = vsel %vm7350_vm6, %v931_v54, -inf  ;;  %v1026_v40 = vsel %vm992_vm3, %v7347_v61, -inf  ;;  %v7364_v43 = vsel %vm7350_vm6, %v778_v53, -inf }
 0x265   : > { %994 = vmax.xlane.f32.xlu0 %v993_v56  ;;  %1003 = vmax.xlane.f32.xlu1 %v1002_v57  ;;  %v1023_v51 = vsel %vm992_vm3, %v7358_v34, -inf  ;;  %v999_v10 = vsel %vm992_vm3, %v7364_v43, -inf }
 0x266   : > { %v5100_v6 = vpop.f32.mrb[36].mxu1  ;;  %v5128_v16 = vpop.f32.mrb[20].mxu0 }
 0x267   : > { %v788_v17 = vpop.f32.mrb[37].mxu1  ;;  %v941_v25 = vpop.f32.mrb[21].mxu0  ;;  %v7386_v12 = vsel %vm7372_vm8, %v5100_v6, -inf  ;;  %v8990_v6 = vmov 0 }
 0x268   : > { %v7380_v53 = vsel %vm7367_vm7, %v788_v17, -inf  ;;  %v7392_v55 = vsel %vm7367_vm7, %v941_v25, -inf  ;;  %v7398_v17 = vsel %vm7372_vm8, %v5128_v16, -inf }
 0x269   : > { %1018 = vmax.xlane.f32.xlu0 %v1017_v23  ;;  %1027 = vmax.xlane.f32.xlu1 %v1026_v40  ;;  %v641_v40 = vadd.s32 48, %v635_v5  ;;  %v1005_v42 = vsel %vm992_vm3, %v7380_v53, -inf  ;;  %v8993_v5 = vmov 0  ;;  %v1029_v25 = vsel %vm992_vm3, %v7392_v55, -inf }
 0x26a   : > { %v5103_v56 = vpop.f32.mrb[38].mxu1  ;;  %v5131_v54 = vpop.f32.mrb[22].mxu0  ;;  %v8994_v5 = vsel %vm7406_vm10, 4294967295, %v8993_v5  ;;  %v1032_v16 = vsel %vm992_vm3, %v7398_v17, -inf }
 0x26b   : > { %v798_v23 = vpop.f32.mrb[39].mxu1  ;;  %v951_v58 = vpop.f32.mrb[23].mxu0  ;;  %vm7401_vm9 = vcmp.le.s32.totalorder %v7300_v7, %v641_v40  ;;  %8995 = vst [vmem:[#allocation25_spill] sm:$0xff] %v8994_v5 }
 0x26c   : > { %v8991_v6 = vsel %vm7401_vm9, 4294967295, %v8990_v6 }
 0x26d   : > { %1024 = vmax.xlane.f32.xlu0 %v1023_v51  ;;  %1000 = vmax.xlane.f32.xlu1 %v999_v10  ;;  %v1008_v51 = vsel %vm992_vm3, %v7386_v12, -inf  ;;  %8992 = vst [vmem:[#allocation24_spill] sm:$0xff] %v8991_v6  ;;  %v7420_v10 = vsel %vm7406_vm10, %v5103_v56, -inf  ;;  %v7438_v56 = vsel %vm7401_vm9, %v951_v58, -inf }
 0x26e   : > { %v1014_v7 = vsel %vm992_vm3, %v7420_v10, -inf }
 0x271   : > { %1006 = vmax.xlane.f32.xlu0 %v1005_v42  ;;  %1009 = vmax.xlane.f32.xlu1 %v1008_v51  ;;  %v7414_v42 = vsel %vm7401_vm9, %v798_v23, -inf  ;;  %v7428_v23 = vsel %vm7406_vm10, %v5131_v54, -inf  ;;  %v1035_v54 = vsel %vm992_vm3, %v7438_v56, -inf }
 0x272   : > { %v1011_v63 = vsel %vm992_vm3, %v7414_v42, -inf  ;;  %v1038_v40 = vsel %vm992_vm3, %v7428_v23, -inf }
 0x275   : > { %1030 = vmax.xlane.f32.xlu0 %v1029_v25  ;;  %1033 = vmax.xlane.f32.xlu1 %v1032_v16 }
 0x279   : > { %1012 = vmax.xlane.f32.xlu0 %v1011_v63  ;;  %1015 = vmax.xlane.f32.xlu1 %v1014_v7 }
 0x27d   : > { %1039 = vmax.xlane.f32.xlu1 %v1038_v40 }
 0x28e   : > { %6095 = vrot.lane.b32.xlu1 %v7180_v48, %s6871_s21 }
 0x28f   : > { %6090 = vrot.lane.b32.xlu0 %v7166_v36, %s6871_s21 }
 0x2ae   : > { %1036 = vmax.xlane.f32.xlu0 %v1035_v54 }
 0x2ee   : > { %v998_v51 = vpop.xlane.xlu0 %997  ;;  %v1022_v25 = vpop.xlane.xlu1 %1021 }
 0x2ef   : > { %v1042_v16 = vsub.f32 %v7314_v14, %v998_v51  ;;  %v1050_v63 = vsub.f32 %v7318_v20, %v1022_v25 }
 0x2f1   : > { %v1059_v7 = vmul.f32 1.442695, %v1042_v16  ;;  %v1075_v40 = vmul.f32 1.442695, %v1050_v63 }
 0x2f2   : > { %v995_v48 = vpop.xlane.xlu0 %994  ;;  %v1004_v15 = vpop.xlane.xlu1 %1003 }
 0x2f3   : > { %6449 = vpow2.f32 %v1059_v7  ;;  %v1041_v36 = vsub.f32 %v7329_v32, %v995_v48  ;;  %v1044_v58 = vsub.f32 %v7335_v45, %v1004_v15 }
 0x2f4   : > { %6451 = vpow2.f32 %v1075_v40 }
 0x2f5   : > { %v1057_v31 = vmul.f32 1.442695, %v1041_v36  ;;  %v1063_v22 = vmul.f32 1.442695, %v1044_v58 }
 0x2f6   : > { %v1019_v6 = vpop.xlane.xlu0 %1018  ;;  %v1028_v5 = vpop.xlane.xlu1 %1027 }
 0x2f7   : > { %6453 = vpow2.f32 %v1057_v31  ;;  %v1049_v54 = vsub.f32 %v7343_v59, %v1019_v6  ;;  %v1052_v14 = vsub.f32 %v7347_v61, %v1028_v5 }
 0x2f8   : > { %6455 = vpow2.f32 %v1063_v22 }
 0x2f9   : > { %v1073_v20 = vmul.f32 1.442695, %v1049_v54  ;;  %v1079_v51 = vmul.f32 1.442695, %v1052_v14 }
 0x2fa   : > { %v1025_v25 = vpop.xlane.xlu0 %1024  ;;  %v1001_v32 = vpop.xlane.xlu1 %1000 }
 0x2fb   : > { %6457 = vpow2.f32 %v1073_v20  ;;  %v1051_v48 = vsub.f32 %v7358_v34, %v1025_v25  ;;  %v1043_v15 = vsub.f32 %v7364_v43, %v1001_v32 }
 0x2fc   : > { %6459 = vpow2.f32 %v1079_v51 }
 0x2fd   : > { %v7450_v45 = vpop.eup %6449  ;;  %v1077_v36 = vmul.f32 1.442695, %v1051_v48  ;;  %v1061_v31 = vmul.f32 1.442695, %v1043_v15 }
 0x2fe   : > { %v1007_v16 = vpop.xlane.xlu0 %1006  ;;  %v1092_v59 = vsel %vm992_vm3, %v7450_v45, 0.0  ;;  %v7454_v61 = vpop.eup %6451 }
 0x2ff   : > { %6461 = vpow2.f32 %v1077_v36  ;;  %v1010_v22 = vpop.xlane.xlu1 %1009  ;;  %v1045_v6 = vsub.f32 %v7380_v53, %v1007_v16  ;;  %1093 = vadd.xlane.f32.xlu1 %v1092_v59  ;;  %v1116_v40 = vsel %vm992_vm3, %v7454_v61, 0.0 }
 0x300   : > { %v1046_v34 = vsub.f32 %v7386_v12, %v1010_v22  ;;  %6463 = vpow2.f32 %v1061_v31 }
 0x301   : > { %v7458_v5 = vpop.eup %6453  ;;  %v1065_v43 = vmul.f32 1.442695, %v1045_v6 }
 0x302   : > { %v1067_v63 = vmul.f32 1.442695, %v1046_v34  ;;  %v1031_v7 = vpop.xlane.xlu0 %1030  ;;  %v1089_v58 = vsel %vm992_vm3, %v7458_v5, 0.0  ;;  %v7464_v54 = vpop.eup %6455 }
 0x303   : > { %v1034_v14 = vpop.xlane.xlu1 %1033  ;;  %v1053_v53 = vsub.f32 %v7392_v55, %v1031_v7  ;;  %1117 = vadd.xlane.f32.xlu1 %v1116_v40  ;;  %1090 = vadd.xlane.f32.xlu0 %v1089_v58  ;;  %v1098_v32 = vsel %vm992_vm3, %v7464_v54, 0.0 }
 0x304   : > { %6465 = vpow2.f32 %v1067_v63  ;;  %v1054_v12 = vsub.f32 %v7398_v17, %v1034_v14 }
 0x305   : > { %v7468_v20 = vpop.eup %6457  ;;  %6467 = vpow2.f32 %v1065_v43  ;;  %v1081_v51 = vmul.f32 1.442695, %v1053_v53 }
 0x306   : > { %v1083_v25 = vmul.f32 1.442695, %v1054_v12  ;;  %v1013_v48 = vpop.xlane.xlu0 %1012  ;;  %v1113_v15 = vsel %vm992_vm3, %v7468_v20, 0.0  ;;  %v7474_v36 = vpop.eup %6459 }
 0x307   : > { %v1016_v55 = vpop.xlane.xlu1 %1015  ;;  %v1047_v31 = vsub.f32 %v7414_v42, %v1013_v48  ;;  %1099 = vadd.xlane.f32.xlu1 %v1098_v32  ;;  %1114 = vadd.xlane.f32.xlu0 %v1113_v15  ;;  %v1122_v43 = vsel %vm992_vm3, %v7474_v36, 0.0 }
 0x308   : > { %6469 = vpow2.f32 %v1083_v25  ;;  %v1048_v17 = vsub.f32 %v7420_v10, %v1016_v55 }
 0x309   : > { %v7478_v16 = vpop.eup %6461  ;;  %6471 = vpow2.f32 %v1081_v51  ;;  %v1069_v59 = vmul.f32 1.442695, %v1047_v31 }
 0x30a   : > { %v1071_v22 = vmul.f32 1.442695, %v1048_v17  ;;  %v6091_v6 = vpop.permute.xlu0 %6090  ;;  %v1119_v34 = vsel %vm992_vm3, %v7478_v16, 0.0  ;;  %v7484_v63 = vpop.eup %6463 }
 0x30b   : > { %v1040_v42 = vpop.xlane.xlu1 %1039  ;;  %v6093_v7 = vunpack.i.h.bf16 %v6091_v6  ;;  %v6092_v40 = vunpack.i.l.bf16 %v6091_v6  ;;  %1120 = vadd.xlane.f32.xlu1 %v1119_v34  ;;  %1123 = vadd.xlane.f32.xlu0 %v1122_v43  ;;  %v1095_v14 = vsel %vm992_vm3, %v7484_v63, 0.0 }
 0x30c   : > { %6473 = vpow2.f32 %v1071_v22 }
 0x30d   : > { %6475 = vpow2.f32 %v1069_v59  ;;  %v5724_v10 = vpack.c.bf16 %v6093_v7, %v6092_v40  ;;  %v1056_v7 = vsub.f32 %v7428_v23, %v1040_v42 }
 0x30e   : > { %v7486_v58 = vpop.eup %6465 }
 0x30f   : > { %v7490_v53 = vpop.eup %6467  ;;  %v6096_v12 = vpop.permute.xlu1 %6095  ;;  %v1104_v51 = vsel %vm992_vm3, %v7486_v58, 0.0  ;;  %1096 = vadd.xlane.f32.xlu0 %v1095_v14  ;;  %5726 = vmatprep.subr.msk.bf16.mxu0 %vm7162_vm1, %v5724_v10  ;;  %v1087_v40 = vmul.f32 1.442695, %v1056_v7 }
 0x310   : > { %v6098_v25 = vunpack.i.h.bf16 %v6096_v12  ;;  %v6097_v48 = vunpack.i.l.bf16 %v6096_v12  ;;  %1105 = vadd.xlane.f32.xlu1 %v1104_v51  ;;  %5729 = vmatpush3.bf16.xpose.msk.msra.mxu0 %vm7162_vm1, %v5724_v10  ;;  %v1101_v55 = vsel %vm992_vm3, %v7490_v53, 0.0 }
 0x311   : > { %6477 = vpow2.f32 %v1087_v40 }
 0x312   : > { %v7498_v32 = vpop.eup %6469  ;;  %v5730_v15 = vpack.c.bf16 %v6098_v25, %v6097_v48 }
 0x313   : > { %v7502_v31 = vpop.eup %6471  ;;  %v1128_v17 = vsel %vm992_vm3, %v7498_v32, 0.0  ;;  %1102 = vadd.xlane.f32.xlu0 %v1101_v55 }
 0x314   : > { %1129 = vadd.xlane.f32.xlu1 %v1128_v17  ;;  %5732 = vmatprep.subr.msk.bf16.mxu0 %vm7162_vm1, %v5730_v15  ;;  %v1125_v22 = vsel %vm992_vm3, %v7502_v31, 0.0 }
 0x316   : > { %v7508_v59 = vpop.eup %6473 }
 0x317   : > { %v7512_v6 = vpop.eup %6475  ;;  %v1110_v34 = vsel %vm992_vm3, %v7508_v59, 0.0  ;;  %1126 = vadd.xlane.f32.xlu0 %v1125_v22 }
 0x318   : > { %1111 = vadd.xlane.f32.xlu1 %v1110_v34  ;;  %5735 = vmatpush3.bf16.xpose.msk.msra.mxu0 %vm7162_vm1, %v5730_v15  ;;  %v1107_v43 = vsel %vm992_vm3, %v7512_v6, 0.0 }
 0x31b   : > { %1108 = vadd.xlane.f32.xlu0 %v1107_v43  ;;  %v7536_v12 = vpop.eup %6477 }
 0x31c   : > { %v1134_v25 = vsel %vm992_vm3, %v7536_v12, 0.0 }
 0x329   : > { %6105 = vrot.lane.b32.xlu1 %v7168_v38, %s6871_s21 }
 0x32d   : > { %6115 = vrot.lane.b32.xlu1 %v7182_v50, %s6871_s21 }
 0x331   : > { %6120 = vrot.lane.b32.xlu1 %v7194_v62, %s6871_s21  ;;  %6100 = vrot.lane.b32.xlu0 %v7192_v60, %s6871_s21 }
 0x335   : > { %1427 = vrot.lane.b32.xlu1 %v7148_v27, %s6871_s21 }
 0x339   : > { %6125 = vrot.lane.b32.xlu1 %v7206_v11, %s6871_s21 }
 0x33b   : > { %v1037_v10 = vpop.xlane.xlu0 %1036 }
 0x33c   : > { %v1055_v14 = vsub.f32 %v7438_v56, %v1037_v10 }
 0x33d   : > { %1598 = vrot.lane.b32.xlu1 %v7222_v19, %s6871_s21 }
 0x33e   : > { %v1085_v51 = vmul.f32 1.442695, %v1055_v14 }
 0x340   : > { %6479 = vpow2.f32 %v1085_v51 }
 0x34a   : > { %v7540_v48 = vpop.eup %6479 }
 0x34b   : > { %v1131_v23 = vsel %vm992_vm3, %v7540_v48, 0.0 }
 0x350   : > { %1135 = vadd.xlane.f32.xlu0 %v1134_v25 }
 0x361   : > { %1132 = vadd.xlane.f32.xlu1 %v1131_v23 }
 0x366   : > { %6110 = vrot.lane.b32.xlu0 %v7204_v9, %s6871_s21 }
 0x36a   : > { %1429 = vrot.lane.b32.xlu0 %v7219_v18, %s6871_s21 }
 0x36e   : > { %1596 = vrot.lane.b32.xlu0 %v7150_v28, %s6871_s21 }
 0x372   : > { %1433 = vrot.lane.b32.xlu1 %v7237_v0, %s6871_s21  ;;  %1431 = vrot.lane.b32.xlu0 %v7224_v21, %s6871_s21 }
 0x376   : > { %1437 = vrot.lane.b32.xlu1 %v7255_v37, %s6871_s21  ;;  %1435 = vrot.lane.b32.xlu0 %v7243_v30, %s6871_s21 }
 0x37a   : > { %1441 = vrot.lane.b32.xlu1 %v7273_v46, %s6871_s21  ;;  %1439 = vrot.lane.b32.xlu0 %v7261_v41, %s6871_s21 }
 0x37e   : > { %1602 = vrot.lane.b32.xlu1 %v7239_v26, %s6871_s21  ;;  %1600 = vrot.lane.b32.xlu0 %v7229_v24, %s6871_s21 }
 0x382   : > { %1606 = vrot.lane.b32.xlu1 %v7257_v39, %s6871_s21  ;;  %1604 = vrot.lane.b32.xlu0 %v7247_v33, %s6871_s21 }
 0x386   : > { %1610 = vrot.lane.b32.xlu1 %v7277_v49, %s6871_s21  ;;  %1608 = vrot.lane.b32.xlu0 %v7265_v44, %s6871_s21 }
 0x38c   : > { %v1094_v56 = vpop.xlane.xlu1 %1093 }
 0x38d   : > { %6481 = vrcp.f32 %v1094_v56 }
 0x390   : > { %v1118_v42 = vpop.xlane.xlu1 %1117  ;;  %v1091_v15 = vpop.xlane.xlu0 %1090 }
 0x391   : > { %6483 = vrcp.f32 %v1091_v15 }
 0x394   : > { %v1100_v55 = vpop.xlane.xlu1 %1099  ;;  %v1115_v17 = vpop.xlane.xlu0 %1114 }
 0x395   : > { %6485 = vrcp.f32 %v1100_v55 }
 0x397   : > { %v6482_v43 = vpop.eup %6481 }
 0x398   : > { %v1121_v22 = vpop.xlane.xlu1 %1120  ;;  %v1124_v34 = vpop.xlane.xlu0 %1123  ;;  %v1154_v51 = vmul.f32 %v6482_v43, %v7450_v45 }
 0x39b   : > { %v6484_v7 = vpop.eup %6483 }
 0x39c   : > { %v1097_v40 = vpop.xlane.xlu0 %1096  ;;  %v1153_v14 = vmul.f32 %v6484_v7, %v7458_v5 }
 0x39d   : > { %v1106_v10 = vpop.xlane.xlu1 %1105  ;;  %6487 = vrcp.f32 %v1097_v40 }
 0x39e   : > { %5148 = vmatprep.mubr.msk.f32.mxu1 %vm992_vm3, %v1153_v14  ;;  %6489 = vrcp.f32 %v1106_v10 }
 0x39f   : > { %5149 = vmatmul.mubr.msk.f32.vlgmr.msra.gmra.mrb[40].mxu1 %vm992_vm3, %v1154_v51  ;;  %v6486_v55 = vpop.eup %6485 }
 0x3a0   : > { %v1103_v25 = vpop.xlane.xlu0 %1102  ;;  %5711 = vmatpush3.bf16.msra.mxu1 %v7281_v52  ;;  %v1156_v7 = vmul.f32 %v6486_v55, %v7464_v54 }
 0x3a1   : > { %v1130_v23 = vpop.xlane.xlu1 %1129  ;;  %6491 = vrcp.f32 %v1103_v25  ;;  %5713 = vmatprep.subr.bf16.mxu1 %v7294_v1 }
 0x3a2   : > { %6493 = vrcp.f32 %v1115_v17 }
 0x3a4   : > { %v1127_v56 = vpop.xlane.xlu0 %1126  ;;  %5715 = vmatpush3.bf16.msra.mxu1 %v7294_v1 }
 0x3a5   : > { %v1112_v15 = vpop.xlane.xlu1 %1111  ;;  %5717 = vmatprep.subr.bf16.mxu1 %v7296_v2 }
 0x3a6   : > { %6495 = vrcp.f32 %v1112_v15 }
 0x3a7   : > { %v6488_v45 = vpop.eup %6487 }
 0x3a8   : > { %v1109_v5 = vpop.xlane.xlu0 %1108  ;;  %v1155_v43 = vmul.f32 %v6488_v45, %v7484_v63  ;;  %5719 = vmatpush3.bf16.msra.mxu1 %v7296_v2  ;;  %v6490_v40 = vpop.eup %6489 }
 0x3a9   : > { %v6106_v52 = vpop.permute.xlu1 %6105  ;;  %6497 = vrcp.f32 %v1109_v5  ;;  %5721 = vmatprep.subr.bf16.mxu1 %v7298_v3  ;;  %v1158_v15 = vmul.f32 %v6490_v40, %v7486_v58 }
 0x3aa   : > { %v6108_v10 = vunpack.i.h.bf16 %v6106_v52  ;;  %v6107_v14 = vunpack.i.l.bf16 %v6106_v52  ;;  %5151 = vmatprep.mubr.msk.f32.mxu1 %vm992_vm3, %v1155_v43  ;;  %6499 = vrcp.f32 %v1118_v42 }
 0x3ab   : > { %v6492_v1 = vpop.eup %6491  ;;  %5152 = vmatmul.mubr.msk.f32.gmra.mrb[42].mxu1 %vm992_vm3, %v1156_v7  ;;  %6501 = vrcp.f32 %v1121_v22 }
 0x3ac   : > { %v5748_v17 = vpack.c.bf16 %v6108_v10, %v6107_v14  ;;  %v6101_v51 = vpop.permute.xlu0 %6100  ;;  %v1157_v63 = vmul.f32 %v6492_v1, %v7490_v53  ;;  %5723 = vmatpush3.bf16.msra.mxu1 %v7298_v3  ;;  %6503 = vrcp.f32 %v1124_v34  ;;  %v6494_v42 = vpop.eup %6493 }
 0x3ad   : > { %v6116_v2 = vpop.permute.xlu1 %6115  ;;  %v6103_v54 = vunpack.i.h.bf16 %v6101_v51  ;;  %v6102_v25 = vunpack.i.l.bf16 %v6101_v51  ;;  %6505 = vrcp.f32 %v1127_v56  ;;  %v1161_v34 = vmul.f32 %v6494_v42, %v7468_v20 }
 0x3ae   : > { %5750 = vmatprep.subr.msk.bf16.mxu1 %vm7162_vm1, %v5748_v17  ;;  %5154 = vmatprep.mubr.msk.f32.mxu1 %vm992_vm3, %v1157_v63  ;;  %6507 = vrcp.f32 %v1130_v23  ;;  %v6118_v52 = vunpack.i.h.bf16 %v6116_v2  ;;  %v6117_v7 = vunpack.i.l.bf16 %v6116_v2 }
 0x3af   : > { %v5736_v55 = vpack.c.bf16 %v6103_v54, %v6102_v25  ;;  %5155 = vmatmul.mubr.msk.f32.gmra.mrb[44].mxu1 %vm992_vm3, %v1158_v15 }
 0x3b0   : > { %v6496_v3 = vpop.eup %6495  ;;  %v5754_v10 = vpack.c.bf16 %v6118_v52, %v6117_v7 }
 0x3b1   : > { %v6121_v53 = vpop.permute.xlu1 %6120  ;;  %5738 = vmatprep.subr.msk.bf16.mxu0 %vm7162_vm1, %v5736_v55  ;;  %v1160_v5 = vmul.f32 %v6496_v3, %v7508_v59 }
 0x3b2   : > { %5741 = vmatpush3.bf16.xpose.msk.msra.mxu0 %vm7162_vm1, %v5736_v55  ;;  %v6123_v1 = vunpack.i.h.bf16 %v6121_v53  ;;  %v6122_v51 = vunpack.i.l.bf16 %v6121_v53 }
 0x3b3   : > { %v6498_v58 = vpop.eup %6497 }
 0x3b4   : > { %v1159_v22 = vmul.f32 %v6498_v58, %v7512_v6  ;;  %v6500_v43 = vpop.eup %6499  ;;  %v5760_v63 = vpack.c.bf16 %v6123_v1, %v6122_v51 }
 0x3b5   : > { %v1428_v45 = vpop.permute.xlu1 %1427  ;;  %v6502_v56 = vpop.eup %6501  ;;  %v1162_v23 = vmul.f32 %v6500_v43, %v7454_v61 }
 0x3b6   : > { %5204 = vmatprep.mubr.msk.f32.mxu0 %vm653_vm0, %v1428_v45  ;;  %5157 = vmatprep.mubr.msk.f32.mxu1 %vm992_vm3, %v1159_v22  ;;  %v6504_v6 = vpop.eup %6503  ;;  %v1163_v40 = vmul.f32 %v6502_v56, %v7478_v16 }
 0x3b7   : > { %5158 = vmatmul.mubr.msk.f32.gmra.mrb[46].mxu1 %vm992_vm3, %v1160_v5  ;;  %v6506_v59 = vpop.eup %6505  ;;  %v1164_v20 = vmul.f32 %v6504_v6, %v7474_v36 }
 0x3b8   : > { %5176 = vmatprep.mubr.msk.f32.mxu1 %vm992_vm3, %v1161_v34  ;;  %v6508_v14 = vpop.eup %6507  ;;  %v1165_v61 = vmul.f32 %v6506_v59, %v7502_v31 }
 0x3b9   : > { %v1166_v16 = vmul.f32 %v6508_v14, %v7498_v32 }
 0x3bb   : > { %5177 = vmatmul.mubr.msk.f32.vlgmr.msra.gmra.mrb[48].mxu1 %vm992_vm3, %v1162_v23 }
 0x3bc   : > { %5753 = vmatpush3.bf16.xpose.msk.msra.mxu1 %vm7162_vm1, %v5748_v17  ;;  %5179 = vmatprep.mubr.msk.f32.mxu1 %vm992_vm3, %v1163_v40  ;;  %v6126_v17 = vpop.permute.xlu1 %6125 }
 0x3bd   : > { %5756 = vmatprep.subr.msk.bf16.mxu1 %vm7162_vm1, %v5754_v10  ;;  %v6128_v36 = vunpack.i.h.bf16 %v6126_v17  ;;  %v6127_v31 = vunpack.i.l.bf16 %v6126_v17 }
 0x3bf   : > { %5180 = vmatmul.mubr.msk.f32.gmra.mrb[50].mxu1 %vm992_vm3, %v1164_v20  ;;  %v5766_v2 = vpack.c.bf16 %v6128_v36, %v6127_v31 }
 0x3c0   : > { %5182 = vmatprep.mubr.msk.f32.mxu1 %vm992_vm3, %v1165_v61  ;;  %v1599_v3 = vpop.permute.xlu1 %1598 }
 0x3c3   : > { %5183 = vmatmul.mubr.msk.f32.gmra.mrb[52].mxu1 %vm992_vm3, %v1166_v16 }
 0x3c4   : > { %5759 = vmatpush3.bf16.xpose.msk.msra.mxu1 %vm7162_vm1, %v5754_v10 }
 0x3c5   : > { %5762 = vmatprep.subr.msk.bf16.mxu1 %vm7162_vm1, %v5760_v63 }
 0x3cc   : > { %5765 = vmatpush3.bf16.xpose.msk.msra.mxu1 %vm7162_vm1, %v5760_v63 }
 0x3cd   : > { %5768 = vmatprep.subr.msk.bf16.mxu1 %vm7162_vm1, %v5766_v2 }
 0x3d4   : > { %5771 = vmatpush3.bf16.xpose.msk.msra.mxu1 %vm7162_vm1, %v5766_v2 }
 0x3dd   : > { %v1136_v32 = vpop.xlane.xlu0 %1135 }
 0x3de   : > { %6509 = vrcp.f32 %v1136_v32 }
 0x3e1   : > { %v6111_v54 = vpop.permute.xlu0 %6110 }
 0x3e2   : > { %v6113_v25 = vunpack.i.h.bf16 %v6111_v54  ;;  %v6112_v15 = vunpack.i.l.bf16 %v6111_v54 }
 0x3e4   : > { %v5742_v55 = vpack.c.bf16 %v6113_v25, %v6112_v15 }
 0x3e5   : > { %v1430_v42 = vpop.permute.xlu0 %1429 }
 0x3e6   : > { %5744 = vmatprep.subr.msk.bf16.mxu0 %vm7162_vm1, %v5742_v55 }
 0x3e7   : > { %5747 = vmatpush3.bf16.xpose.msk.msra.mxu0 %vm7162_vm1, %v5742_v55 }
 0x3e8   : > { %v6510_v56 = vpop.eup %6509 }
 0x3e9   : > { %v1597_v53 = vpop.permute.xlu0 %1596  ;;  %v1168_v6 = vmul.f32 %v6510_v56, %v7536_v12 }
 0x3ed   : > { %v1432_v58 = vpop.permute.xlu0 %1431 }
 0x3ee   : > { %v1133_v22 = vpop.xlane.xlu1 %1132  ;;  %5205 = vmatmul.mubr.msk.f32.vlgmr.msra.gmra.mrb[24].mxu0 %vm653_vm0, %v1430_v42 }
 0x3ef   : > { %6511 = vrcp.f32 %v1133_v22  ;;  %5207 = vmatprep.mubr.msk.f32.mxu0 %vm653_vm0, %v1432_v58 }
 0x3f1   : > { %v1436_v45 = vpop.permute.xlu0 %1435 }
 0x3f2   : > { %v1434_v5 = vpop.permute.xlu1 %1433 }
 0x3f3   : > { %5208 = vmatmul.mubr.msk.f32.gmra.mrb[26].mxu0 %vm653_vm0, %v1434_v5 }
 0x3f4   : > { %5210 = vmatprep.mubr.msk.f32.mxu0 %vm653_vm0, %v1436_v45 }
 0x3f5   : > { %v1440_v43 = vpop.permute.xlu0 %1439 }
 0x3f6   : > { %v1438_v34 = vpop.permute.xlu1 %1437 }
 0x3f7   : > { %5211 = vmatmul.mubr.msk.f32.gmra.mrb[28].mxu0 %vm653_vm0, %v1438_v34 }
 0x3f8   : > { %5213 = vmatprep.mubr.msk.f32.mxu0 %vm653_vm0, %v1440_v43 }
 0x3f9   : > { %v6512_v52 = vpop.eup %6511  ;;  %v1601_v40 = vpop.permute.xlu0 %1600 }
 0x3fa   : > { %v1442_v7 = vpop.permute.xlu1 %1441  ;;  %v1167_v23 = vmul.f32 %v6512_v52, %v7540_v48 }
 0x3fb   : > { %5214 = vmatmul.mubr.msk.f32.gmra.mrb[30].mxu0 %vm653_vm0, %v1442_v7 }
 0x3fc   : > { %5185 = vmatprep.mubr.msk.f32.mxu1 %vm992_vm3, %v1167_v23 }
 0x3fd   : > { %5186 = vmatmul.mubr.msk.f32.gmra.mrb[54].mxu1 %vm992_vm3, %v1168_v6  ;;  %v1605_v10 = vpop.permute.xlu0 %1604 }
 0x3fe   : > { %5232 = vmatprep.mubr.msk.f32.mxu1 %vm653_vm0, %v1597_v53  ;;  %v1603_v59 = vpop.permute.xlu1 %1602 }
 0x401   : > { %5233 = vmatmul.mubr.msk.f32.vlgmr.msra.gmra.mrb[56].mxu1 %vm653_vm0, %v1599_v3  ;;  %v1609_v20 = vpop.permute.xlu0 %1608 }
 0x402   : > { %5235 = vmatprep.mubr.msk.f32.mxu1 %vm653_vm0, %v1601_v40  ;;  %v1607_v48 = vpop.permute.xlu1 %1606 }
 0x405   : > { %5236 = vmatmul.mubr.msk.f32.gmra.mrb[58].mxu1 %vm653_vm0, %v1603_v59 }
 0x406   : > { %5238 = vmatprep.mubr.msk.f32.mxu1 %vm653_vm0, %v1605_v10  ;;  %v1611_v12 = vpop.permute.xlu1 %1610 }
 0x409   : > { %5239 = vmatmul.mubr.msk.f32.gmra.mrb[60].mxu1 %vm653_vm0, %v1607_v48 }
 0x40a   : > { %5241 = vmatprep.mubr.msk.f32.mxu1 %vm653_vm0, %v1609_v20 }
 0x40d   : > { %5242 = vmatmul.mubr.msk.f32.gmra.mrb[62].mxu1 %vm653_vm0, %v1611_v12 }
 0x472   : > { %v7653_v14 = vpop.f32.mrb[40].mxu1 }
 0x473   : > { %8996 = vst [vmem:[#allocation26_spill] sm:$0xff] %v7653_v14  ;;  %v7655_v61 = vpop.f32.mrb[41].mxu1 }
 0x474   : > { %8997 = vst [vmem:[#allocation27_spill] sm:$0xff] %v7655_v61 }
 0x47e   : > { %v7657_v1 = vpop.f32.mrb[42].mxu1 }
 0x47f   : > { %8998 = vst [vmem:[#allocation28_spill] sm:$0xff] %v7657_v1  ;;  %v7659_v51 = vpop.f32.mrb[43].mxu1 }
 0x480   : > { %8999 = vst [vmem:[#allocation29_spill] sm:$0xff] %v7659_v51 }
 0x482   : > { %v7661_v16 = vpop.f32.mrb[44].mxu1 }
 0x483   : > { %9000 = vst [vmem:[#allocation30_spill] sm:$0xff] %v7661_v16  ;;  %v7663_v63 = vpop.f32.mrb[45].mxu1 }
 0x484   : > { %9001 = vst [vmem:[#allocation31_spill] sm:$0xff] %v7663_v63 }
 0x48a   : > { %v7665_v17 = vpop.f32.mrb[46].mxu1 }
 0x48b   : > { %9002 = vst [vmem:[#allocation32_spill] sm:$0xff] %v7665_v17  ;;  %v7667_v36 = vpop.f32.mrb[47].mxu1  ;;  %v9023_v17 = vld [vmem:[#allocation22_spill] sm:$0xff] }
 0x48c   : > { %9003 = vst [vmem:[#allocation33_spill] sm:$0xff] %v7667_v36 }
 0x48e   : > { %v7669_v31 = vpop.f32.mrb[48].mxu1 }
 0x48f   : > { %9004 = vst [vmem:[#allocation34_spill] sm:$0xff] %v7669_v31  ;;  %v7671_v2 = vpop.f32.mrb[49].mxu1  ;;  %v9021_v31 = vld [vmem:[#allocation14_spill] sm:$0xff] }
 0x490   : > { %9005 = vst [vmem:[#allocation35_spill] sm:$0xff] %v7671_v2  ;;  %v9022_v2 = vld [vmem:[#allocation12_spill] sm:$0xff] }
 0x492   : > { %v7673_v32 = vpop.f32.mrb[50].mxu1 }
 0x493   : > { %9006 = vst [vmem:[#allocation36_spill] sm:$0xff] %v7673_v32  ;;  %v7675_v54 = vpop.f32.mrb[51].mxu1  ;;  %v9019_v32 = vld [vmem:[#allocation23_spill] sm:$0xff] }
 0x494   : > { %9007 = vst [vmem:[#allocation37_spill] sm:$0xff] %v7675_v54  ;;  %v9020_v54 = vld [vmem:[#allocation20_spill] sm:$0xff] }
 0x496   : > { %v7677_v25 = vpop.f32.mrb[52].mxu1 }
 0x497   : > { %9008 = vst [vmem:[#allocation38_spill] sm:$0xff] %v7677_v25  ;;  %v7679_v15 = vpop.f32.mrb[53].mxu1  ;;  %v9017_v25 = vld [vmem:[#allocation21_spill] sm:$0xff] }
 0x498   : > { %9009 = vst [vmem:[#allocation39_spill] sm:$0xff] %v7679_v15  ;;  %v9018_v15 = vld [vmem:[#allocation19_spill] sm:$0xff] }
 0x4c1   : > { %v5206_v55 = vpop.f32.mrb[24].mxu0 }
 0x4c2   : > { %v1766_v42 = vsel %vm7303_vm2, %v5206_v55, -inf  ;;  %v1557_v53 = vpop.f32.mrb[25].mxu0 }
 0x4c3   : > { %v1765_v3 = vsel %vm7308_vm4, %v1557_v53, -inf  ;;  %v1784_v58 = vsel %vm992_vm3, %v1766_v42, -inf }
 0x4c4   : > { %1785 = vmax.xlane.f32.xlu1 %v1784_v58  ;;  %v1781_v22 = vsel %vm992_vm3, %v1765_v3, -inf }
 0x4c5   : > { %1782 = vmax.xlane.f32.xlu0 %v1781_v22 }
 0x4c6   : > { %v5209_v45 = vpop.f32.mrb[26].mxu0 }
 0x4c7   : > { %v1768_v5 = vsel %vm7323_vm5, %v5209_v45, -inf  ;;  %v1567_v43 = vpop.f32.mrb[27].mxu0 }
 0x4c8   : > { %v1767_v34 = vsel %vm7350_vm6, %v1567_v43, -inf  ;;  %v1790_v56 = vsel %vm992_vm3, %v1768_v5, -inf }
 0x4c9   : > { %1791 = vmax.xlane.f32.xlu1 %v1790_v56  ;;  %v1787_v52 = vsel %vm992_vm3, %v1767_v34, -inf }
 0x4ca   : > { %1788 = vmax.xlane.f32.xlu0 %v1787_v52  ;;  %v5212_v7 = vpop.f32.mrb[28].mxu0 }
 0x4cb   : > { %v1770_v23 = vsel %vm7372_vm8, %v5212_v7, -inf  ;;  %v1577_v6 = vpop.f32.mrb[29].mxu0 }
 0x4cc   : > { %v1769_v40 = vsel %vm7367_vm7, %v1577_v6, -inf  ;;  %v1796_v59 = vsel %vm992_vm3, %v1770_v23, -inf }
 0x4cd   : > { %1797 = vmax.xlane.f32.xlu1 %v1796_v59  ;;  %v1793_v10 = vsel %vm992_vm3, %v1769_v40, -inf }
 0x4ce   : > { %1794 = vmax.xlane.f32.xlu0 %v1793_v10  ;;  %v5215_v48 = vpop.f32.mrb[30].mxu0 }
 0x4cf   : > { %v1772_v12 = vsel %vm7406_vm10, %v5215_v48, -inf  ;;  %v1587_v55 = vpop.f32.mrb[31].mxu0 }
 0x4d0   : > { %v1771_v58 = vsel %vm7401_vm9, %v1587_v55, -inf  ;;  %v7703_v22 = vpop.f32.mrb[54].mxu1  ;;  %v1802_v45 = vsel %vm992_vm3, %v1772_v12, -inf }
 0x4d1   : > { %9012 = vst [vmem:[#allocation25_spill] sm:$0xff] %v7703_v22  ;;  %v7706_v43 = vpop.f32.mrb[55].mxu1  ;;  %1803 = vmax.xlane.f32.xlu1 %v1802_v45  ;;  %v1799_v56 = vsel %vm992_vm3, %v1771_v58, -inf  ;;  %v9014_v45 = vld [vmem:[#allocation17_spill] sm:$0xff] }
 0x4d2   : > { %9013 = vst [vmem:[#allocation24_spill] sm:$0xff] %v7706_v43  ;;  %1800 = vmax.xlane.f32.xlu0 %v1799_v56  ;;  %v9015_v56 = vld [vmem:[#allocation18_spill] sm:$0xff]  ;;  %v9016_v43 = vld [vmem:[#allocation16_spill] sm:$0xff] }
 0x4d4   : > { %v7709_v52 = vpop.f32.mrb[56].mxu1 }
 0x4d5   : > { %v7711_v7 = vpop.f32.mrb[57].mxu1 }
 0x4d8   : > { %v7713_v6 = vpop.f32.mrb[58].mxu1 }
 0x4d9   : > { %v7715_v59 = vpop.f32.mrb[59].mxu1 }
 0x4dc   : > { %v7717_v10 = vpop.f32.mrb[60].mxu1 }
 0x4dd   : > { %v7719_v48 = vpop.f32.mrb[61].mxu1 }
 0x4e0   : > { %v7721_v55 = vpop.f32.mrb[62].mxu1 }
 0x4e1   : > { %v7723_v22 = vpop.f32.mrb[63].mxu1 }
 0x4e2   : > { %6135 = vrot.lane.b32.xlu1 %v9014_v45, %s6871_s21 }
 0x4e6   : > { %6140 = vrot.lane.b32.xlu1 %v9015_v56, %s6871_s21 }
 0x4e8   : > { %6130 = vrot.lane.b32.xlu0 %v9016_v43, %s6871_s21 }
 0x4ea   : > { %6155 = vrot.lane.b32.xlu1 %v9017_v25, %s6871_s21 }
 0x4ec   : > { %6145 = vrot.lane.b32.xlu0 %v9018_v15, %s6871_s21 }
 0x4ee   : > { %6170 = vrot.lane.b32.xlu1 %v9019_v32, %s6871_s21 }
 0x4f0   : > { %6150 = vrot.lane.b32.xlu0 %v9020_v54, %s6871_s21 }
 0x4f2   : > { %6175 = vrot.lane.b32.xlu1 %v9021_v31, %s6872_s23 }
 0x4f4   : > { %6160 = vrot.lane.b32.xlu0 %v9022_v2, %s6872_s23 }
 0x4f6   : > { %6185 = vrot.lane.b32.xlu1 %v7168_v38, %s6872_s23 }
 0x4f8   : > { %6165 = vrot.lane.b32.xlu0 %v9023_v17, %s6871_s21 }
 0x4fc   : > { %6180 = vrot.lane.b32.xlu0 %v7192_v60, %s6872_s23 }
 0x551   : > { %v1786_v36 = vpop.xlane.xlu1 %1785 }
 0x552   : > { %v1830_v16 = vsub.f32 %v1766_v42, %v1786_v36  ;;  %v1783_v63 = vpop.xlane.xlu0 %1782 }
 0x553   : > { %v1829_v1 = vsub.f32 %v1765_v3, %v1783_v63 }
 0x554   : > { %v1847_v51 = vmul.f32 1.442695, %v1830_v16 }
 0x555   : > { %v1845_v61 = vmul.f32 1.442695, %v1829_v1 }
 0x556   : > { %6513 = vpow2.f32 %v1847_v51  ;;  %v1792_v14 = vpop.xlane.xlu1 %1791 }
 0x557   : > { %6515 = vpow2.f32 %v1845_v61  ;;  %v1832_v31 = vsub.f32 %v1768_v5, %v1792_v14  ;;  %v1789_v2 = vpop.xlane.xlu0 %1788 }
 0x558   : > { %v1831_v54 = vsub.f32 %v1767_v34, %v1789_v2 }
 0x559   : > { %v1851_v32 = vmul.f32 1.442695, %v1832_v31 }
 0x55a   : > { %v1849_v38 = vmul.f32 1.442695, %v1831_v54  ;;  %v1798_v15 = vpop.xlane.xlu1 %1797 }
 0x55b   : > { %6517 = vpow2.f32 %v1851_v32  ;;  %v1834_v17 = vsub.f32 %v1770_v23, %v1798_v15  ;;  %v1795_v25 = vpop.xlane.xlu0 %1794 }
 0x55c   : > { %6519 = vpow2.f32 %v1849_v38  ;;  %v1833_v60 = vsub.f32 %v1769_v40, %v1795_v25 }
 0x55d   : > { %v1855_v43 = vmul.f32 1.442695, %v1834_v17 }
 0x55e   : > { %v1853_v36 = vmul.f32 1.442695, %v1833_v60  ;;  %v1804_v42 = vpop.xlane.xlu1 %1803 }
 0x55f   : > { %6521 = vpow2.f32 %v1855_v43  ;;  %v1836_v16 = vsub.f32 %v1772_v12, %v1804_v42  ;;  %v1801_v1 = vpop.xlane.xlu0 %1800 }
 0x560   : > { %v7749_v51 = vpop.eup %6513  ;;  %v1835_v61 = vsub.f32 %v1771_v58, %v1801_v1  ;;  %6523 = vpow2.f32 %v1853_v36 }
 0x561   : > { %v7751_v14 = vpop.eup %6515  ;;  %v1859_v63 = vmul.f32 1.442695, %v1836_v16  ;;  %v1880_v31 = vsel %vm992_vm3, %v7749_v51, 0.0 }
 0x562   : > { %v1857_v2 = vmul.f32 1.442695, %v1835_v61  ;;  %v6136_v32 = vpop.permute.xlu1 %6135  ;;  %1881 = vadd.xlane.f32.xlu1 %v1880_v31  ;;  %v1877_v38 = vsel %vm992_vm3, %v7751_v14, 0.0 }
 0x563   : > { %6525 = vpow2.f32 %v1859_v63  ;;  %v6131_v60 = vpop.permute.xlu0 %6130  ;;  %1878 = vadd.xlane.f32.xlu0 %v1877_v38  ;;  %v6138_v17 = vunpack.i.h.bf16 %v6136_v32  ;;  %v6137_v54 = vunpack.i.l.bf16 %v6136_v32 }
 0x564   : > { %v6133_v25 = vunpack.i.h.bf16 %v6131_v60  ;;  %v6132_v15 = vunpack.i.l.bf16 %v6131_v60  ;;  %6527 = vpow2.f32 %v1857_v2 }
 0x565   : > { %v7757_v3 = vpop.eup %6517  ;;  %v5776_v42 = vpack.c.bf16 %v6138_v17, %v6137_v54 }
 0x566   : > { %v7759_v5 = vpop.eup %6519  ;;  %v6141_v34 = vpop.permute.xlu1 %6140  ;;  %v1886_v23 = vsel %vm992_vm3, %v7757_v3, 0.0  ;;  %v5772_v40 = vpack.c.bf16 %v6133_v25, %v6132_v15 }
 0x567   : > { %v6143_v12 = vunpack.i.h.bf16 %v6141_v34  ;;  %v6142_v58 = vunpack.i.l.bf16 %v6141_v34  ;;  %1887 = vadd.xlane.f32.xlu1 %v1886_v23  ;;  %v6146_v43 = vpop.permute.xlu0 %6145  ;;  %v1883_v36 = vsel %vm992_vm3, %v7759_v5, 0.0 }
 0x568   : > { %1884 = vadd.xlane.f32.xlu0 %v1883_v36  ;;  %5773 = vmatprep.subr.bf16.mxu0 %v5772_v40  ;;  %v6148_v31 = vunpack.i.h.bf16 %v6146_v43  ;;  %v6147_v2 = vunpack.i.l.bf16 %v6146_v43 }
 0x569   : > { %v7765_v16 = vpop.eup %6521  ;;  %5775 = vmatpush3.bf16.msra.mxu0 %v5772_v40  ;;  %v5780_v38 = vpack.c.bf16 %v6143_v12, %v6142_v58  ;;  %v7782_v12 = vsel %vm7303_vm2, %v7709_v52, -inf }
 0x56a   : > { %v6156_v1 = vpop.permute.xlu1 %6155  ;;  %5777 = vmatprep.subr.bf16.mxu0 %v5776_v42  ;;  %v1892_v61 = vsel %vm992_vm3, %v7765_v16, 0.0  ;;  %v7769_v63 = vpop.eup %6523 }
 0x56b   : > { %1893 = vadd.xlane.f32.xlu1 %v1892_v61  ;;  %v6151_v32 = vpop.permute.xlu0 %6150  ;;  %v6158_v60 = vunpack.i.h.bf16 %v6156_v1  ;;  %v6157_v25 = vunpack.i.l.bf16 %v6156_v1  ;;  %v1889_v23 = vsel %vm992_vm3, %v7769_v63, 0.0  ;;  %v5784_v61 = vpack.c.bf16 %v6148_v31, %v6147_v2 }
 0x56c   : > { %v6153_v15 = vunpack.i.h.bf16 %v6151_v32  ;;  %v6152_v34 = vunpack.i.l.bf16 %v6151_v32  ;;  %v7798_v31 = vsel %vm7323_vm5, %v7713_v6, -inf }
 0x56d   : > { %v7771_v17 = vpop.eup %6525  ;;  %5779 = vmatpush3.bf16.msra.mxu0 %v5776_v42  ;;  %v5792_v32 = vpack.c.bf16 %v6158_v60, %v6157_v25  ;;  %v1814_v6 = vsel %vm992_vm3, %v7798_v31, -inf }
 0x56e   : > { %v6171_v54 = vpop.permute.xlu1 %6170  ;;  %5781 = vmatprep.subr.bf16.mxu0 %v5780_v38  ;;  %v1898_v40 = vsel %vm992_vm3, %v7771_v17, 0.0  ;;  %v5788_v36 = vpack.c.bf16 %v6153_v15, %v6152_v34  ;;  %v7777_v43 = vpop.eup %6527  ;;  %v1808_v15 = vsel %vm992_vm3, %v7782_v12, -inf  ;;  %v7793_v34 = vsel %vm7308_vm4, %v7711_v7, -inf }
 0x56f   : > { %1890 = vadd.xlane.f32.xlu1 %v1889_v23  ;;  %1899 = vadd.xlane.f32.xlu0 %v1898_v40  ;;  %v6161_v58 = vpop.permute.xlu0 %6160  ;;  %v1895_v52 = vsel %vm992_vm3, %v7777_v43, 0.0  ;;  %v6173_v2 = vunpack.i.h.bf16 %v6171_v54  ;;  %v6172_v60 = vunpack.i.l.bf16 %v6171_v54  ;;  %v1805_v7 = vsel %vm992_vm3, %v7793_v34, -inf }
 0x570   : > { %v6163_v42 = vunpack.i.h.bf16 %v6161_v58  ;;  %v6162_v1 = vunpack.i.l.bf16 %v6161_v58  ;;  %5789 = vmatprep.subr.bf16.mxu1 %v5788_v36  ;;  %v7812_v54 = vsel %vm7350_vm6, %v7715_v59, -inf }
 0x571   : > { %5783 = vmatpush3.bf16.msra.mxu0 %v5780_v38  ;;  %5791 = vmatpush3.bf16.msra.mxu1 %v5788_v36 }
 0x572   : > { %v7784_v56 = vpop.permute.xlu1 %6175  ;;  %5785 = vmatprep.subr.bf16.mxu0 %v5784_v61  ;;  %5793 = vmatprep.subr.bf16.mxu1 %v5792_v32  ;;  %v7800_v25 = vpack.c.bf16 %v6163_v42, %v6162_v1  ;;  %v7817_v42 = vsel %vm7372_vm8, %v7717_v10, -inf  ;;  %v7831_v10 = vsel %vm7406_vm10, %v7721_v55, -inf  ;;  %v7845_v55 = vsel %vm7401_vm9, %v7723_v22, -inf }
 0x573   : > { %1809 = vmax.xlane.f32.xlu0 %v1808_v15  ;;  %1896 = vadd.xlane.f32.xlu1 %v1895_v52  ;;  %v6166_v38 = vpop.permute.xlu0 %6165  ;;  %v1811_v15 = vsel %vm992_vm3, %v7812_v54, -inf  ;;  %v1820_v59 = vsel %vm992_vm3, %v7817_v42, -inf  ;;  %v7826_v52 = vsel %vm7367_vm7, %v7719_v48, -inf  ;;  %v1826_v48 = vsel %vm992_vm3, %v7831_v10, -inf }
 0x574   : > { %v6168_v23 = vunpack.i.h.bf16 %v6166_v38  ;;  %v6167_v40 = vunpack.i.l.bf16 %v6166_v38  ;;  %v1817_v38 = vsel %vm992_vm3, %v7826_v52, -inf }
 0x575   : > { %5787 = vmatpush3.bf16.msra.mxu0 %v5784_v61  ;;  %5795 = vmatpush3.bf16.msra.mxu1 %v5792_v32  ;;  %v5800_v32 = vpack.c.bf16 %v6173_v2, %v6172_v60  ;;  %v1823_v60 = vsel %vm992_vm3, %v7845_v55, -inf }
 0x576   : > { %v6186_v36 = vpop.permute.xlu1 %6185  ;;  %5806 = vmatprep.subr.msk.bf16.mxu0 %vm7162_vm1, %v7800_v25  ;;  %v5796_v58 = vpack.c.bf16 %v6168_v23, %v6167_v40 }
 0x577   : > { %1806 = vmax.xlane.f32.xlu0 %v1805_v7  ;;  %1815 = vmax.xlane.f32.xlu1 %v1814_v6  ;;  %v6188_v1 = vunpack.i.h.bf16 %v6186_v36  ;;  %v6187_v61 = vunpack.i.l.bf16 %v6186_v36  ;;  %v6181_v22 = vpop.permute.xlu0 %6180 }
 0x578   : > { %5797 = vmatprep.subr.bf16.mxu1 %v5796_v58 }
 0x579   : > { %5799 = vmatpush3.bf16.msra.mxu1 %v5796_v58  ;;  %v7833_v2 = vpack.c.bf16 %v6188_v1, %v6187_v61  ;;  %v6178_v61 = vunpack.i.h.bf16 %v7784_v56 }
 0x57a   : > { %5801 = vmatprep.subr.bf16.mxu1 %v5800_v32 }
 0x57b   : > { %1812 = vmax.xlane.f32.xlu0 %v1811_v15  ;;  %1821 = vmax.xlane.f32.xlu1 %v1820_v59 }
 0x57d   : > { %5803 = vmatpush3.bf16.msra.mxu1 %v5800_v32  ;;  %v6177_v32 = vunpack.i.l.bf16 %v7784_v56 }
 0x57e   : > { %5830 = vmatprep.subr.msk.bf16.mxu1 %vm7162_vm1, %v7833_v2 }
 0x57f   : > { %1818 = vmax.xlane.f32.xlu0 %v1817_v38  ;;  %1827 = vmax.xlane.f32.xlu1 %v1826_v48 }
 0x583   : > { %1824 = vmax.xlane.f32.xlu0 %v1823_v60 }
 0x590   : > { %6195 = vrot.lane.b32.xlu1 %v7182_v50, %s6872_s23 }
 0x594   : > { %6200 = vrot.lane.b32.xlu1 %v7194_v62, %s6872_s23 }
 0x598   : > { %2279 = vrot.lane.b32.xlu1 %v7148_v27, %s6872_s23 }
 0x599   : > { %6190 = vrot.lane.b32.xlu0 %v7204_v9, %s6872_s23 }
 0x59c   : > { %6205 = vrot.lane.b32.xlu1 %v7206_v11, %s6872_s23 }
 0x5ef   : > { %v1882_v23 = vpop.xlane.xlu1 %1881 }
 0x5f0   : > { %6529 = vrcp.f32 %v1882_v23  ;;  %v1879_v40 = vpop.xlane.xlu0 %1878  ;;  %v5810_v23 = vpack.c.bf16 %v6178_v61, %v6177_v32 }
 0x5f1   : > { %6531 = vrcp.f32 %v1879_v40 }
 0x5f4   : > { %v1888_v36 = vpop.xlane.xlu1 %1887 }
 0x5f5   : > { %6533 = vrcp.f32 %v1888_v36  ;;  %v1885_v7 = vpop.xlane.xlu0 %1884 }
 0x5f6   : > { %6535 = vrcp.f32 %v1885_v7 }
 0x5f8   : > { %v1894_v6 = vpop.xlane.xlu1 %1893 }
 0x5f9   : > { %6537 = vrcp.f32 %v1894_v6  ;;  %v6183_v6 = vunpack.i.h.bf16 %v6181_v22 }
 0x5fa   : > { %v6530_v58 = vpop.eup %6529 }
 0x5fb   : > { %v6532_v1 = vpop.eup %6531  ;;  %v1942_v48 = vmul.f32 %v6530_v58, %v7749_v51  ;;  %v6182_v58 = vunpack.i.l.bf16 %v6181_v22 }
 0x5fc   : > { %v1891_v15 = vpop.xlane.xlu1 %1890  ;;  %v1900_v59 = vpop.xlane.xlu0 %1899  ;;  %v1941_v38 = vmul.f32 %v6532_v1, %v7751_v14 }
 0x5fd   : > { %6539 = vrcp.f32 %v1891_v15 }
 0x5fe   : > { %5260 = vmatprep.mubr.msk.f32.mxu0 %vm992_vm3, %v1941_v38  ;;  %6541 = vrcp.f32 %v1900_v59  ;;  %v5816_v38 = vpack.c.bf16 %v6183_v6, %v6182_v58 }
 0x5ff   : > { %v6534_v60 = vpop.eup %6533  ;;  %5261 = vmatmul.mubr.msk.f32.vlgmr.msra.gmra.mrb[32].mxu0 %vm992_vm3, %v1942_v48 }
 0x600   : > { %v6536_v40 = vpop.eup %6535  ;;  %v1897_v36 = vpop.xlane.xlu1 %1896  ;;  %5809 = vmatpush3.bf16.xpose.msk.msra.mxu0 %vm7162_vm1, %v7800_v25  ;;  %v1944_v14 = vmul.f32 %v6534_v60, %v7757_v3 }
 0x601   : > { %v1810_v7 = vpop.xlane.xlu0 %1809  ;;  %6543 = vrcp.f32 %v1897_v36  ;;  %5812 = vmatprep.subr.msk.bf16.mxu0 %vm7162_vm1, %v5810_v23  ;;  %v1943_v51 = vmul.f32 %v6536_v40, %v7759_v5 }
 0x602   : > { %v1838_v56 = vsub.f32 %v7782_v12, %v1810_v7 }
 0x603   : > { %5263 = vmatprep.mubr.msk.f32.mxu0 %vm992_vm3, %v1943_v51  ;;  %v6538_v15 = vpop.eup %6537 }
 0x604   : > { %v1863_v1 = vmul.f32 1.442695, %v1838_v56  ;;  %v1816_v61 = vpop.xlane.xlu1 %1815  ;;  %5264 = vmatmul.mubr.msk.f32.gmra.mrb[34].mxu0 %vm992_vm3, %v1944_v14  ;;  %v1946_v40 = vmul.f32 %v6538_v15, %v7765_v16 }
 0x605   : > { %v1807_v32 = vpop.xlane.xlu0 %1806  ;;  %v1840_v25 = vsub.f32 %v7798_v31, %v1816_v61 }
 0x606   : > { %6545 = vpow2.f32 %v1863_v1  ;;  %v1837_v12 = vsub.f32 %v7793_v34, %v1807_v32 }
 0x607   : > { %v6540_v59 = vpop.eup %6539  ;;  %v1867_v60 = vmul.f32 1.442695, %v1840_v25 }
 0x608   : > { %v1861_v5 = vmul.f32 1.442695, %v1837_v12  ;;  %v1822_v48 = vpop.xlane.xlu1 %1821  ;;  %5815 = vmatpush3.bf16.xpose.msk.msra.mxu0 %vm7162_vm1, %v5810_v23  ;;  %v1945_v22 = vmul.f32 %v6540_v59, %v7769_v63  ;;  %v6542_v31 = vpop.eup %6541 }
 0x609   : > { %v1813_v3 = vpop.xlane.xlu0 %1812  ;;  %5818 = vmatprep.subr.msk.bf16.mxu0 %vm7162_vm1, %v5816_v38  ;;  %v1948_v63 = vmul.f32 %v6542_v31, %v7771_v17 }
 0x60a   : > { %6547 = vpow2.f32 %v1861_v5  ;;  %5266 = vmatprep.mubr.msk.f32.mxu0 %vm992_vm3, %v1945_v22  ;;  %v1839_v59 = vsub.f32 %v7812_v54, %v1813_v3 }
 0x60b   : > { %v6544_v34 = vpop.eup %6543  ;;  %5267 = vmatmul.mubr.msk.f32.gmra.mrb[36].mxu0 %vm992_vm3, %v1946_v40  ;;  %6549 = vpow2.f32 %v1867_v60 }
 0x60c   : > { %v1828_v36 = vpop.xlane.xlu1 %1827  ;;  %v1947_v56 = vmul.f32 %v6544_v34, %v7777_v43  ;;  %v1865_v5 = vmul.f32 1.442695, %v1839_v59 }
 0x60d   : > { %v1819_v7 = vpop.xlane.xlu0 %1818  ;;  %v1844_v31 = vsub.f32 %v7831_v10, %v1828_v36 }
 0x60e   : > { %5269 = vmatprep.mubr.msk.f32.mxu0 %vm992_vm3, %v1947_v56  ;;  %6551 = vpow2.f32 %v1865_v5  ;;  %v1841_v60 = vsub.f32 %v7826_v52, %v1819_v7 }
 0x60f   : > { %5270 = vmatmul.mubr.msk.f32.gmra.mrb[38].mxu0 %vm992_vm3, %v1948_v63  ;;  %v1875_v63 = vmul.f32 1.442695, %v1844_v31 }
 0x610   : > { %v7888_v23 = vpop.eup %6545  ;;  %v7891_v16 = vpop.permute.xlu1 %6195  ;;  %5821 = vmatpush3.bf16.xpose.msk.msra.mxu0 %vm7162_vm1, %v5816_v38  ;;  %v1842_v38 = vsub.f32 %v7817_v42, %v1822_v48  ;;  %v1869_v34 = vmul.f32 1.442695, %v1841_v60 }
 0x611   : > { %v1825_v51 = vpop.xlane.xlu0 %1824  ;;  %v1904_v14 = vsel %vm992_vm3, %v7888_v23, 0.0 }
 0x612   : > { %1905 = vadd.xlane.f32.xlu0 %v1904_v14  ;;  %v1871_v22 = vmul.f32 1.442695, %v1842_v38  ;;  %v1843_v40 = vsub.f32 %v7845_v55, %v1825_v51 }
 0x614   : > { %v7897_v43 = vpop.eup %6547  ;;  %v7899_v6 = vpop.permute.xlu1 %6200  ;;  %6553 = vpow2.f32 %v1871_v22  ;;  %v1873_v56 = vmul.f32 1.442695, %v1843_v40 }
 0x615   : > { %v6191_v17 = vpop.permute.xlu0 %6190  ;;  %v1901_v61 = vsel %vm992_vm3, %v7897_v43, 0.0  ;;  %v7903_v32 = vpop.eup %6549  ;;  %6555 = vpow2.f32 %v1869_v34  ;;  %v6203_v22 = vunpack.i.h.bf16 %v7899_v6 }
 0x616   : > { %v6193_v58 = vunpack.i.h.bf16 %v6191_v17  ;;  %v6192_v1 = vunpack.i.l.bf16 %v6191_v17  ;;  %1902 = vadd.xlane.f32.xlu1 %v1901_v61  ;;  %v1910_v15 = vsel %vm992_vm3, %v7903_v32, 0.0  ;;  %6557 = vpow2.f32 %v1873_v56 }
 0x617   : > { %6559 = vpow2.f32 %v1875_v63 }
 0x618   : > { %v5822_v25 = vpack.c.bf16 %v6193_v58, %v6192_v1  ;;  %v2280_v12 = vpop.permute.xlu1 %2279  ;;  %v7921_v14 = vpop.eup %6551 }
 0x619   : > { %5316 = vmatprep.mubr.msk.f32.mxu0 %vm653_vm0, %v2280_v12  ;;  %v1907_v54 = vsel %vm992_vm3, %v7921_v14, 0.0  ;;  %v6198_v12 = vunpack.i.h.bf16 %v7891_v16 }
 0x61a   : > { %5824 = vmatprep.subr.msk.bf16.mxu0 %vm7162_vm1, %v5822_v25  ;;  %1911 = vadd.xlane.f32.xlu1 %v1910_v15  ;;  %v6197_v15 = vunpack.i.l.bf16 %v7891_v16  ;;  %v6202_v16 = vunpack.i.l.bf16 %v7899_v6 }
 0x61b   : > { %5827 = vmatpush3.bf16.xpose.msk.msra.mxu0 %vm7162_vm1, %v5822_v25 }
 0x61c   : > { %v6206_v17 = vpop.permute.xlu1 %6205  ;;  %v5834_v5 = vpack.c.bf16 %v6198_v12, %v6197_v15  ;;  %v5840_v60 = vpack.c.bf16 %v6203_v22, %v6202_v16 }
 0x61e   : > { %v7925_v42 = vpop.eup %6553 }
 0x61f   : > { %v1916_v52 = vsel %vm992_vm3, %v7925_v42, 0.0  ;;  %v7929_v55 = vpop.eup %6555 }
 0x620   : > { %v7931_v10 = vpop.eup %6557  ;;  %v1913_v48 = vsel %vm992_vm3, %v7929_v55, 0.0 }
 0x621   : > { %v7935_v3 = vpop.eup %6559  ;;  %v1919_v36 = vsel %vm992_vm3, %v7931_v10, 0.0 }
 0x622   : > { %v1922_v7 = vsel %vm992_vm3, %v7935_v3, 0.0 }
 0x628   : > { %2281 = vrot.lane.b32.xlu0 %v7219_v18, %s6872_s23 }
 0x62b   : > { %2450 = vrot.lane.b32.xlu1 %v7222_v19, %s6872_s23 }
 0x647   : > { %1908 = vadd.xlane.f32.xlu0 %v1907_v54 }
 0x64b   : > { %1917 = vadd.xlane.f32.xlu0 %v1916_v52 }
 0x64f   : > { %1914 = vadd.xlane.f32.xlu0 %v1913_v48  ;;  %1920 = vadd.xlane.f32.xlu1 %v1919_v36 }
 0x653   : > { %1923 = vadd.xlane.f32.xlu0 %v1922_v7 }
 0x660   : > { %2285 = vrot.lane.b32.xlu1 %v7237_v0, %s6872_s23 }
 0x664   : > { %2289 = vrot.lane.b32.xlu1 %v7255_v37, %s6872_s23 }
 0x668   : > { %2293 = vrot.lane.b32.xlu1 %v7273_v46, %s6872_s23 }
 0x669   : > { %2448 = vrot.lane.b32.xlu0 %v7150_v28, %s6872_s23 }
 0x66c   : > { %2454 = vrot.lane.b32.xlu1 %v7239_v26, %s6872_s23 }
 0x66d   : > { %2283 = vrot.lane.b32.xlu0 %v7224_v21, %s6872_s23 }
 0x670   : > { %2458 = vrot.lane.b32.xlu1 %v7257_v39, %s6872_s23 }
 0x671   : > { %2287 = vrot.lane.b32.xlu0 %v7243_v30, %s6872_s23 }
 0x674   : > { %2462 = vrot.lane.b32.xlu1 %v7277_v49, %s6872_s23 }
 0x675   : > { %2291 = vrot.lane.b32.xlu0 %v7261_v41, %s6872_s23 }
 0x679   : > { %2452 = vrot.lane.b32.xlu0 %v7229_v24, %s6872_s23 }
 0x67d   : > { %2456 = vrot.lane.b32.xlu0 %v7247_v33, %s6872_s23 }
 0x681   : > { %2460 = vrot.lane.b32.xlu0 %v7265_v44, %s6872_s23 }
 0x69f   : > { %v1906_v51 = vpop.xlane.xlu0 %1905 }
 0x6a0   : > { %6561 = vrcp.f32 %v1906_v51 }
 0x6a3   : > { %v2282_v58 = vpop.permute.xlu0 %2281  ;;  %v1903_v1 = vpop.xlane.xlu1 %1902 }
 0x6a4   : > { %5317 = vmatmul.mubr.msk.f32.vlgmr.msra.gmra.mrb[40].mxu0 %vm653_vm0, %v2282_v58  ;;  %6563 = vrcp.f32 %v1903_v1 }
 0x6aa   : > { %v6562_v61 = vpop.eup %6561 }
 0x6ab   : > { %v1950_v38 = vmul.f32 %v6562_v61, %v7888_v23  ;;  %v6208_v23 = vunpack.i.h.bf16 %v6206_v17 }
 0x6ae   : > { %v6564_v25 = vpop.eup %6563 }
 0x6af   : > { %v1949_v59 = vmul.f32 %v6564_v25, %v7897_v43  ;;  %v6207_v43 = vunpack.i.l.bf16 %v6206_v17 }
 0x6b1   : > { %5288 = vmatprep.mubr.msk.f32.mxu1 %vm992_vm3, %v1949_v59  ;;  %v5846_v40 = vpack.c.bf16 %v6208_v23, %v6207_v43 }
 0x6b2   : > { %5289 = vmatmul.mubr.msk.f32.vlgmr.msra.gmra.mrb[64].mxu1 %vm992_vm3, %v1950_v38 }
 0x6b3   : > { %5833 = vmatpush3.bf16.xpose.msk.msra.mxu1 %vm7162_vm1, %v7833_v2  ;;  %v1912_v2 = vpop.xlane.xlu1 %1911 }
 0x6b4   : > { %5836 = vmatprep.subr.msk.bf16.mxu1 %vm7162_vm1, %v5834_v5  ;;  %6565 = vrcp.f32 %v1912_v2 }
 0x6b7   : > { %v2451_v48 = vpop.permute.xlu1 %2450 }
 0x6bb   : > { %5839 = vmatpush3.bf16.xpose.msk.msra.mxu1 %vm7162_vm1, %v5834_v5 }
 0x6bc   : > { %5842 = vmatprep.subr.msk.bf16.mxu1 %vm7162_vm1, %v5840_v60 }
 0x6be   : > { %v6566_v51 = vpop.eup %6565 }
 0x6bf   : > { %v1952_v59 = vmul.f32 %v6566_v51, %v7903_v32 }
 0x6c3   : > { %5845 = vmatpush3.bf16.xpose.msk.msra.mxu1 %vm7162_vm1, %v5840_v60 }
 0x6c4   : > { %5848 = vmatprep.subr.msk.bf16.mxu1 %vm7162_vm1, %v5846_v40 }
 0x6cb   : > { %5851 = vmatpush3.bf16.xpose.msk.msra.mxu1 %vm7162_vm1, %v5846_v40 }
 0x6d2   : > { %v7991_v6 = vpop.f32.mrb[32].mxu0 }
 0x6d3   : > { %v7993_v34 = vpop.f32.mrb[33].mxu0 }
 0x6d4   : > { %v1909_v31 = vpop.xlane.xlu0 %1908 }
 0x6d5   : > { %6567 = vrcp.f32 %v1909_v31 }
 0x6d7   : > { %v7997_v54 = vpop.f32.mrb[34].mxu0 }
 0x6d8   : > { %v1918_v63 = vpop.xlane.xlu0 %1917  ;;  %9024 = vst [vmem:[#allocation17_spill] sm:$0xff] %v7997_v54  ;;  %v7999_v52 = vpop.f32.mrb[35].mxu0 }
 0x6d9   : > { %9025 = vst [vmem:[#allocation40_spill] sm:$0xff] %v7999_v52  ;;  %6569 = vrcp.f32 %v1918_v63 }
 0x6dc   : > { %v1915_v7 = vpop.xlane.xlu0 %1914  ;;  %v1921_v17 = vpop.xlane.xlu1 %1920 }
 0x6dd   : > { %6571 = vrcp.f32 %v1915_v7 }
 0x6de   : > { %6573 = vrcp.f32 %v1921_v17  ;;  %v8003_v1 = vpop.f32.mrb[36].mxu0 }
 0x6df   : > { %v6568_v58 = vpop.eup %6567  ;;  %9026 = vst [vmem:[#allocation41_spill] sm:$0xff] %v8003_v1  ;;  %v8005_v25 = vpop.f32.mrb[37].mxu0 }
 0x6e0   : > { %v1924_v61 = vpop.xlane.xlu0 %1923  ;;  %9027 = vst [vmem:[#allocation42_spill] sm:$0xff] %v8005_v25  ;;  %v1951_v12 = vmul.f32 %v6568_v58, %v7921_v14  ;;  %v2286_v38 = vpop.permute.xlu1 %2285 }
 0x6e1   : > { %6575 = vrcp.f32 %v1924_v61 }
 0x6e2   : > { %5291 = vmatprep.mubr.msk.f32.mxu1 %vm992_vm3, %v1951_v12  ;;  %v8012_v5 = vpop.f32.mrb[38].mxu0 }
 0x6e3   : > { %9028 = vst [vmem:[#allocation43_spill] sm:$0xff] %v8012_v5  ;;  %5292 = vmatmul.mubr.msk.f32.gmra.mrb[66].mxu1 %vm992_vm3, %v1952_v59  ;;  %v8015_v16 = vpop.f32.mrb[39].mxu0  ;;  %v6570_v14 = vpop.eup %6569 }
 0x6e4   : > { %v2449_v22 = vpop.permute.xlu0 %2448  ;;  %9029 = vst [vmem:[#allocation44_spill] sm:$0xff] %v8015_v16  ;;  %v2290_v23 = vpop.permute.xlu1 %2289  ;;  %v1954_v31 = vmul.f32 %v6570_v14, %v7925_v42  ;;  %v9048_v16 = vld [vmem:[#allocation15_spill] sm:$0xff] }
 0x6e7   : > { %v6572_v43 = vpop.eup %6571 }
 0x6e8   : > { %v2284_v40 = vpop.permute.xlu0 %2283  ;;  %v1953_v2 = vmul.f32 %v6572_v43, %v7929_v55  ;;  %v6574_v32 = vpop.eup %6573 }
 0x6e9   : > { %5319 = vmatprep.mubr.msk.f32.mxu0 %vm653_vm0, %v2284_v40  ;;  %v1955_v63 = vmul.f32 %v6574_v32, %v7931_v10  ;;  %v2294_v51 = vpop.permute.xlu1 %2293 }
 0x6ea   : > { %5294 = vmatprep.mubr.msk.f32.mxu1 %vm992_vm3, %v1953_v2  ;;  %5320 = vmatmul.mubr.msk.f32.gmra.mrb[42].mxu0 %vm653_vm0, %v2286_v38 }
 0x6eb   : > { %v6576_v7 = vpop.eup %6575  ;;  %5295 = vmatmul.mubr.msk.f32.gmra.mrb[68].mxu1 %vm992_vm3, %v1954_v31 }
 0x6ec   : > { %v2288_v17 = vpop.permute.xlu0 %2287  ;;  %5297 = vmatprep.mubr.msk.f32.mxu1 %vm992_vm3, %v1955_v63  ;;  %v1956_v55 = vmul.f32 %v6576_v7, %v7935_v3 }
 0x6ed   : > { %5322 = vmatprep.mubr.msk.f32.mxu0 %vm653_vm0, %v2288_v17  ;;  %v2455_v10 = vpop.permute.xlu1 %2454 }
 0x6ee   : > { %5323 = vmatmul.mubr.msk.f32.gmra.mrb[44].mxu0 %vm653_vm0, %v2290_v23 }
 0x6ef   : > { %5298 = vmatmul.mubr.msk.f32.gmra.mrb[70].mxu1 %vm992_vm3, %v1956_v55 }
 0x6f0   : > { %v2292_v42 = vpop.permute.xlu0 %2291  ;;  %5344 = vmatprep.mubr.msk.f32.mxu1 %vm653_vm0, %v2449_v22 }
 0x6f1   : > { %5325 = vmatprep.mubr.msk.f32.mxu0 %vm653_vm0, %v2292_v42  ;;  %v2459_v3 = vpop.permute.xlu1 %2458 }
 0x6f2   : > { %5326 = vmatmul.mubr.msk.f32.gmra.mrb[46].mxu0 %vm653_vm0, %v2294_v51 }
 0x6f3   : > { %5345 = vmatmul.mubr.msk.f32.vlgmr.msra.gmra.mrb[72].mxu1 %vm653_vm0, %v2451_v48 }
 0x6f4   : > { %v2453_v58 = vpop.permute.xlu0 %2452 }
 0x6f5   : > { %5347 = vmatprep.mubr.msk.f32.mxu1 %vm653_vm0, %v2453_v58  ;;  %v2463_v59 = vpop.permute.xlu1 %2462 }
 0x6f7   : > { %5348 = vmatmul.mubr.msk.f32.gmra.mrb[74].mxu1 %vm653_vm0, %v2455_v10 }
 0x6f8   : > { %v2457_v61 = vpop.permute.xlu0 %2456 }
 0x6f9   : > { %5350 = vmatprep.mubr.msk.f32.mxu1 %vm653_vm0, %v2457_v61 }
 0x6fb   : > { %5351 = vmatmul.mubr.msk.f32.gmra.mrb[76].mxu1 %vm653_vm0, %v2459_v3 }
 0x6fc   : > { %v2461_v12 = vpop.permute.xlu0 %2460 }
 0x6fd   : > { %5353 = vmatprep.mubr.msk.f32.mxu1 %vm653_vm0, %v2461_v12 }
 0x6ff   : > { %5354 = vmatmul.mubr.msk.f32.gmra.mrb[78].mxu1 %vm653_vm0, %v2463_v59 }
 0x777   : > { %v5318_v38 = vpop.f32.mrb[40].mxu0 }
 0x778   : > { %v8043_v48 = vsel %vm7303_vm2, %v5318_v38, -inf  ;;  %v2409_v22 = vpop.f32.mrb[41].mxu0 }
 0x779   : > { %v2636_v14 = vsel %vm992_vm3, %v8043_v48, -inf  ;;  %v8049_v23 = vsel %vm7308_vm4, %v2409_v22, -inf }
 0x77a   : > { %v2633_v43 = vsel %vm992_vm3, %v8049_v23, -inf  ;;  %2637 = vmax.xlane.f32.xlu1 %v2636_v14 }
 0x77b   : > { %2634 = vmax.xlane.f32.xlu0 %v2633_v43 }
 0x785   : > { %v8053_v40 = vpop.f32.mrb[64].mxu1 }
 0x786   : > { %9030 = vst [vmem:[#allocation45_spill] sm:$0xff] %v8053_v40  ;;  %v8055_v2 = vpop.f32.mrb[65].mxu1  ;;  %v9047_v40 = vld [vmem:[#allocation22_spill] sm:$0xff] }
 0x787   : > { %9031 = vst [vmem:[#allocation46_spill] sm:$0xff] %v8055_v2  ;;  %v9046_v2 = vld [vmem:[#allocation13_spill] sm:$0xff] }
 0x7b6   : > { %v8059_v31 = vpop.f32.mrb[66].mxu1 }
 0x7b7   : > { %9032 = vst [vmem:[#allocation47_spill] sm:$0xff] %v8059_v31  ;;  %v8061_v63 = vpop.f32.mrb[67].mxu1  ;;  %v9045_v31 = vld [vmem:[#allocation12_spill] sm:$0xff] }
 0x7b8   : > { %9033 = vst [vmem:[#allocation48_spill] sm:$0xff] %v8061_v63  ;;  %v9044_v63 = vld [vmem:[#allocation14_spill] sm:$0xff] }
 0x7bd   : > { %v5321_v51 = vpop.f32.mrb[42].mxu0 }
 0x7be   : > { %v8067_v17 = vsel %vm7323_vm5, %v5321_v51, -inf  ;;  %v8069_v55 = vpop.f32.mrb[68].mxu1  ;;  %v2419_v42 = vpop.f32.mrb[43].mxu0 }
 0x7bf   : > { %9034 = vst [vmem:[#allocation49_spill] sm:$0xff] %v8069_v55  ;;  %v2642_v10 = vsel %vm992_vm3, %v8067_v17, -inf  ;;  %v8075_v58 = vsel %vm7350_vm6, %v2419_v42, -inf  ;;  %v8077_v3 = vpop.f32.mrb[69].mxu1  ;;  %v9043_v55 = vld [vmem:[#allocation20_spill] sm:$0xff] }
 0x7c0   : > { %9035 = vst [vmem:[#allocation50_spill] sm:$0xff] %v8077_v3  ;;  %v2639_v61 = vsel %vm992_vm3, %v8075_v58, -inf  ;;  %2643 = vmax.xlane.f32.xlu1 %v2642_v10  ;;  %v9042_v3 = vld [vmem:[#allocation23_spill] sm:$0xff] }
 0x7c1   : > { %2640 = vmax.xlane.f32.xlu0 %v2639_v61  ;;  %v5324_v59 = vpop.f32.mrb[44].mxu0 }
 0x7c2   : > { %v8085_v38 = vsel %vm7372_vm8, %v5324_v59, -inf  ;;  %v8087_v22 = vpop.f32.mrb[70].mxu1  ;;  %v2429_v14 = vpop.f32.mrb[45].mxu0 }
 0x7c3   : > { %9036 = vst [vmem:[#allocation51_spill] sm:$0xff] %v8087_v22  ;;  %v2648_v43 = vsel %vm992_vm3, %v8085_v38, -inf  ;;  %v8093_v51 = vsel %vm7367_vm7, %v2429_v14, -inf  ;;  %v8095_v42 = vpop.f32.mrb[71].mxu1  ;;  %v9041_v22 = vld [vmem:[#allocation19_spill] sm:$0xff] }
 0x7c4   : > { %9037 = vst [vmem:[#allocation52_spill] sm:$0xff] %v8095_v42  ;;  %v2645_v10 = vsel %vm992_vm3, %v8093_v51, -inf  ;;  %2649 = vmax.xlane.f32.xlu1 %v2648_v43 }
 0x7c5   : > { %2646 = vmax.xlane.f32.xlu0 %v2645_v10  ;;  %v5327_v59 = vpop.f32.mrb[46].mxu0 }
 0x7c6   : > { %v8103_v12 = vsel %vm7406_vm10, %v5327_v59, -inf  ;;  %v2439_v7 = vpop.f32.mrb[47].mxu0  ;;  %v8105_v32 = vpop.f32.mrb[72].mxu1 }
 0x7c7   : > { %v2654_v14 = vsel %vm992_vm3, %v8103_v12, -inf  ;;  %v8111_v60 = vsel %vm7401_vm9, %v2439_v7, -inf  ;;  %v8113_v15 = vpop.f32.mrb[73].mxu1  ;;  %v9038_v7 = vld [vmem:[#allocation18_spill] sm:$0xff] }
 0x7c8   : > { %v2651_v43 = vsel %vm992_vm3, %v8111_v60, -inf  ;;  %2655 = vmax.xlane.f32.xlu1 %v2654_v14  ;;  %v9039_v14 = vld [vmem:[#allocation16_spill] sm:$0xff] }
 0x7c9   : > { %2652 = vmax.xlane.f32.xlu0 %v2651_v43  ;;  %v9040_v43 = vld [vmem:[#allocation21_spill] sm:$0xff] }
 0x7ca   : > { %v8117_v10 = vpop.f32.mrb[74].mxu1 }
 0x7cb   : > { %v8119_v59 = vpop.f32.mrb[75].mxu1 }
 0x7ce   : > { %v8121_v61 = vpop.f32.mrb[76].mxu1 }
 0x7cf   : > { %v8123_v36 = vpop.f32.mrb[77].mxu1 }
 0x7d2   : > { %v8125_v56 = vpop.f32.mrb[78].mxu1 }
 0x7d3   : > { %v8127_v42 = vpop.f32.mrb[79].mxu1 }
 0x7d9   : > { %6215 = vrot.lane.b32.xlu1 %v9014_v45, %s6872_s23 }
 0x7dd   : > { %6220 = vrot.lane.b32.xlu1 %v9038_v7, %s6872_s23 }
 0x7df   : > { %6210 = vrot.lane.b32.xlu0 %v9039_v14, %s6872_s23 }
 0x7e1   : > { %6235 = vrot.lane.b32.xlu1 %v9040_v43, %s6872_s23 }
 0x7e3   : > { %6225 = vrot.lane.b32.xlu0 %v9041_v22, %s6872_s23 }
 0x7e5   : > { %6250 = vrot.lane.b32.xlu1 %v9042_v3, %s6872_s23 }
 0x7e7   : > { %6230 = vrot.lane.b32.xlu0 %v9043_v55, %s6872_s23 }
 0x7e9   : > { %6255 = vrot.lane.b32.xlu1 %v9044_v63, %s6873_s7 }
 0x7eb   : > { %6240 = vrot.lane.b32.xlu0 %v9045_v31, %s6873_s7 }
 0x7ed   : > { %6265 = vrot.lane.b32.xlu1 %v9046_v2, %s6873_s7 }
 0x7ef   : > { %6245 = vrot.lane.b32.xlu0 %v9047_v40, %s6872_s23 }
 0x7f1   : > { %6275 = vrot.lane.b32.xlu1 %v7182_v50, %s6873_s7 }
 0x7f3   : > { %6260 = vrot.lane.b32.xlu0 %v9048_v16, %s6873_s7 }
 0x7f5   : > { %6280 = vrot.lane.b32.xlu1 %v7194_v62, %s6873_s7 }
 0x7f7   : > { %6270 = vrot.lane.b32.xlu0 %v7204_v9, %s6873_s7 }
 0x7f9   : > { %3115 = vrot.lane.b32.xlu1 %v7148_v27, %s6873_s7 }
 0x7fb   : > { %3117 = vrot.lane.b32.xlu0 %v7219_v18, %s6873_s7 }
 0x7fd   : > { %3119 = vrot.lane.b32.xlu1 %v7224_v21, %s6873_s7 }
 0x7ff   : > { %3121 = vrot.lane.b32.xlu0 %v7237_v0, %s6873_s7 }
 0x801   : > { %6285 = vrot.lane.b32.xlu1 %v7206_v11, %s6873_s7 }
 0x807   : > { %v2638_v16 = vpop.xlane.xlu1 %2637 }
 0x808   : > { %v2635_v50 = vpop.xlane.xlu0 %2634  ;;  %v2682_v2 = vsub.f32 %v8043_v48, %v2638_v16 }
 0x809   : > { %v2681_v62 = vsub.f32 %v8049_v23, %v2635_v50 }
 0x80a   : > { %v2699_v27 = vmul.f32 1.442695, %v2682_v2 }
 0x80b   : > { %v2697_v9 = vmul.f32 1.442695, %v2681_v62 }
 0x80d   : > { %6577 = vpow2.f32 %v2697_v9 }
 0x80e   : > { %6579 = vpow2.f32 %v2699_v27 }
 0x817   : > { %v8171_v18 = vpop.eup %6577 }
 0x818   : > { %v2729_v21 = vsel %vm992_vm3, %v8171_v18, 0.0  ;;  %v8175_v0 = vpop.eup %6579 }
 0x819   : > { %v2732_v11 = vsel %vm992_vm3, %v8175_v0, 0.0 }
 0x81e   : > { %2730 = vadd.xlane.f32.xlu0 %v2729_v21 }
 0x825   : > { %2733 = vadd.xlane.f32.xlu1 %v2732_v11 }
 0x84d   : > { %v2644_v23 = vpop.xlane.xlu1 %2643 }
 0x84e   : > { %v2684_v31 = vsub.f32 %v8067_v17, %v2644_v23  ;;  %v2641_v63 = vpop.xlane.xlu0 %2640 }
 0x84f   : > { %v2683_v48 = vsub.f32 %v8075_v58, %v2641_v63 }
 0x850   : > { %v2703_v50 = vmul.f32 1.442695, %v2684_v31 }
 0x851   : > { %v2701_v62 = vmul.f32 1.442695, %v2683_v48  ;;  %v2650_v16 = vpop.xlane.xlu1 %2649 }
 0x852   : > { %6581 = vpow2.f32 %v2703_v50  ;;  %v2686_v9 = vsub.f32 %v8085_v38, %v2650_v16  ;;  %v2647_v2 = vpop.xlane.xlu0 %2646 }
 0x853   : > { %6583 = vpow2.f32 %v2701_v62  ;;  %v2685_v27 = vsub.f32 %v8093_v51, %v2647_v2 }
 0x854   : > { %v2707_v21 = vmul.f32 1.442695, %v2686_v9 }
 0x855   : > { %v2705_v5 = vmul.f32 1.442695, %v2685_v27  ;;  %v2656_v25 = vpop.xlane.xlu1 %2655 }
 0x856   : > { %6585 = vpow2.f32 %v2707_v21  ;;  %v2688_v11 = vsub.f32 %v8103_v12, %v2656_v25  ;;  %v2653_v17 = vpop.xlane.xlu0 %2652 }
 0x857   : > { %v2687_v23 = vsub.f32 %v8111_v60, %v2653_v17  ;;  %6587 = vpow2.f32 %v2705_v5 }
 0x858   : > { %v2711_v58 = vmul.f32 1.442695, %v2688_v11 }
 0x859   : > { %v2709_v31 = vmul.f32 1.442695, %v2687_v23  ;;  %v6216_v63 = vpop.permute.xlu1 %6215 }
 0x85a   : > { %6589 = vpow2.f32 %v2711_v58  ;;  %v6211_v48 = vpop.permute.xlu0 %6210  ;;  %v6218_v38 = vunpack.i.h.bf16 %v6216_v63  ;;  %v6217_v50 = vunpack.i.l.bf16 %v6216_v63 }
 0x85b   : > { %v6213_v62 = vunpack.i.h.bf16 %v6211_v48  ;;  %v6212_v16 = vunpack.i.l.bf16 %v6211_v48  ;;  %6591 = vpow2.f32 %v2709_v31 }
 0x85c   : > { %v8185_v51 = vpop.eup %6581  ;;  %v5856_v11 = vpack.c.bf16 %v6218_v38, %v6217_v50 }
 0x85d   : > { %v8187_v9 = vpop.eup %6583  ;;  %v6221_v2 = vpop.permute.xlu1 %6220  ;;  %v2738_v25 = vsel %vm992_vm3, %v8185_v51, 0.0  ;;  %v5852_v60 = vpack.c.bf16 %v6213_v62, %v6212_v16 }
 0x85e   : > { %v6223_v5 = vunpack.i.h.bf16 %v6221_v2  ;;  %v6222_v12 = vunpack.i.l.bf16 %v6221_v2  ;;  %2739 = vadd.xlane.f32.xlu1 %v2738_v25  ;;  %v6226_v27 = vpop.permute.xlu0 %6225  ;;  %v2735_v21 = vsel %vm992_vm3, %v8187_v9, 0.0 }
 0x85f   : > { %2736 = vadd.xlane.f32.xlu0 %v2735_v21  ;;  %5853 = vmatprep.subr.bf16.mxu0 %v5852_v60  ;;  %v6228_v63 = vunpack.i.h.bf16 %v6226_v27  ;;  %v6227_v48 = vunpack.i.l.bf16 %v6226_v27 }
 0x860   : > { %v8193_v17 = vpop.eup %6585  ;;  %5855 = vmatpush3.bf16.msra.mxu0 %v5852_v60  ;;  %v5860_v16 = vpack.c.bf16 %v6223_v5, %v6222_v12  ;;  %v8210_v5 = vsel %vm7303_vm2, %v8105_v32, -inf }
 0x861   : > { %v6236_v23 = vpop.permute.xlu1 %6235  ;;  %5857 = vmatprep.subr.bf16.mxu0 %v5856_v11  ;;  %v2744_v58 = vsel %vm992_vm3, %v8193_v17, 0.0  ;;  %v8197_v31 = vpop.eup %6587 }
 0x862   : > { %2745 = vadd.xlane.f32.xlu1 %v2744_v58  ;;  %v6231_v62 = vpop.permute.xlu0 %6230  ;;  %v6238_v2 = vunpack.i.h.bf16 %v6236_v23  ;;  %v6237_v25 = vunpack.i.l.bf16 %v6236_v23  ;;  %v2741_v60 = vsel %vm992_vm3, %v8197_v31, 0.0  ;;  %v5864_v58 = vpack.c.bf16 %v6228_v63, %v6227_v48 }
 0x863   : > { %v6233_v21 = vunpack.i.h.bf16 %v6231_v62  ;;  %v6232_v1 = vunpack.i.l.bf16 %v6231_v62  ;;  %v8226_v63 = vsel %vm7323_vm5, %v8117_v10, -inf }
 0x864   : > { %v8199_v38 = vpop.eup %6589  ;;  %5859 = vmatpush3.bf16.msra.mxu0 %v5856_v11  ;;  %v5872_v62 = vpack.c.bf16 %v6238_v2, %v6237_v25 }
 0x865   : > { %v6251_v50 = vpop.permute.xlu1 %6250  ;;  %5861 = vmatprep.subr.bf16.mxu0 %v5860_v16  ;;  %v2750_v52 = vsel %vm992_vm3, %v8199_v38, 0.0  ;;  %v5868_v54 = vpack.c.bf16 %v6233_v21, %v6232_v1  ;;  %v8205_v27 = vpop.eup %6591  ;;  %v2660_v1 = vsel %vm992_vm3, %v8210_v5, -inf }
 0x866   : > { %2742 = vadd.xlane.f32.xlu1 %v2741_v60  ;;  %2751 = vadd.xlane.f32.xlu0 %v2750_v52  ;;  %v6241_v12 = vpop.permute.xlu0 %6240  ;;  %v2747_v32 = vsel %vm992_vm3, %v8205_v27, 0.0  ;;  %v8221_v52 = vsel %vm7308_vm4, %v8113_v15, -inf  ;;  %v2666_v15 = vsel %vm992_vm3, %v8226_v63, -inf }
 0x867   : > { %v6243_v11 = vunpack.i.h.bf16 %v6241_v12  ;;  %v6242_v23 = vunpack.i.l.bf16 %v6241_v12  ;;  %5869 = vmatprep.subr.bf16.mxu1 %v5868_v54  ;;  %v2657_v12 = vsel %vm992_vm3, %v8221_v52, -inf }
 0x868   : > { %5863 = vmatpush3.bf16.msra.mxu0 %v5860_v16  ;;  %5871 = vmatpush3.bf16.msra.mxu1 %v5868_v54  ;;  %v6253_v54 = vunpack.i.h.bf16 %v6251_v50  ;;  %v6252_v16 = vunpack.i.l.bf16 %v6251_v50  ;;  %v8237_v50 = vsel %vm7350_vm6, %v8119_v59, -inf  ;;  %v8251_v59 = vsel %vm7367_vm7, %v8123_v36, -inf }
 0x869   : > { %v8214_v21 = vpop.permute.xlu1 %6255  ;;  %5865 = vmatprep.subr.bf16.mxu0 %v5864_v58  ;;  %5873 = vmatprep.subr.bf16.mxu1 %v5872_v62  ;;  %v5884_v2 = vpack.c.bf16 %v6243_v11, %v6242_v23  ;;  %v8242_v11 = vsel %vm7372_vm8, %v8121_v61, -inf  ;;  %v8256_v61 = vsel %vm7406_vm10, %v8125_v56, -inf  ;;  %v8270_v56 = vsel %vm7401_vm9, %v8127_v42, -inf }
 0x86a   : > { %2661 = vmax.xlane.f32.xlu0 %v2660_v1  ;;  %2748 = vadd.xlane.f32.xlu1 %v2747_v32  ;;  %v6246_v48 = vpop.permute.xlu0 %6245  ;;  %v2663_v1 = vsel %vm992_vm3, %v8237_v50, -inf  ;;  %v2672_v32 = vsel %vm992_vm3, %v8242_v11, -inf  ;;  %v2675_v36 = vsel %vm992_vm3, %v8270_v56, -inf }
 0x86b   : > { %v6248_v25 = vunpack.i.h.bf16 %v6246_v48  ;;  %v6247_v60 = vunpack.i.l.bf16 %v6246_v48  ;;  %v2678_v48 = vsel %vm992_vm3, %v8256_v61, -inf }
 0x86c   : > { %5867 = vmatpush3.bf16.msra.mxu0 %v5864_v58  ;;  %5875 = vmatpush3.bf16.msra.mxu1 %v5872_v62  ;;  %v5880_v62 = vpack.c.bf16 %v6253_v54, %v6252_v16  ;;  %v2669_v54 = vsel %vm992_vm3, %v8251_v59, -inf }
 0x86d   : > { %v6266_v40 = vpop.permute.xlu1 %6265  ;;  %5886 = vmatprep.subr.msk.bf16.mxu0 %vm7162_vm1, %v5884_v2  ;;  %v5876_v10 = vpack.c.bf16 %v6248_v25, %v6247_v60 }
 0x86e   : > { %2658 = vmax.xlane.f32.xlu0 %v2657_v12  ;;  %2667 = vmax.xlane.f32.xlu1 %v2666_v15  ;;  %v6268_v23 = vunpack.i.h.bf16 %v6266_v40  ;;  %v6267_v58 = vunpack.i.l.bf16 %v6266_v40  ;;  %v6261_v16 = vpop.permute.xlu0 %6260 }
 0x86f   : > { %5877 = vmatprep.subr.bf16.mxu1 %v5876_v10 }
 0x870   : > { %5879 = vmatpush3.bf16.msra.mxu1 %v5876_v10  ;;  %v8258_v40 = vpack.c.bf16 %v6268_v23, %v6267_v58 }
 0x871   : > { %5881 = vmatprep.subr.bf16.mxu1 %v5880_v62  ;;  %v8280_v25 = vpop.permute.xlu1 %6275 }
 0x872   : > { %2664 = vmax.xlane.f32.xlu0 %v2663_v1  ;;  %2673 = vmax.xlane.f32.xlu1 %v2672_v32  ;;  %v6271_v42 = vpop.permute.xlu0 %6270  ;;  %v6258_v1 = vunpack.i.h.bf16 %v8214_v21  ;;  %v6257_v32 = vunpack.i.l.bf16 %v8214_v21 }
 0x873   : > { %v6273_v21 = vunpack.i.h.bf16 %v6271_v42 }
 0x874   : > { %5883 = vmatpush3.bf16.msra.mxu1 %v5880_v62 }
 0x875   : > { %5910 = vmatprep.subr.msk.bf16.mxu1 %vm7162_vm1, %v8258_v40  ;;  %v8282_v60 = vpop.permute.xlu1 %6280 }
 0x876   : > { %2670 = vmax.xlane.f32.xlu0 %v2669_v54  ;;  %2679 = vmax.xlane.f32.xlu1 %v2678_v48  ;;  %v8284_v12 = vpop.permute.xlu0 %3117 }
 0x879   : > { %v8286_v15 = vpop.permute.xlu1 %3115 }
 0x87a   : > { %2676 = vmax.xlane.f32.xlu0 %v2675_v36  ;;  %v8288_v10 = vpop.permute.xlu0 %3121  ;;  %v5890_v36 = vpack.c.bf16 %v6258_v1, %v6257_v32 }
 0x87d   : > { %v8290_v23 = vpop.permute.xlu1 %3119 }
 0x887   : > { %3125 = vrot.lane.b32.xlu1 %v7255_v37, %s6873_s7 }
 0x88b   : > { %3129 = vrot.lane.b32.xlu1 %v7273_v46, %s6873_s7  ;;  %v8292_v46 = vpop.permute.xlu1 %6285 }
 0x890   : > { %3123 = vrot.lane.b32.xlu0 %v7243_v30, %s6873_s7 }
 0x8ab   : > { %v2731_v37 = vpop.xlane.xlu0 %2730 }
 0x8ac   : > { %6593 = vrcp.f32 %v2731_v37  ;;  %v6263_v37 = vunpack.i.h.bf16 %v6261_v16 }
 0x8b2   : > { %v2734_v58 = vpop.xlane.xlu1 %2733 }
 0x8b3   : > { %6595 = vrcp.f32 %v2734_v58 }
 0x8b6   : > { %v6594_v30 = vpop.eup %6593 }
 0x8b7   : > { %v2793_v62 = vmul.f32 %v6594_v30, %v8171_v18  ;;  %v6262_v18 = vunpack.i.l.bf16 %v6261_v16 }
 0x8b9   : > { %5372 = vmatprep.mubr.msk.f32.mxu0 %vm992_vm3, %v2793_v62  ;;  %v5896_v58 = vpack.c.bf16 %v6263_v37, %v6262_v18 }
 0x8bd   : > { %v6596_v54 = vpop.eup %6595 }
 0x8be   : > { %v2794_v48 = vmul.f32 %v6596_v54, %v8175_v0  ;;  %v6272_v0 = vunpack.i.l.bf16 %v6271_v42 }
 0x8c0   : > { %5373 = vmatmul.mubr.msk.f32.vlgmr.msra.gmra.mrb[48].mxu0 %vm992_vm3, %v2794_v48  ;;  %v5902_v30 = vpack.c.bf16 %v6273_v21, %v6272_v0 }
 0x8c1   : > { %5889 = vmatpush3.bf16.xpose.msk.msra.mxu0 %vm7162_vm1, %v5884_v2 }
 0x8c2   : > { %5892 = vmatprep.subr.msk.bf16.mxu0 %vm7162_vm1, %v5890_v36 }
 0x8c9   : > { %5895 = vmatpush3.bf16.xpose.msk.msra.mxu0 %vm7162_vm1, %v5890_v36 }
 0x8ca   : > { %5898 = vmatprep.subr.msk.bf16.mxu0 %vm7162_vm1, %v5896_v58 }
 0x8d1   : > { %5901 = vmatpush3.bf16.xpose.msk.msra.mxu0 %vm7162_vm1, %v5896_v58 }
 0x8d2   : > { %5904 = vmatprep.subr.msk.bf16.mxu0 %vm7162_vm1, %v5902_v30 }
 0x8d9   : > { %5907 = vmatpush3.bf16.xpose.msk.msra.mxu0 %vm7162_vm1, %v5902_v30 }
 0x8eb   : > { %v2740_v2 = vpop.xlane.xlu1 %2739 }
 0x8ec   : > { %6597 = vrcp.f32 %v2740_v2  ;;  %v2737_v16 = vpop.xlane.xlu0 %2736 }
 0x8ed   : > { %6599 = vrcp.f32 %v2737_v16 }
 0x8ef   : > { %v2746_v62 = vpop.xlane.xlu1 %2745 }
 0x8f0   : > { %6601 = vrcp.f32 %v2746_v62 }
 0x8f3   : > { %v2743_v1 = vpop.xlane.xlu1 %2742  ;;  %v2752_v32 = vpop.xlane.xlu0 %2751 }
 0x8f4   : > { %6603 = vrcp.f32 %v2743_v1 }
 0x8f5   : > { %6605 = vrcp.f32 %v2752_v32 }
 0x8f6   : > { %v6598_v42 = vpop.eup %6597 }
 0x8f7   : > { %v6600_v54 = vpop.eup %6599  ;;  %v2749_v48 = vpop.xlane.xlu1 %2748  ;;  %v2796_v58 = vmul.f32 %v6598_v42, %v8185_v51 }
 0x8f8   : > { %v2662_v36 = vpop.xlane.xlu0 %2661  ;;  %6607 = vrcp.f32 %v2749_v48  ;;  %v2795_v18 = vmul.f32 %v6600_v54, %v8187_v9 }
 0x8f9   : > { %v2690_v37 = vsub.f32 %v8210_v5, %v2662_v36 }
 0x8fa   : > { %5375 = vmatprep.mubr.msk.f32.mxu0 %vm992_vm3, %v2795_v18  ;;  %v6602_v62 = vpop.eup %6601 }
 0x8fb   : > { %v2715_v21 = vmul.f32 1.442695, %v2690_v37  ;;  %v2668_v0 = vpop.xlane.xlu1 %2667  ;;  %5376 = vmatmul.mubr.msk.f32.gmra.mrb[50].mxu0 %vm992_vm3, %v2796_v58  ;;  %v2798_v51 = vmul.f32 %v6602_v62, %v8193_v17 }
 0x8fc   : > { %v2659_v30 = vpop.xlane.xlu0 %2658  ;;  %v2692_v2 = vsub.f32 %v8226_v63, %v2668_v0 }
 0x8fd   : > { %6609 = vpow2.f32 %v2715_v21  ;;  %v2689_v16 = vsub.f32 %v8221_v52, %v2659_v30 }
 0x8fe   : > { %v6604_v1 = vpop.eup %6603  ;;  %v2719_v5 = vmul.f32 1.442695, %v2692_v2 }
 0x8ff   : > { %v2713_v32 = vmul.f32 1.442695, %v2689_v16  ;;  %v2797_v9 = vmul.f32 %v6604_v1, %v8197_v31  ;;  %v6606_v42 = vpop.eup %6605  ;;  %v2674_v37 = vpop.xlane.xlu1 %2673 }
 0x900   : > { %v2665_v48 = vpop.xlane.xlu0 %2664  ;;  %v2800_v36 = vmul.f32 %v6606_v42, %v8199_v38  ;;  %v2694_v30 = vsub.f32 %v8242_v11, %v2674_v37 }
 0x901   : > { %6611 = vpow2.f32 %v2713_v32  ;;  %5378 = vmatprep.mubr.msk.f32.mxu0 %vm992_vm3, %v2797_v9 }
 0x902   : > { %v6608_v54 = vpop.eup %6607  ;;  %5379 = vmatmul.mubr.msk.f32.gmra.mrb[52].mxu0 %vm992_vm3, %v2798_v51  ;;  %6613 = vpow2.f32 %v2719_v5  ;;  %v2723_v2 = vmul.f32 1.442695, %v2694_v30 }
 0x903   : > { %v2799_v52 = vmul.f32 %v6608_v54, %v8205_v27  ;;  %v2680_v38 = vpop.xlane.xlu1 %2679 }
 0x904   : > { %v2671_v63 = vpop.xlane.xlu0 %2670  ;;  %v2696_v1 = vsub.f32 %v8256_v61, %v2680_v38  ;;  %v6283_v38 = vunpack.i.h.bf16 %v8282_v60 }
 0x905   : > { %5381 = vmatprep.mubr.msk.f32.mxu0 %vm992_vm3, %v2799_v52  ;;  %v2693_v16 = vsub.f32 %v8251_v59, %v2671_v63 }
 0x906   : > { %5382 = vmatmul.mubr.msk.f32.gmra.mrb[54].mxu0 %vm992_vm3, %v2800_v36  ;;  %v6277_v36 = vunpack.i.l.bf16 %v8280_v25 }
 0x907   : > { %v8328_v18 = vpop.eup %6609  ;;  %5428 = vmatprep.mubr.msk.f32.mxu0 %vm653_vm0, %v8286_v15  ;;  %v3126_v0 = vpop.permute.xlu1 %3125  ;;  %v2721_v32 = vmul.f32 1.442695, %v2693_v16 }
 0x908   : > { %v2756_v17 = vsel %vm992_vm3, %v8328_v18, 0.0  ;;  %v2677_v31 = vpop.xlane.xlu0 %2676 }
 0x909   : > { %2757 = vadd.xlane.f32.xlu0 %v2756_v17  ;;  %v2695_v62 = vsub.f32 %v8270_v56, %v2677_v31 }
 0x90a   : > { %5429 = vmatmul.mubr.msk.f32.vlgmr.msra.gmra.mrb[56].mxu0 %vm653_vm0, %v8284_v12 }
 0x90b   : > { %v8337_v27 = vpop.eup %6611  ;;  %5431 = vmatprep.mubr.msk.f32.mxu0 %vm653_vm0, %v8290_v23  ;;  %v2691_v23 = vsub.f32 %v8237_v50, %v2665_v48  ;;  %v2725_v5 = vmul.f32 1.442695, %v2695_v62  ;;  %v3130_v63 = vpop.permute.xlu1 %3129 }
 0x90c   : > { %v2753_v58 = vsel %vm992_vm3, %v8337_v27, 0.0  ;;  %v8343_v21 = vpop.eup %6613  ;;  %v3124_v15 = vpop.permute.xlu0 %3123 }
 0x90d   : > { %2754 = vadd.xlane.f32.xlu1 %v2753_v58  ;;  %v2762_v12 = vsel %vm992_vm3, %v8343_v21, 0.0 }
 0x90e   : > { %5432 = vmatmul.mubr.msk.f32.gmra.mrb[58].mxu0 %vm653_vm0, %v8288_v10  ;;  %v2717_v10 = vmul.f32 1.442695, %v2691_v23 }
 0x90f   : > { %5434 = vmatprep.mubr.msk.f32.mxu0 %vm653_vm0, %v3124_v15 }
 0x910   : > { %6615 = vpow2.f32 %v2717_v10 }
 0x911   : > { %2763 = vadd.xlane.f32.xlu1 %v2762_v12  ;;  %6617 = vpow2.f32 %v2723_v2 }
 0x912   : > { %5435 = vmatmul.mubr.msk.f32.gmra.mrb[60].mxu0 %vm653_vm0, %v3126_v0  ;;  %6619 = vpow2.f32 %v2721_v32 }
 0x913   : > { %6621 = vpow2.f32 %v2725_v5 }
 0x91f   : > { %3127 = vrot.lane.b32.xlu0 %v7261_v41, %s6873_s7  ;;  %v2727_v41 = vmul.f32 1.442695, %v2696_v1 }
 0x921   : > { %6623 = vpow2.f32 %v2727_v41 }
 0x922   : > { %3286 = vrot.lane.b32.xlu1 %v7222_v19, %s6873_s7  ;;  %v8360_v19 = vpop.eup %6615 }
 0x923   : > { %v2759_v50 = vsel %vm992_vm3, %v8360_v19, 0.0  ;;  %v8364_v11 = vpop.eup %6617 }
 0x924   : > { %v2768_v59 = vsel %vm992_vm3, %v8364_v11, 0.0  ;;  %v8368_v56 = vpop.eup %6619 }
 0x925   : > { %v8370_v61 = vpop.eup %6621  ;;  %v2765_v48 = vsel %vm992_vm3, %v8368_v56, 0.0 }
 0x926   : > { %v2771_v51 = vsel %vm992_vm3, %v8370_v61, 0.0 }
 0x92b   : > { %v8374_v9 = vpop.eup %6623 }
 0x92c   : > { %v2774_v42 = vsel %vm992_vm3, %v8374_v9, 0.0 }
 0x93e   : > { %2760 = vadd.xlane.f32.xlu0 %v2759_v50 }
 0x942   : > { %2769 = vadd.xlane.f32.xlu0 %v2768_v59 }
 0x946   : > { %2766 = vadd.xlane.f32.xlu0 %v2765_v48  ;;  %2772 = vadd.xlane.f32.xlu1 %v2771_v51 }
 0x94a   : > { %2775 = vadd.xlane.f32.xlu0 %v2774_v42 }
 0x957   : > { %3290 = vrot.lane.b32.xlu1 %v7239_v26, %s6873_s7 }
 0x95b   : > { %3294 = vrot.lane.b32.xlu1 %v7257_v39, %s6873_s7 }
 0x95f   : > { %3298 = vrot.lane.b32.xlu1 %v7277_v49, %s6873_s7 }
 0x960   : > { %3284 = vrot.lane.b32.xlu0 %v7150_v28, %s6873_s7 }
 0x964   : > { %3288 = vrot.lane.b32.xlu0 %v7229_v24, %s6873_s7 }
 0x968   : > { %3292 = vrot.lane.b32.xlu0 %v7247_v33, %s6873_s7 }
 0x96c   : > { %3296 = vrot.lane.b32.xlu0 %v7265_v44, %s6873_s7  ;;  %v6278_v44 = vunpack.i.h.bf16 %v8280_v25  ;;  %v6282_v25 = vunpack.i.l.bf16 %v8282_v60 }
 0x96e   : > { %v5914_v31 = vpack.c.bf16 %v6278_v44, %v6277_v36  ;;  %v5920_v58 = vpack.c.bf16 %v6283_v38, %v6282_v25 }
 0x993   : > { %v8394_v54 = vpop.f32.mrb[48].mxu0 }
 0x994   : > { %v8396_v26 = vpop.f32.mrb[49].mxu0 }
 0x995   : > { %v6334_v39 = vpack.i.bf16 %v8394_v54, %v8396_v26 }
 0x996   : > { %v2758_v49 = vpop.xlane.xlu0 %2757 }
 0x997   : > { %6625 = vrcp.f32 %v2758_v49 }
 0x99a   : > { %v3128_v52 = vpop.permute.xlu0 %3127  ;;  %v2755_v28 = vpop.xlane.xlu1 %2754 }
 0x99b   : > { %5437 = vmatprep.mubr.msk.f32.mxu0 %vm653_vm0, %v3128_v52  ;;  %6627 = vrcp.f32 %v2755_v28 }
 0x99c   : > { %5438 = vmatmul.mubr.msk.f32.gmra.mrb[62].mxu0 %vm653_vm0, %v3130_v63 }
 0x9a1   : > { %v6626_v24 = vpop.eup %6625 }
 0x9a2   : > { %v2802_v17 = vmul.f32 %v6626_v24, %v8328_v18  ;;  %v6288_v18 = vunpack.i.h.bf16 %v8292_v46 }
 0x9a5   : > { %v6628_v33 = vpop.eup %6627 }
 0x9a6   : > { %v2801_v37 = vmul.f32 %v6628_v33, %v8337_v27  ;;  %v6287_v27 = vunpack.i.l.bf16 %v8292_v46 }
 0x9a8   : > { %5400 = vmatprep.mubr.msk.f32.mxu1 %vm992_vm3, %v2801_v37  ;;  %v5926_v15 = vpack.c.bf16 %v6288_v18, %v6287_v27 }
 0x9a9   : > { %5401 = vmatmul.mubr.msk.f32.vlgmr.msra.gmra.mrb[80].mxu1 %vm992_vm3, %v2802_v17 }
 0x9aa   : > { %5913 = vmatpush3.bf16.xpose.msk.msra.mxu1 %vm7162_vm1, %v8258_v40  ;;  %v2764_v40 = vpop.xlane.xlu1 %2763 }
 0x9ab   : > { %5916 = vmatprep.subr.msk.bf16.mxu1 %vm7162_vm1, %v5914_v31  ;;  %6629 = vrcp.f32 %v2764_v40 }
 0x9ae   : > { %v3287_v23 = vpop.permute.xlu1 %3286 }
 0x9b2   : > { %5919 = vmatpush3.bf16.xpose.msk.msra.mxu1 %vm7162_vm1, %v5914_v31 }
 0x9b3   : > { %5922 = vmatprep.subr.msk.bf16.mxu1 %vm7162_vm1, %v5920_v58 }
 0x9b5   : > { %v6630_v16 = vpop.eup %6629 }
 0x9b6   : > { %v2804_v50 = vmul.f32 %v6630_v16, %v8343_v21 }
 0x9ba   : > { %5925 = vmatpush3.bf16.xpose.msk.msra.mxu1 %vm7162_vm1, %v5920_v58 }
 0x9bb   : > { %5928 = vmatprep.subr.msk.bf16.mxu1 %vm7162_vm1, %v5926_v15 }
 0x9c2   : > { %5931 = vmatpush3.bf16.xpose.msk.msra.mxu1 %vm7162_vm1, %v5926_v15 }
 0x9cb   : > { %v2761_v60 = vpop.xlane.xlu0 %2760 }
 0x9cc   : > { %6631 = vrcp.f32 %v2761_v60 }
 0x9ce   : > { %v8427_v0 = vpop.f32.mrb[50].mxu0 }
 0x9cf   : > { %v2770_v12 = vpop.xlane.xlu0 %2769  ;;  %v8429_v30 = vpop.f32.mrb[51].mxu0 }
 0x9d0   : > { %v6349_v46 = vpack.i.bf16 %v8427_v0, %v8429_v30  ;;  %6633 = vrcp.f32 %v2770_v12  ;;  %v9057_v0 = vld [vmem:[#allocation43_spill] sm:$0xff]  ;;  %v9058_v30 = vld [vmem:[#allocation44_spill] sm:$0xff] }
 0x9d3   : > { %v2767_v10 = vpop.xlane.xlu0 %2766  ;;  %v2773_v2 = vpop.xlane.xlu1 %2772 }
 0x9d4   : > { %6635 = vrcp.f32 %v2767_v10 }
 0x9d5   : > { %6637 = vrcp.f32 %v2773_v2  ;;  %v8433_v62 = vpop.f32.mrb[52].mxu0 }
 0x9d6   : > { %v6632_v35 = vpop.eup %6631  ;;  %v8435_v32 = vpop.f32.mrb[53].mxu0 }
 0x9d7   : > { %v2776_v1 = vpop.xlane.xlu0 %2775  ;;  %v2803_v5 = vmul.f32 %v6632_v35, %v8360_v19  ;;  %v6364_v41 = vpack.i.bf16 %v8433_v62, %v8435_v32  ;;  %v3291_v60 = vpop.permute.xlu1 %3290  ;;  %v9060_v62 = vld [vmem:[#allocation45_spill] sm:$0xff]  ;;  %v9061_v32 = vld [vmem:[#allocation46_spill] sm:$0xff] }
 0x9d8   : > { %6639 = vrcp.f32 %v2776_v1 }
 0x9d9   : > { %5403 = vmatprep.mubr.msk.f32.mxu1 %vm992_vm3, %v2803_v5  ;;  %v8442_v59 = vpop.f32.mrb[54].mxu0 }
 0x9da   : > { %5404 = vmatmul.mubr.msk.f32.gmra.mrb[82].mxu1 %vm992_vm3, %v2804_v50  ;;  %v8445_v48 = vpop.f32.mrb[55].mxu0  ;;  %v6634_v42 = vpop.eup %6633 }
 0x9db   : > { %v6379_v51 = vpack.i.bf16 %v8442_v59, %v8445_v48  ;;  %v3285_v24 = vpop.permute.xlu0 %3284  ;;  %v2806_v36 = vmul.f32 %v6634_v42, %v8364_v11  ;;  %v3295_v35 = vpop.permute.xlu1 %3294  ;;  %v9063_v59 = vld [vmem:[#allocation47_spill] sm:$0xff]  ;;  %v9064_v48 = vld [vmem:[#allocation48_spill] sm:$0xff] }
 0x9dd   : > { %v5430_v19 = vpop.f32.mrb[56].mxu0 }
 0x9de   : > { %v6636_v49 = vpop.eup %6635  ;;  %v3454_v52 = vsel %vm7303_vm2, %v5430_v19, -inf  ;;  %v3245_v28 = vpop.f32.mrb[57].mxu0 }
 0x9df   : > { %v6638_v63 = vpop.eup %6637  ;;  %v2805_v21 = vmul.f32 %v6636_v49, %v8368_v56  ;;  %v3472_v33 = vsel %vm992_vm3, %v3454_v52, -inf  ;;  %v3453_v44 = vsel %vm7308_vm4, %v3245_v28, -inf  ;;  %v3289_v18 = vpop.permute.xlu0 %3288 }
 0x9e0   : > { %v3469_v37 = vsel %vm992_vm3, %v3453_v44, -inf  ;;  %3473 = vmax.xlane.f32.xlu1 %v3472_v33  ;;  %v2807_v17 = vmul.f32 %v6638_v63, %v8370_v61  ;;  %v3299_v5 = vpop.permute.xlu1 %3298 }
 0x9e1   : > { %5406 = vmatprep.mubr.msk.f32.mxu1 %vm992_vm3, %v2805_v21  ;;  %3470 = vmax.xlane.f32.xlu0 %v3469_v37  ;;  %v5433_v56 = vpop.f32.mrb[58].mxu0 }
 0x9e2   : > { %v6640_v31 = vpop.eup %6639  ;;  %5407 = vmatmul.mubr.msk.f32.gmra.mrb[84].mxu1 %vm992_vm3, %v2806_v36  ;;  %v3255_v38 = vpop.f32.mrb[59].mxu0  ;;  %v3456_v27 = vsel %vm7323_vm5, %v5433_v56, -inf }
 0x9e3   : > { %5409 = vmatprep.mubr.msk.f32.mxu1 %vm992_vm3, %v2807_v17  ;;  %v2808_v25 = vmul.f32 %v6640_v31, %v8374_v9  ;;  %v3455_v11 = vsel %vm7350_vm6, %v3255_v38, -inf  ;;  %v3478_v12 = vsel %vm992_vm3, %v3456_v27, -inf  ;;  %v3293_v2 = vpop.permute.xlu0 %3292 }
 0x9e4   : > { %v3475_v58 = vsel %vm992_vm3, %v3455_v11, -inf }
 0x9e5   : > { %3476 = vmax.xlane.f32.xlu0 %v3475_v58  ;;  %v5436_v61 = vpop.f32.mrb[60].mxu0 }
 0x9e6   : > { %5410 = vmatmul.mubr.msk.f32.gmra.mrb[86].mxu1 %vm992_vm3, %v2808_v25  ;;  %v3458_v15 = vsel %vm7372_vm8, %v5436_v61, -inf  ;;  %v3265_v40 = vpop.f32.mrb[61].mxu0 }
 0x9e7   : > { %5456 = vmatprep.mubr.msk.f32.mxu1 %vm653_vm0, %v3285_v24  ;;  %v3484_v9 = vsel %vm992_vm3, %v3458_v15, -inf  ;;  %v3457_v10 = vsel %vm7367_vm7, %v3265_v40, -inf  ;;  %v3297_v1 = vpop.permute.xlu0 %3296 }
 0x9e8   : > { %3485 = vmax.xlane.f32.xlu1 %v3484_v9  ;;  %v3481_v16 = vsel %vm992_vm3, %v3457_v10, -inf }
 0x9e9   : > { %3479 = vmax.xlane.f32.xlu0 %v3478_v12 }
 0x9ea   : > { %5457 = vmatmul.mubr.msk.f32.vlgmr.msra.gmra.mrb[88].mxu1 %vm653_vm0, %v3287_v23 }
 0x9eb   : > { %5459 = vmatprep.mubr.msk.f32.mxu1 %vm653_vm0, %v3289_v18 }
 0x9ed   : > { %3482 = vmax.xlane.f32.xlu0 %v3481_v16 }
 0x9ee   : > { %5460 = vmatmul.mubr.msk.f32.gmra.mrb[90].mxu1 %vm653_vm0, %v3291_v60 }
 0x9ef   : > { %5462 = vmatprep.mubr.msk.f32.mxu1 %vm653_vm0, %v3293_v2 }
 0x9f2   : > { %5463 = vmatmul.mubr.msk.f32.gmra.mrb[92].mxu1 %vm653_vm0, %v3295_v35 }
 0x9f3   : > { %5465 = vmatprep.mubr.msk.f32.mxu1 %vm653_vm0, %v3297_v1 }
 0x9f6   : > { %5466 = vmatmul.mubr.msk.f32.gmra.mrb[94].mxu1 %vm653_vm0, %v3299_v5 }
 0xa6d   : > { %v3474_v23 = vpop.xlane.xlu1 %3473 }
 0xa6e   : > { %v3518_v50 = vsub.f32 %v3454_v52, %v3474_v23  ;;  %v3471_v42 = vpop.xlane.xlu0 %3470 }
 0xa6f   : > { %v5439_v49 = vpop.f32.mrb[62].mxu0  ;;  %v3517_v19 = vsub.f32 %v3453_v44, %v3471_v42 }
 0xa70   : > { %v8485_v63 = vsel %vm7406_vm10, %v5439_v49, -inf  ;;  %v3275_v28 = vpop.f32.mrb[63].mxu0  ;;  %v3535_v21 = vmul.f32 1.442695, %v3518_v50 }
 0xa71   : > { %v3490_v24 = vsel %vm992_vm3, %v8485_v63, -inf  ;;  %v8491_v33 = vsel %vm7401_vm9, %v3275_v28, -inf  ;;  %v3533_v36 = vmul.f32 1.442695, %v3517_v19 }
 0xa72   : > { %v3487_v52 = vsel %vm992_vm3, %v8491_v33, -inf  ;;  %3491 = vmax.xlane.f32.xlu1 %v3490_v24  ;;  %6641 = vpow2.f32 %v3535_v21  ;;  %v3477_v44 = vpop.xlane.xlu0 %3476 }
 0xa73   : > { %3488 = vmax.xlane.f32.xlu0 %v3487_v52  ;;  %6643 = vpow2.f32 %v3533_v36  ;;  %v3519_v37 = vsub.f32 %v3455_v11, %v3477_v44 }
 0xa75   : > { %v3537_v17 = vmul.f32 1.442695, %v3519_v37  ;;  %v3486_v31 = vpop.xlane.xlu1 %3485 }
 0xa76   : > { %v3522_v56 = vsub.f32 %v3458_v15, %v3486_v31  ;;  %v3480_v38 = vpop.xlane.xlu0 %3479 }
 0xa77   : > { %6645 = vpow2.f32 %v3537_v17  ;;  %v3520_v25 = vsub.f32 %v3456_v27, %v3480_v38 }
 0xa78   : > { %v3543_v58 = vmul.f32 1.442695, %v3522_v56 }
 0xa79   : > { %v3539_v18 = vmul.f32 1.442695, %v3520_v25 }
 0xa7a   : > { %v3483_v61 = vpop.xlane.xlu0 %3482 }
 0xa7b   : > { %6647 = vpow2.f32 %v3539_v18  ;;  %v3521_v40 = vsub.f32 %v3457_v10, %v3483_v61 }
 0xa7c   : > { %v8495_v9 = vpop.eup %6641  ;;  %v8497_v60 = vpop.f32.mrb[80].mxu1  ;;  %6649 = vpow2.f32 %v3543_v58 }
 0xa7d   : > { %v8499_v12 = vpop.eup %6643  ;;  %v3541_v2 = vmul.f32 1.442695, %v3521_v40  ;;  %v8501_v11 = vpop.f32.mrb[81].mxu1  ;;  %v3568_v15 = vsel %vm992_vm3, %v8495_v9, 0.0 }
 0xa7e   : > { %v6394_v27 = vpack.i.bf16 %v8497_v60, %v8501_v11  ;;  %3569 = vadd.xlane.f32.xlu1 %v3568_v15  ;;  %v3565_v10 = vsel %vm992_vm3, %v8499_v12, 0.0 }
 0xa7f   : > { %6651 = vpow2.f32 %v3541_v2  ;;  %3566 = vadd.xlane.f32.xlu0 %v3565_v10 }
 0xa81   : > { %v8509_v16 = vpop.eup %6645 }
 0xa82   : > { %v3571_v35 = vsel %vm992_vm3, %v8509_v16, 0.0 }
 0xa83   : > { %3572 = vadd.xlane.f32.xlu0 %v3571_v35 }
 0xa85   : > { %v8513_v1 = vpop.eup %6647 }
 0xa86   : > { %v3574_v5 = vsel %vm992_vm3, %v8513_v1, 0.0  ;;  %v8517_v23 = vpop.eup %6649 }
 0xa87   : > { %3575 = vadd.xlane.f32.xlu1 %v3574_v5  ;;  %v3580_v42 = vsel %vm992_vm3, %v8517_v23, 0.0 }
 0xa89   : > { %v8519_v50 = vpop.eup %6651 }
 0xa8a   : > { %v3577_v49 = vsel %vm992_vm3, %v8519_v50, 0.0 }
 0xa8b   : > { %3581 = vadd.xlane.f32.xlu1 %v3580_v42  ;;  %3578 = vadd.xlane.f32.xlu0 %v3577_v49 }
 0xaad   : > { %v8525_v19 = vpop.f32.mrb[82].mxu1 }
 0xaae   : > { %v8527_v28 = vpop.f32.mrb[83].mxu1 }
 0xaaf   : > { %v6404_v21 = vpack.i.bf16 %v8525_v19, %v8527_v28  ;;  %v9066_v28 = vld [vmem:[#allocation49_spill] sm:$0xff] }
 0xab5   : > { %v8531_v24 = vpop.f32.mrb[84].mxu1 }
 0xab6   : > { %v8533_v36 = vpop.f32.mrb[85].mxu1 }
 0xab7   : > { %v6419_v52 = vpack.i.bf16 %v8531_v24, %v8533_v36  ;;  %v9069_v36 = vld [vmem:[#allocation51_spill] sm:$0xff] }
 0xab9   : > { %v8537_v44 = vpop.f32.mrb[86].mxu1 }
 0xaba   : > { %v8539_v37 = vpop.f32.mrb[87].mxu1 }
 0xabb   : > { %v6439_v17 = vpack.i.bf16 %v8537_v44, %v8539_v37 }
 0xabd   : > { %v5458_v31 = vpop.f32.mrb[88].mxu1 }
 0xabe   : > { %v8545_v56 = vsel %vm7303_vm2, %v5458_v31, -inf  ;;  %v3414_v38 = vpop.f32.mrb[89].mxu1 }
 0xabf   : > { %v3496_v25 = vsel %vm992_vm3, %v8545_v56, -inf  ;;  %v8551_v58 = vsel %vm7308_vm4, %v3414_v38, -inf }
 0xac0   : > { %v3493_v18 = vsel %vm992_vm3, %v8551_v58, -inf  ;;  %3497 = vmax.xlane.f32.xlu1 %v3496_v25 }
 0xac1   : > { %v5461_v61 = vpop.f32.mrb[90].mxu1  ;;  %3494 = vmax.xlane.f32.xlu0 %v3493_v18 }
 0xac2   : > { %v8557_v40 = vsel %vm7323_vm5, %v5461_v61, -inf  ;;  %v3424_v8 = vpop.f32.mrb[91].mxu1 }
 0xac3   : > { %v3502_v2 = vsel %vm992_vm3, %v8557_v40, -inf  ;;  %v8563_v15 = vsel %vm7350_vm6, %v3424_v8, -inf }
 0xac4   : > { %v3499_v13 = vsel %vm992_vm3, %v8563_v15, -inf  ;;  %3503 = vmax.xlane.f32.xlu1 %v3502_v2 }
 0xac5   : > { %v5464_v10 = vpop.f32.mrb[92].mxu1  ;;  %3500 = vmax.xlane.f32.xlu0 %v3499_v13 }
 0xac6   : > { %v8569_v35 = vsel %vm7372_vm8, %v5464_v10, -inf  ;;  %v3434_v29 = vpop.f32.mrb[93].mxu1 }
 0xac7   : > { %v3508_v5 = vsel %vm992_vm3, %v8569_v35, -inf  ;;  %v8575_v42 = vsel %vm7367_vm7, %v3434_v29, -inf }
 0xac8   : > { %v3505_v4 = vsel %vm992_vm3, %v8575_v42, -inf  ;;  %3509 = vmax.xlane.f32.xlu1 %v3508_v5 }
 0xac9   : > { %v5467_v49 = vpop.f32.mrb[94].mxu1  ;;  %3506 = vmax.xlane.f32.xlu0 %v3505_v4 }
 0xaca   : > { %v8581_v31 = vsel %vm7406_vm10, %v5467_v49, -inf  ;;  %v3444_v57 = vpop.f32.mrb[95].mxu1 }
 0xacb   : > { %v3514_v38 = vsel %vm992_vm3, %v8581_v31, -inf  ;;  %v8587_v25 = vsel %vm7401_vm9, %v3444_v57, -inf }
 0xacc   : > { %v3511_v47 = vsel %vm992_vm3, %v8587_v25, -inf  ;;  %3515 = vmax.xlane.f32.xlu1 %v3514_v38 }
 0xacd   : > { %3512 = vmax.xlane.f32.xlu0 %v3511_v47 }
 0xae3   : > { %6290 = vrot.lane.b32.xlu0 %v9039_v14, %s6873_s7 }
 0xae7   : > { %6300 = vrot.lane.b32.xlu0 %v9038_v7, %s6873_s7 }
 0xaeb   : > { %6310 = vrot.lane.b32.xlu0 %v9043_v55, %s6873_s7 }
 0xaef   : > { %6315 = vrot.lane.b32.xlu0 %v9040_v43, %s6873_s7 }
 0xaff   : > { %v3492_v20 = vpop.xlane.xlu1 %3491 }
 0xb00   : > { %v3524_v53 = vsub.f32 %v8485_v63, %v3492_v20  ;;  %v3489_v18 = vpop.xlane.xlu0 %3488 }
 0xb01   : > { %v3523_v61 = vsub.f32 %v8491_v33, %v3489_v18 }
 0xb02   : > { %v3547_v8 = vmul.f32 1.442695, %v3524_v53 }
 0xb03   : > { %v3545_v2 = vmul.f32 1.442695, %v3523_v61 }
 0xb05   : > { %6653 = vpow2.f32 %v3545_v2 }
 0xb06   : > { %6655 = vpow2.f32 %v3547_v8 }
 0xb0b   : > { %v8615_v10 = vpop.xlane.xlu1 %3569 }
 0xb0c   : > { %v3567_v14 = vpop.xlane.xlu0 %3566 }
 0xb0d   : > { %6657 = vrcp.f32 %v3567_v14 }
 0xb0f   : > { %v8601_v13 = vpop.eup %6653 }
 0xb10   : > { %v3583_v55 = vsel %vm992_vm3, %v8601_v13, 0.0  ;;  %v8605_v7 = vpop.eup %6655  ;;  %v8619_v5 = vpop.xlane.xlu0 %3572 }
 0xb11   : > { %3584 = vadd.xlane.f32.xlu1 %v3583_v55  ;;  %v3586_v43 = vsel %vm992_vm3, %v8605_v7, 0.0 }
 0xb14   : > { %v8617_v29 = vpop.xlane.xlu1 %3575 }
 0xb15   : > { %3587 = vadd.xlane.f32.xlu1 %v3586_v43 }
 0xb17   : > { %v6658_v63 = vpop.eup %6657 }
 0xb18   : > { %v3629_v33 = vmul.f32 %v6658_v63, %v8499_v12  ;;  %v8621_v4 = vpop.xlane.xlu1 %3581  ;;  %v8623_v49 = vpop.xlane.xlu0 %3578 }
 0xb1a   : > { %5484 = vmatprep.mubr.msk.f32.mxu0 %vm992_vm3, %v3629_v33 }
 0xb26   : > { %6295 = vrot.lane.b32.xlu1 %v9014_v45, %s6873_s7 }
 0xb2a   : > { %6305 = vrot.lane.b32.xlu1 %v9041_v22, %s6873_s7 }
 0xb4d   : > { %v3498_v57 = vpop.xlane.xlu1 %3497 }
 0xb4e   : > { %v3526_v12 = vsub.f32 %v8545_v56, %v3498_v57  ;;  %v3495_v38 = vpop.xlane.xlu0 %3494 }
 0xb4f   : > { %v3525_v47 = vsub.f32 %v8551_v58, %v3495_v38 }
 0xb50   : > { %v3551_v45 = vmul.f32 1.442695, %v3526_v12 }
 0xb51   : > { %v3549_v20 = vmul.f32 1.442695, %v3525_v47  ;;  %v3504_v53 = vpop.xlane.xlu1 %3503 }
 0xb52   : > { %6659 = vpow2.f32 %v3551_v45  ;;  %v3528_v22 = vsub.f32 %v8557_v40, %v3504_v53  ;;  %v3501_v18 = vpop.xlane.xlu0 %3500 }
 0xb53   : > { %6661 = vpow2.f32 %v3549_v20  ;;  %v3527_v61 = vsub.f32 %v8563_v15, %v3501_v18 }
 0xb54   : > { %v3555_v8 = vmul.f32 1.442695, %v3528_v22 }
 0xb55   : > { %v3553_v2 = vmul.f32 1.442695, %v3527_v61  ;;  %v3510_v14 = vpop.xlane.xlu1 %3509 }
 0xb56   : > { %6663 = vpow2.f32 %v3555_v8  ;;  %v3530_v55 = vsub.f32 %v8569_v35, %v3510_v14  ;;  %v3507_v56 = vpop.xlane.xlu0 %3506 }
 0xb57   : > { %v3529_v43 = vsub.f32 %v8575_v42, %v3507_v56  ;;  %6665 = vpow2.f32 %v3553_v2 }
 0xb58   : > { %v3559_v58 = vmul.f32 1.442695, %v3530_v55 }
 0xb59   : > { %v3557_v63 = vmul.f32 1.442695, %v3529_v43  ;;  %v3516_v33 = vpop.xlane.xlu1 %3515 }
 0xb5a   : > { %v3532_v57 = vsub.f32 %v8581_v31, %v3516_v33  ;;  %v3513_v40 = vpop.xlane.xlu0 %3512 }
 0xb5b   : > { %6667 = vpow2.f32 %v3557_v63  ;;  %v3531_v38 = vsub.f32 %v8587_v25, %v3513_v40 }
 0xb5c   : > { %v8632_v12 = vpop.eup %6659  ;;  %6669 = vpow2.f32 %v3559_v58  ;;  %v3563_v15 = vmul.f32 1.442695, %v3532_v57 }
 0xb5d   : > { %v8635_v47 = vpop.eup %6661  ;;  %v3592_v35 = vsel %vm992_vm3, %v8632_v12, 0.0  ;;  %v3561_v22 = vmul.f32 1.442695, %v3531_v38 }
 0xb5e   : > { %3593 = vadd.xlane.f32.xlu1 %v3592_v35  ;;  %v6291_v42 = vpop.permute.xlu0 %6290  ;;  %v3589_v45 = vsel %vm992_vm3, %v8635_v47, 0.0  ;;  %6671 = vpow2.f32 %v3563_v15 }
 0xb5f   : > { %v6293_v20 = vunpack.i.h.bf16 %v6291_v42  ;;  %v6292_v31 = vunpack.i.l.bf16 %v6291_v42  ;;  %3590 = vadd.xlane.f32.xlu0 %v3589_v45  ;;  %6673 = vpow2.f32 %v3561_v22  ;;  %v9049_v22 = vpack.i.bf16 %v7991_v6, %v7993_v34 }
 0xb60   : > { %v8641_v53 = vpop.eup %6663  ;;  %6675 = vrcp.f32 %v8615_v10 }
 0xb61   : > { %v5932_v18 = vpack.c.bf16 %v6293_v20, %v6292_v31  ;;  %v3598_v25 = vsel %vm992_vm3, %v8641_v53, 0.0  ;;  %v8645_v61 = vpop.eup %6665  ;;  %6677 = vrcp.f32 %v8619_v5 }
 0xb62   : > { %3599 = vadd.xlane.f32.xlu1 %v3598_v25  ;;  %v6301_v8 = vpop.permute.xlu0 %6300  ;;  %v3595_v14 = vsel %vm992_vm3, %v8645_v61, 0.0  ;;  %v9051_v25 = vld [vmem:[#allocation17_spill] sm:$0xff]  ;;  %6679 = vrcp.f32 %v8617_v29 }
 0xb63   : > { %5933 = vmatprep.subr.bf16.mxu0 %v5932_v18  ;;  %6681 = vrcp.f32 %v8623_v49 }
 0xb64   : > { %5935 = vmatpush3.bf16.msra.mxu0 %v5932_v18  ;;  %v9050_v18 = vld [vmem:[#allocation22_spill] sm:$0xff]  ;;  %6683 = vrcp.f32 %v8621_v4 }
 0xb65   : > { %v8647_v2 = vpop.eup %6667 }
 0xb66   : > { %v8651_v55 = vpop.eup %6669  ;;  %3596 = vadd.xlane.f32.xlu1 %v3595_v14  ;;  %v6311_v56 = vpop.permute.xlu0 %6310  ;;  %v3601_v43 = vsel %vm992_vm3, %v8647_v2, 0.0  ;;  %v9052_v14 = vld [vmem:[#allocation40_spill] sm:$0xff] }
 0xb67   : > { %v6313_v58 = vunpack.i.h.bf16 %v6311_v56  ;;  %v6312_v63 = vunpack.i.l.bf16 %v6311_v56  ;;  %3602 = vadd.xlane.f32.xlu0 %v3601_v43  ;;  %v3604_v57 = vsel %vm992_vm3, %v8651_v55, 0.0  ;;  %v9053_v56 = vpack.i.bf16 %v9051_v25, %v9052_v14 }
 0xb68   : > { %v8657_v40 = vpop.eup %6671 }
 0xb69   : > { %v5948_v33 = vpack.c.bf16 %v6313_v58, %v6312_v63  ;;  %v3610_v45 = vsel %vm992_vm3, %v8657_v40, 0.0  ;;  %v8661_v20 = vpop.eup %6673  ;;  %v6303_v63 = vunpack.i.h.bf16 %v6301_v8 }
 0xb6a   : > { %3605 = vadd.xlane.f32.xlu1 %v3604_v57  ;;  %v6316_v15 = vpop.permute.xlu0 %6315  ;;  %v3607_v31 = vsel %vm992_vm3, %v8661_v20, 0.0  ;;  %v6676_v10 = vpop.eup %6675 }
 0xb6b   : > { %v6318_v38 = vunpack.i.h.bf16 %v6316_v15  ;;  %v6317_v35 = vunpack.i.l.bf16 %v6316_v15  ;;  %5949 = vmatprep.subr.bf16.mxu1 %v5948_v33  ;;  %v6678_v5 = vpop.eup %6677 }
 0xb6c   : > { %5951 = vmatpush3.bf16.msra.mxu1 %v5948_v33  ;;  %v6302_v33 = vunpack.i.l.bf16 %v6301_v8  ;;  %v3630_v8 = vmul.f32 %v6676_v10, %v8495_v9 }
 0xb6d   : > { %v5952_v42 = vpack.c.bf16 %v6318_v38, %v6317_v35  ;;  %v6680_v35 = vpop.eup %6679 }
 0xb6e   : > { %3611 = vadd.xlane.f32.xlu1 %v3610_v45  ;;  %v5940_v54 = vpack.c.bf16 %v6303_v63, %v6302_v33  ;;  %v6682_v29 = vpop.eup %6681  ;;  %v3632_v49 = vmul.f32 %v6680_v35, %v8513_v1 }
 0xb6f   : > { %5953 = vmatprep.subr.bf16.mxu1 %v5952_v42  ;;  %v6684_v4 = vpop.eup %6683  ;;  %v3633_v45 = vmul.f32 %v6682_v29, %v8519_v50 }
 0xb70   : > { %5955 = vmatpush3.bf16.msra.mxu1 %v5952_v42  ;;  %v3631_v42 = vmul.f32 %v6678_v5, %v8509_v16  ;;  %v3634_v9 = vmul.f32 %v6684_v4, %v8517_v23 }
 0xb72   : > { %3608 = vadd.xlane.f32.xlu1 %v3607_v31 }
 0xb7d   : > { %6325 = vrot.lane.b32.xlu0 %v9042_v3, %s6873_s7 }
 0xb81   : > { %6330 = vrot.lane.b32.xlu0 %v9049_v22, %s6873_s7 }
 0xb83   : > { %6320 = vrot.lane.b32.xlu1 %v9050_v18, %s6873_s7 }
 0xb85   : > { %6335 = vrot.lane.b32.xlu0 %v6334_v39, %s6872_s23 }
 0xb87   : > { %6345 = vrot.lane.b32.xlu1 %v9053_v56, %s6873_s7 }
 0xb9e   : > { %v3585_v43 = vpop.xlane.xlu1 %3584 }
 0xb9f   : > { %6685 = vrcp.f32 %v3585_v43 }
 0xba2   : > { %v3588_v3 = vpop.xlane.xlu1 %3587 }
 0xba3   : > { %6687 = vrcp.f32 %v3588_v3 }
 0xba6   : > { %v6296_v58 = vpop.permute.xlu1 %6295 }
 0xba7   : > { %v6298_v6 = vunpack.i.h.bf16 %v6296_v58  ;;  %v6297_v34 = vunpack.i.l.bf16 %v6296_v58 }
 0xba9   : > { %v5936_v57 = vpack.c.bf16 %v6298_v6, %v6297_v34  ;;  %v6686_v31 = vpop.eup %6685 }
 0xbaa   : > { %v6306_v15 = vpop.permute.xlu1 %6305  ;;  %v3635_v16 = vmul.f32 %v6686_v31, %v8601_v13  ;;  %v4194_v31 = vld [vmem:[#allocation7 + $0x10] sm:$0xff] }
 0xbab   : > { %v6308_v26 = vunpack.i.h.bf16 %v6306_v15  ;;  %v6307_v39 = vunpack.i.l.bf16 %v6306_v15  ;;  %5937 = vmatprep.subr.bf16.mxu0 %v5936_v57 }
 0xbac   : > { %5939 = vmatpush3.bf16.msra.mxu0 %v5936_v57 }
 0xbad   : > { %5941 = vmatprep.subr.bf16.mxu0 %v5940_v54  ;;  %v5944_v38 = vpack.c.bf16 %v6308_v26, %v6307_v39  ;;  %v6688_v22 = vpop.eup %6687 }
 0xbae   : > { %v3636_v18 = vmul.f32 %v6688_v22, %v8605_v7 }
 0xbb0   : > { %5943 = vmatpush3.bf16.msra.mxu0 %v5940_v54 }
 0xbb1   : > { %5945 = vmatprep.subr.bf16.mxu0 %v5944_v38 }
 0xbb4   : > { %5947 = vmatpush3.bf16.msra.mxu0 %v5944_v38 }
 0xbb7   : > { %5485 = vmatmul.mubr.msk.f32.vlgmr.msra.gmra.mrb[64].mxu0 %vm992_vm3, %v3630_v8 }
 0xbb8   : > { %5487 = vmatprep.mubr.msk.f32.mxu0 %vm992_vm3, %v3631_v42 }
 0xbbb   : > { %5488 = vmatmul.mubr.msk.f32.gmra.mrb[66].mxu0 %vm992_vm3, %v3632_v49 }
 0xbbc   : > { %5490 = vmatprep.mubr.msk.f32.mxu0 %vm992_vm3, %v3633_v45 }
 0xbbf   : > { %5491 = vmatmul.mubr.msk.f32.gmra.mrb[68].mxu0 %vm992_vm3, %v3634_v9  ;;  %v4195_v9 = vld [vmem:[#allocation7 + $0x18] sm:$0xff] }
 0xbc0   : > { %5493 = vmatprep.mubr.msk.f32.mxu0 %vm992_vm3, %v3635_v16  ;;  %v5968_v22 = vpack.c.bf16 %v4195_v9, %v4194_v31 }
 0xbc3   : > { %5494 = vmatmul.mubr.msk.f32.gmra.mrb[70].mxu0 %vm992_vm3, %v3636_v18  ;;  %v4198_v18 = vld [vmem:[#allocation7 + $0x30] sm:$0xff] }
 0xbeb   : > { %v3594_v1 = vpop.xlane.xlu1 %3593 }
 0xbec   : > { %v3591_v50 = vpop.xlane.xlu0 %3590 }
 0xbed   : > { %6689 = vrcp.f32 %v3591_v50  ;;  %v4200_v50 = vld [vmem:[#allocation7 + $0x40] sm:$0xff] }
 0xbee   : > { %6691 = vrcp.f32 %v3594_v1  ;;  %v4199_v1 = vld [vmem:[#allocation7 + $0x38] sm:$0xff] }
 0xbef   : > { %v3600_v25 = vpop.xlane.xlu1 %3599 }
 0xbf3   : > { %v3597_v14 = vpop.xlane.xlu1 %3596 }
 0xbf4   : > { %v3603_v13 = vpop.xlane.xlu0 %3602  ;;  %6693 = vrcp.f32 %v3597_v14  ;;  %v4202_v14 = vld [vmem:[#allocation7 + $0x50] sm:$0xff] }
 0xbf5   : > { %6695 = vrcp.f32 %v3600_v25  ;;  %v4201_v25 = vld [vmem:[#allocation7 + $0x48] sm:$0xff] }
 0xbf6   : > { %6697 = vrcp.f32 %v3603_v13  ;;  %v4204_v13 = vld [vmem:[#allocation7 + $0x60] sm:$0xff] }
 0xbf7   : > { %v6690_v56 = vpop.eup %6689  ;;  %v3606_v43 = vpop.xlane.xlu1 %3605 }
 0xbf8   : > { %v3637_v23 = vmul.f32 %v6690_v56, %v8635_v47  ;;  %v6326_v63 = vpop.permute.xlu0 %6325  ;;  %6699 = vrcp.f32 %v3606_v43  ;;  %v6692_v47 = vpop.eup %6691  ;;  %v5980_v56 = vpack.c.bf16 %v4201_v25, %v4200_v50  ;;  %v4203_v43 = vld [vmem:[#allocation7 + $0x58] sm:$0xff]  ;;  %v9072_v25 = vld [vmem:[#allocation26_spill] sm:$0xff] }
 0xbf9   : > { %v6328_v33 = vunpack.i.h.bf16 %v6326_v63  ;;  %v6327_v6 = vunpack.i.l.bf16 %v6326_v63  ;;  %v3638_v39 = vmul.f32 %v6692_v47, %v8632_v12  ;;  %v4206_v63 = vld [vmem:[#allocation7 + $0x70] sm:$0xff] }
 0xbfa   : > { %5512 = vmatprep.mubr.msk.f32.mxu1 %vm992_vm3, %v3637_v23  ;;  %v5984_v23 = vpack.c.bf16 %v4203_v43, %v4202_v14 }
 0xbfb   : > { %v3612_v3 = vpop.xlane.xlu1 %3611  ;;  %v5960_v54 = vpack.c.bf16 %v6328_v33, %v6327_v6 }
 0xbfe   : > { %v6694_v26 = vpop.eup %6693 }
 0xbff   : > { %v3609_v58 = vpop.xlane.xlu1 %3608  ;;  %v6696_v38 = vpop.eup %6695  ;;  %v3639_v10 = vmul.f32 %v6694_v26, %v8645_v61 }
 0xc00   : > { %6701 = vrcp.f32 %v3609_v58  ;;  %v6698_v5 = vpop.eup %6697  ;;  %v3640_v8 = vmul.f32 %v6696_v38, %v8641_v53  ;;  %v4192_v53 = vld [vmem:[#allocation7] sm:$0xff] }
 0xc01   : > { %6703 = vrcp.f32 %v3612_v3  ;;  %v3641_v42 = vmul.f32 %v6698_v5, %v8647_v2  ;;  %v4193_v2 = vld [vmem:[#allocation7 + $0x8] sm:$0xff]  ;;  %v9055_v5 = vld [vmem:[#allocation42_spill] sm:$0xff] }
 0xc02   : > { %v6700_v35 = vpop.eup %6699  ;;  %v5964_v45 = vpack.c.bf16 %v4193_v2, %v4192_v53  ;;  %v4205_v3 = vld [vmem:[#allocation7 + $0x68] sm:$0xff] }
 0xc03   : > { %v6321_v7 = vpop.permute.xlu1 %6320  ;;  %v3642_v12 = vmul.f32 %v6700_v35, %v8651_v55  ;;  %v4196_v55 = vld [vmem:[#allocation7 + $0x20] sm:$0xff]  ;;  %v5988_v58 = vpack.c.bf16 %v4205_v3, %v4204_v13 }
 0xc04   : > { %v6323_v34 = vunpack.i.h.bf16 %v6321_v7  ;;  %v6322_v57 = vunpack.i.l.bf16 %v6321_v7  ;;  %5965 = vmatprep.subr.bf16.mxu0 %v5964_v45  ;;  %v4207_v7 = vld [vmem:[#allocation7 + $0x78] sm:$0xff] }
 0xc05   : > { %5967 = vmatpush3.bf16.msra.mxu0 %v5964_v45  ;;  %v5992_v33 = vpack.c.bf16 %v4207_v7, %v4206_v63 }
 0xc06   : > { %v5956_v15 = vpack.c.bf16 %v6323_v34, %v6322_v57  ;;  %5969 = vmatprep.subr.bf16.mxu0 %v5968_v22 }
 0xc08   : > { %5957 = vmatprep.subr.bf16.mxu1 %v5956_v15 }
 0xc09   : > { %5959 = vmatpush3.bf16.msra.mxu1 %v5956_v15  ;;  %5971 = vmatpush3.bf16.msra.mxu0 %v5968_v22  ;;  %v6331_v22 = vpop.permute.xlu0 %6330 }
 0xc0a   : > { %5961 = vmatprep.subr.bf16.mxu1 %v5960_v54  ;;  %v6702_v29 = vpop.eup %6701 }
 0xc0b   : > { %v6704_v49 = vpop.eup %6703  ;;  %v3643_v61 = vmul.f32 %v6702_v29, %v8661_v20  ;;  %v4197_v20 = vld [vmem:[#allocation7 + $0x28] sm:$0xff] }
 0xc0c   : > { %v3644_v4 = vmul.f32 %v6704_v49, %v8657_v40  ;;  %v5972_v16 = vpack.c.bf16 %v4197_v20, %v4196_v55  ;;  %v5976_v40 = vpack.c.bf16 %v4199_v1, %v4198_v18  ;;  %v6333_v20 = vunpack.i.h.bf16 %v6331_v22 }
 0xc0d   : > { %5963 = vmatpush3.bf16.msra.mxu1 %v5960_v54  ;;  %v6336_v55 = vpop.permute.xlu0 %6335 }
 0xc0e   : > { %5973 = vmatprep.subr.bf16.mxu0 %v5972_v16  ;;  %v6338_v18 = vunpack.i.h.bf16 %v6336_v55  ;;  %v6337_v1 = vunpack.i.l.bf16 %v6336_v55  ;;  %v4144_v14 = vsel %vm653_vm0, %v9072_v25, %v6333_v20 }
 0xc0f   : > { %5975 = vmatpush3.bf16.msra.mxu0 %v5972_v16  ;;  %v6332_v16 = vunpack.i.l.bf16 %v6331_v22 }
 0xc10   : > { %5513 = vmatmul.mubr.msk.f32.vlgmr.msra.gmra.mrb[96].mxu1 %vm992_vm3, %v3638_v39  ;;  %5977 = vmatprep.subr.bf16.mxu0 %v5976_v40  ;;  %v4160_v37 = vsel %vm992_vm3, %v4144_v14, %v6338_v18 }
 0xc11   : > { %5515 = vmatprep.mubr.msk.f32.mxu1 %vm992_vm3, %v3639_v10  ;;  %v9054_v10 = vld [vmem:[#allocation41_spill] sm:$0xff] }
 0xc13   : > { %5979 = vmatpush3.bf16.msra.mxu0 %v5976_v40  ;;  %v6346_v40 = vpop.permute.xlu1 %6345 }
 0xc14   : > { %5516 = vmatmul.mubr.msk.f32.gmra.mrb[98].mxu1 %vm992_vm3, %v3640_v8  ;;  %5981 = vmatprep.subr.bf16.mxu0 %v5980_v56  ;;  %v9056_v8 = vpack.i.bf16 %v9054_v10, %v9055_v5  ;;  %v6347_v13 = vunpack.i.l.bf16 %v6346_v40 }
 0xc15   : > { %5518 = vmatprep.mubr.msk.f32.mxu1 %vm992_vm3, %v3641_v42 }
 0xc17   : > { %5983 = vmatpush3.bf16.msra.mxu0 %v5980_v56 }
 0xc18   : > { %5519 = vmatmul.mubr.msk.f32.gmra.mrb[100].mxu1 %vm992_vm3, %v3642_v12  ;;  %5985 = vmatprep.subr.bf16.mxu0 %v5984_v23 }
 0xc19   : > { %5521 = vmatprep.mubr.msk.f32.mxu1 %vm992_vm3, %v3643_v61 }
 0xc1b   : > { %5987 = vmatpush3.bf16.msra.mxu0 %v5984_v23  ;;  %v9073_v23 = vld [vmem:[#allocation27_spill] sm:$0xff] }
 0xc1c   : > { %5522 = vmatmul.mubr.msk.f32.gmra.mrb[102].mxu1 %vm992_vm3, %v3644_v4  ;;  %5989 = vmatprep.subr.bf16.mxu0 %v5988_v58  ;;  %v4143_v44 = vsel %vm653_vm0, %v9073_v23, %v6332_v16 }
 0xc1d   : > { %v4159_v3 = vsel %vm992_vm3, %v4143_v44, %v6337_v1 }
 0xc1f   : > { %5991 = vmatpush3.bf16.msra.mxu0 %v5988_v58 }
 0xc20   : > { %5993 = vmatprep.subr.bf16.mxu0 %v5992_v33 }
 0xc23   : > { %5995 = vmatpush3.bf16.msra.mxu0 %v5992_v33 }
 0xc8a   : > { %v5486_v6 = vpop.f32.mrb[64].mxu0 }
 0xc8b   : > { %v3759_v34 = vpop.f32.mrb[65].mxu0 }
 0xc8c   : > { %v6339_v57 = vpack.i.bf16 %v5486_v6, %v3759_v34 }
 0xc8e   : > { %6340 = vrot.lane.b32.xlu0 %v6339_v57, %s6871_s21  ;;  %v5489_v15 = vpop.f32.mrb[66].mxu0 }
 0xc8f   : > { %v3769_v54 = vpop.f32.mrb[67].mxu0 }
 0xc90   : > { %v6354_v47 = vpack.i.bf16 %v5489_v15, %v3769_v54  ;;  %v9074_v54 = vld [vmem:[#allocation29_spill] sm:$0xff] }
 0xc92   : > { %6350 = vrot.lane.b32.xlu0 %v6349_v46, %s6872_s23  ;;  %6355 = vrot.lane.b32.xlu1 %v6354_v47, %s6871_s21  ;;  %v5492_v26 = vpop.f32.mrb[68].mxu0  ;;  %v9059_v46 = vpack.i.bf16 %v9057_v0, %v9058_v30  ;;  %v4145_v47 = vsel %vm653_vm0, %v9074_v54, %v6347_v13  ;;  %v9081_v13 = vld [vmem:[#allocation34_spill] sm:$0xff] }
 0xc93   : > { %v3779_v39 = vpop.f32.mrb[69].mxu0 }
 0xc94   : > { %v6369_v38 = vpack.i.bf16 %v5492_v26, %v3779_v39  ;;  %v9075_v26 = vld [vmem:[#allocation28_spill] sm:$0xff] }
 0xc96   : > { %6360 = vrot.lane.b32.xlu0 %v9056_v8, %s6873_s7  ;;  %6365 = vrot.lane.b32.xlu1 %v6364_v41, %s6872_s23  ;;  %v5495_v35 = vpop.f32.mrb[70].mxu0  ;;  %v9062_v41 = vpack.i.bf16 %v9060_v62, %v9061_v32  ;;  %v9076_v62 = vld [vmem:[#allocation31_spill] sm:$0xff] }
 0xc97   : > { %v3789_v42 = vpop.f32.mrb[71].mxu0 }
 0xc98   : > { %v6384_v29 = vpack.i.bf16 %v5495_v35, %v3789_v42 }
 0xc9a   : > { %6375 = vrot.lane.b32.xlu1 %v9059_v46, %s6873_s7  ;;  %6370 = vrot.lane.b32.xlu0 %v6369_v38, %s6871_s21 }
 0xc9e   : > { %6380 = vrot.lane.b32.xlu0 %v6379_v51, %s6872_s23  ;;  %6385 = vrot.lane.b32.xlu1 %v6384_v29, %s6871_s21  ;;  %v9065_v51 = vpack.i.bf16 %v9063_v59, %v9064_v48 }
 0xca2   : > { %6390 = vrot.lane.b32.xlu0 %v9062_v41, %s6873_s7  ;;  %6395 = vrot.lane.b32.xlu1 %v6394_v27, %s6872_s23  ;;  %v9077_v41 = vld [vmem:[#allocation30_spill] sm:$0xff] }
 0xca6   : > { %6405 = vrot.lane.b32.xlu0 %v6404_v21, %s6872_s23  ;;  %6400 = vrot.lane.b32.xlu1 %v9065_v51, %s6873_s7  ;;  %v9067_v21 = vld [vmem:[#allocation50_spill] sm:$0xff] }
 0xca7   : > { %v9068_v4 = vpack.i.bf16 %v9066_v28, %v9067_v21 }
 0xcaa   : > { %6420 = vrot.lane.b32.xlu1 %v6419_v52, %s6872_s23  ;;  %v9070_v52 = vld [vmem:[#allocation52_spill] sm:$0xff] }
 0xcab   : > { %v9071_v45 = vpack.i.bf16 %v9069_v36, %v9070_v52  ;;  %v9078_v52 = vld [vmem:[#allocation33_spill] sm:$0xff] }
 0xce3   : > { %v5514_v12 = vpop.f32.mrb[96].mxu1 }
 0xce4   : > { %v3912_v49 = vpop.f32.mrb[97].mxu1 }
 0xce5   : > { %v6409_v61 = vpack.i.bf16 %v5514_v12, %v3912_v49 }
 0xce7   : > { %v5517_v60 = vpop.f32.mrb[98].mxu1  ;;  %6410 = vrot.lane.b32.xlu0 %v6409_v61, %s6871_s21 }
 0xce8   : > { %v3922_v11 = vpop.f32.mrb[99].mxu1 }
 0xce9   : > { %v6424_v27 = vpack.i.bf16 %v5517_v60, %v3922_v11 }
 0xceb   : > { %v5520_v19 = vpop.f32.mrb[100].mxu1  ;;  %6415 = vrot.lane.b32.xlu0 %v9068_v4, %s6873_s7  ;;  %6425 = vrot.lane.b32.xlu1 %v6424_v27, %s6871_s21 }
 0xcec   : > { %v3932_v53 = vpop.f32.mrb[101].mxu1 }
 0xced   : > { %v6434_v2 = vpack.i.bf16 %v5520_v19, %v3932_v53 }
 0xcef   : > { %v5523_v24 = vpop.f32.mrb[102].mxu1  ;;  %6435 = vrot.lane.b32.xlu0 %v6434_v2, %s6871_s21  ;;  %6430 = vrot.lane.b32.xlu1 %v9071_v45, %s6873_s7 }
 0xcf0   : > { %v3942_v31 = vpop.f32.mrb[103].mxu1 }
 0xcf1   : > { %v6444_v9 = vpack.i.bf16 %v5523_v24, %v3942_v31  ;;  %v9079_v31 = vld [vmem:[#allocation32_spill] sm:$0xff] }
 0xcf3   : > { %6440 = vrot.lane.b32.xlu0 %v6439_v17, %s6872_s23  ;;  %6445 = vrot.lane.b32.xlu1 %v6444_v9, %s6871_s21  ;;  %v6348_v17 = vunpack.i.h.bf16 %v6346_v40 }
 0xcf5   : > { %v4146_v39 = vsel %vm653_vm0, %v9075_v26, %v6348_v17  ;;  %v9082_v26 = vld [vmem:[#allocation37_spill] sm:$0xff] }
 0xd00   : > { %v6341_v50 = vpop.permute.xlu0 %6340 }
 0xd01   : > { %v6343_v56 = vunpack.i.h.bf16 %v6341_v50  ;;  %v6342_v43 = vunpack.i.l.bf16 %v6341_v50 }
 0xd03   : > { %v4176_v58 = vsel %vm4175_vm11, %v4159_v3, %v6342_v43  ;;  %v4177_v63 = vsel %vm4175_vm11, %v4160_v37, %v6343_v56  ;;  %v9080_v37 = vld [vmem:[#allocation35_spill] sm:$0xff] }
 0xd04   : > { %v6351_v7 = vpop.permute.xlu0 %6350  ;;  %5556 = vmatprep.mubr.f32.mxu0 %v4176_v58  ;;  %v6356_v33 = vpop.permute.xlu1 %6355 }
 0xd05   : > { %v6353_v6 = vunpack.i.h.bf16 %v6351_v7  ;;  %v6352_v34 = vunpack.i.l.bf16 %v6351_v7  ;;  %v6358_v57 = vunpack.i.h.bf16 %v6356_v33  ;;  %v6357_v15 = vunpack.i.l.bf16 %v6356_v33  ;;  %5557 = vmatmul.mubr.f32.vlgmr.msra.gmra.mrb[72].mxu0 %v4177_v63 }
 0xd07   : > { %v4161_v38 = vsel %vm992_vm3, %v4145_v47, %v6352_v34  ;;  %v4162_v10 = vsel %vm992_vm3, %v4146_v39, %v6353_v6 }
 0xd08   : > { %v6361_v5 = vpop.permute.xlu0 %6360  ;;  %v6366_v8 = vpop.permute.xlu1 %6365  ;;  %v4178_v35 = vsel %vm4175_vm11, %v4161_v38, %v6357_v15  ;;  %v4179_v42 = vsel %vm4175_vm11, %v4162_v10, %v6358_v57  ;;  %v9083_v38 = vld [vmem:[#allocation36_spill] sm:$0xff] }
 0xd09   : > { %v6363_v29 = vunpack.i.h.bf16 %v6361_v5  ;;  %v6362_v0 = vunpack.i.l.bf16 %v6361_v5  ;;  %5559 = vmatprep.mubr.f32.mxu0 %v4178_v35  ;;  %v6368_v30 = vunpack.i.h.bf16 %v6366_v8  ;;  %v6367_v46 = vunpack.i.l.bf16 %v6366_v8 }
 0xd0a   : > { %5560 = vmatmul.mubr.f32.gmra.mrb[74].mxu0 %v4179_v42 }
 0xd0b   : > { %v4147_v32 = vsel %vm653_vm0, %v9076_v62, %v6362_v0  ;;  %v4148_v59 = vsel %vm653_vm0, %v9077_v41, %v6363_v29  ;;  %v9084_v41 = vld [vmem:[#allocation39_spill] sm:$0xff] }
 0xd0c   : > { %v6376_v48 = vpop.permute.xlu1 %6375  ;;  %v6371_v51 = vpop.permute.xlu0 %6370  ;;  %v4163_v11 = vsel %vm992_vm3, %v4147_v32, %v6367_v46  ;;  %v4164_v27 = vsel %vm992_vm3, %v4148_v59, %v6368_v30 }
 0xd0d   : > { %v6373_v12 = vunpack.i.h.bf16 %v6371_v51  ;;  %v6372_v49 = vunpack.i.l.bf16 %v6371_v51  ;;  %v6378_v61 = vunpack.i.h.bf16 %v6376_v48  ;;  %v6377_v60 = vunpack.i.l.bf16 %v6376_v48  ;;  %v9085_v48 = vld [vmem:[#allocation38_spill] sm:$0xff] }
 0xd0f   : > { %v4180_v19 = vsel %vm4175_vm11, %v4163_v11, %v6372_v49  ;;  %v4181_v28 = vsel %vm4175_vm11, %v4164_v27, %v6373_v12  ;;  %v4149_v45 = vsel %vm653_vm0, %v9078_v52, %v6377_v60  ;;  %v4150_v9 = vsel %vm653_vm0, %v9079_v31, %v6378_v61 }
 0xd10   : > { %v6381_v21 = vpop.permute.xlu0 %6380  ;;  %5562 = vmatprep.mubr.f32.mxu0 %v4180_v19  ;;  %v6386_v4 = vpop.permute.xlu1 %6385 }
 0xd11   : > { %v6383_v53 = vunpack.i.h.bf16 %v6381_v21  ;;  %v6382_v2 = vunpack.i.l.bf16 %v6381_v21  ;;  %v6388_v24 = vunpack.i.h.bf16 %v6386_v4  ;;  %v6387_v36 = vunpack.i.l.bf16 %v6386_v4  ;;  %5563 = vmatmul.mubr.f32.gmra.mrb[76].mxu0 %v4181_v28 }
 0xd13   : > { %v4165_v22 = vsel %vm992_vm3, %v4149_v45, %v6382_v2  ;;  %v4166_v55 = vsel %vm992_vm3, %v4150_v9, %v6383_v53 }
 0xd14   : > { %v4182_v20 = vsel %vm4175_vm11, %v4165_v22, %v6387_v36  ;;  %v4183_v16 = vsel %vm4175_vm11, %v4166_v55, %v6388_v24  ;;  %v6396_v18 = vpop.permute.xlu1 %6395  ;;  %v6391_v1 = vpop.permute.xlu0 %6390  ;;  %v9086_v22 = vld [vmem:[#allocation24_spill] sm:$0xff] }
 0xd15   : > { %5565 = vmatprep.mubr.f32.mxu0 %v4182_v20  ;;  %v6393_v50 = vunpack.i.h.bf16 %v6391_v1  ;;  %v6392_v25 = vunpack.i.l.bf16 %v6391_v1  ;;  %v6398_v56 = vunpack.i.h.bf16 %v6396_v18  ;;  %v6397_v43 = vunpack.i.l.bf16 %v6396_v18  ;;  %v9087_v20 = vld [vmem:[#allocation25_spill] sm:$0xff] }
 0xd16   : > { %5566 = vmatmul.mubr.f32.gmra.mrb[78].mxu0 %v4183_v16 }
 0xd17   : > { %v4151_v17 = vsel %vm653_vm0, %v9080_v37, %v6392_v25  ;;  %v4152_v3 = vsel %vm653_vm0, %v9081_v13, %v6393_v50  ;;  %v4689_v25 = vld [vmem:[%s8917_s3] ss:$0 sm:$0xff] }
 0xd18   : > { %v6401_v40 = vpop.permute.xlu1 %6400  ;;  %v6406_v14 = vpop.permute.xlu0 %6405  ;;  %v4167_v57 = vsel %vm992_vm3, %v4151_v17, %v6397_v43  ;;  %v4168_v15 = vsel %vm992_vm3, %v4152_v3, %v6398_v56 }
 0xd19   : > { %v6403_v23 = vunpack.i.h.bf16 %v6401_v40  ;;  %v6402_v44 = vunpack.i.l.bf16 %v6401_v40  ;;  %v6408_v6 = vunpack.i.h.bf16 %v6406_v14  ;;  %v6407_v34 = vunpack.i.l.bf16 %v6406_v14 }
 0xd1b   : > { %v4153_v39 = vsel %vm653_vm0, %v9082_v26, %v6402_v44  ;;  %v4154_v10 = vsel %vm653_vm0, %v9083_v38, %v6403_v23 }
 0xd1c   : > { %v6421_v58 = vpop.permute.xlu1 %6420  ;;  %v4169_v30 = vsel %vm992_vm3, %v4153_v39, %v6407_v34  ;;  %v4170_v46 = vsel %vm992_vm3, %v4154_v10, %v6408_v6 }
 0xd1d   : > { %v6423_v12 = vunpack.i.h.bf16 %v6421_v58  ;;  %v6422_v49 = vunpack.i.l.bf16 %v6421_v58 }
 0xd59   : > { %v6411_v63 = vpop.permute.xlu0 %6410 }
 0xd5a   : > { %v6413_v7 = vunpack.i.h.bf16 %v6411_v63  ;;  %v6412_v33 = vunpack.i.l.bf16 %v6411_v63 }
 0xd5c   : > { %v4184_v54 = vsel %vm4175_vm11, %v4167_v57, %v6412_v33  ;;  %v4185_v47 = vsel %vm4175_vm11, %v4168_v15, %v6413_v7 }
 0xd5d   : > { %v6416_v5 = vpop.permute.xlu0 %6415  ;;  %v6426_v8 = vpop.permute.xlu1 %6425  ;;  %5568 = vmatprep.mubr.f32.mxu0 %v4184_v54 }
 0xd5e   : > { %v6418_v35 = vunpack.i.h.bf16 %v6416_v5  ;;  %v6417_v42 = vunpack.i.l.bf16 %v6416_v5  ;;  %v6428_v29 = vunpack.i.h.bf16 %v6426_v8  ;;  %v6427_v0 = vunpack.i.l.bf16 %v6426_v8  ;;  %5569 = vmatmul.mubr.f32.gmra.mrb[80].mxu0 %v4185_v47 }
 0xd60   : > { %v4186_v62 = vsel %vm4175_vm11, %v4169_v30, %v6427_v0  ;;  %v4187_v32 = vsel %vm4175_vm11, %v4170_v46, %v6428_v29  ;;  %v4155_v59 = vsel %vm653_vm0, %v9084_v41, %v6417_v42  ;;  %v4156_v51 = vsel %vm653_vm0, %v9085_v48, %v6418_v35 }
 0xd61   : > { %v6436_v61 = vpop.permute.xlu0 %6435  ;;  %v6431_v60 = vpop.permute.xlu1 %6430  ;;  %5571 = vmatprep.mubr.f32.mxu0 %v4186_v62  ;;  %v4171_v21 = vsel %vm992_vm3, %v4155_v59, %v6422_v49  ;;  %v4172_v4 = vsel %vm992_vm3, %v4156_v51, %v6423_v12 }
 0xd62   : > { %v6438_v11 = vunpack.i.h.bf16 %v6436_v61  ;;  %v6437_v27 = vunpack.i.l.bf16 %v6436_v61  ;;  %5572 = vmatmul.mubr.f32.gmra.mrb[82].mxu0 %v4187_v32  ;;  %v6433_v19 = vunpack.i.h.bf16 %v6431_v60  ;;  %v6432_v28 = vunpack.i.l.bf16 %v6431_v60 }
 0xd64   : > { %v4188_v53 = vsel %vm4175_vm11, %v4171_v21, %v6437_v27  ;;  %v4189_v2 = vsel %vm4175_vm11, %v4172_v4, %v6438_v11  ;;  %v4157_v55 = vsel %vm653_vm0, %v9086_v22, %v6432_v28  ;;  %v4158_v16 = vsel %vm653_vm0, %v9087_v20, %v6433_v19 }
 0xd65   : > { %v6441_v24 = vpop.permute.xlu0 %6440  ;;  %v6446_v36 = vpop.permute.xlu1 %6445  ;;  %5574 = vmatprep.mubr.f32.mxu0 %v4188_v53 }
 0xd66   : > { %v6443_v52 = vunpack.i.h.bf16 %v6441_v24  ;;  %v6442_v45 = vunpack.i.l.bf16 %v6441_v24  ;;  %v6448_v31 = vunpack.i.h.bf16 %v6446_v36  ;;  %v6447_v9 = vunpack.i.l.bf16 %v6446_v36  ;;  %5575 = vmatmul.mubr.f32.gmra.mrb[84].mxu0 %v4189_v2 }
 0xd68   : > { %v4173_v18 = vsel %vm992_vm3, %v4157_v55, %v6442_v45  ;;  %v4174_v1 = vsel %vm992_vm3, %v4158_v16, %v6443_v52 }
 0xd69   : > { %v4190_v40 = vsel %vm4175_vm11, %v4173_v18, %v6447_v9  ;;  %v4191_v50 = vsel %vm4175_vm11, %v4174_v1, %v6448_v31 }
 0xd6a   : > { %5577 = vmatprep.mubr.f32.mxu0 %v4190_v40 }
 0xd6b   : > { %5578 = vmatmul.mubr.f32.gmra.mrb[86].mxu0 %v4191_v50 }
 0xdd8   : > { %v5558_v14 = vpop.f32.mrb[72].mxu0 }
 0xdd9   : > { %v4287_v56 = vadd.f32 %v5558_v14, %v4689_v25  ;;  %v4281_v43 = vpop.f32.mrb[73].mxu0 }
 0xdda   : > { %v4282_v23 = vadd.f32 %v4689_v25, %v4281_v43 }
 0xddb   : > { %4361 = vst [vmem:[%s8845_s6 + $0x8] sm:$0xff] %v4287_v56 }
 0xddc   : > { %4360 = vst [vmem:[%s8845_s6] sm:$0xff] %v4282_v23 }
 0xddd   : > { %v5561_v44 = vpop.f32.mrb[74].mxu0 }
 0xdde   : > { %v4297_v37 = vadd.f32 %v5561_v44, %v4689_v25  ;;  %v4291_v17 = vpop.f32.mrb[75].mxu0 }
 0xddf   : > { %v4292_v13 = vadd.f32 %v4689_v25, %v4291_v17 }
 0xde0   : > { %4363 = vst [vmem:[%s8845_s6 + $0x18] sm:$0xff] %v4297_v37 }
 0xde1   : > { %4362 = vst [vmem:[%s8845_s6 + $0x10] sm:$0xff] %v4292_v13 }
 0xde4   : > { %v5564_v3 = vpop.f32.mrb[76].mxu0 }
 0xde5   : > { %v4307_v58 = vadd.f32 %v5564_v3, %v4689_v25  ;;  %v4301_v63 = vpop.f32.mrb[77].mxu0 }
 0xde6   : > { %v4302_v7 = vadd.f32 %v4689_v25, %v4301_v63 }
 0xde7   : > { %4365 = vst [vmem:[%s8845_s6 + $0x28] sm:$0xff] %v4307_v58 }
 0xde8   : > { %4364 = vst [vmem:[%s8845_s6 + $0x20] sm:$0xff] %v4302_v7 }
 0xde9   : > { %v5567_v33 = vpop.f32.mrb[78].mxu0 }
 0xdea   : > { %v4317_v6 = vadd.f32 %v5567_v33, %v4689_v25  ;;  %v4311_v34 = vpop.f32.mrb[79].mxu0 }
 0xdeb   : > { %v4312_v57 = vadd.f32 %v4689_v25, %v4311_v34 }
 0xdec   : > { %4367 = vst [vmem:[%s8845_s6 + $0x38] sm:$0xff] %v4317_v6 }
 0xded   : > { %4366 = vst [vmem:[%s8845_s6 + $0x30] sm:$0xff] %v4312_v57 }
 0xe31   : > { %v5570_v15 = vpop.f32.mrb[80].mxu0 }
 0xe32   : > { %v4327_v54 = vadd.f32 %v5570_v15, %v4689_v25  ;;  %v4321_v47 = vpop.f32.mrb[81].mxu0 }
 0xe33   : > { %v4322_v26 = vadd.f32 %v4689_v25, %v4321_v47 }
 0xe34   : > { %4369 = vst [vmem:[%s8845_s6 + $0x48] sm:$0xff] %v4327_v54 }
 0xe35   : > { %4368 = vst [vmem:[%s8845_s6 + $0x40] sm:$0xff] %v4322_v26  ;;  %v5573_v39 = vpop.f32.mrb[82].mxu0 }
 0xe36   : > { %v4337_v38 = vadd.f32 %v5573_v39, %v4689_v25  ;;  %v4331_v10 = vpop.f32.mrb[83].mxu0 }
 0xe37   : > { %v4332_v5 = vadd.f32 %v4689_v25, %v4331_v10 }
 0xe38   : > { %4371 = vst [vmem:[%s8845_s6 + $0x58] sm:$0xff] %v4337_v38 }
 0xe39   : > { %4370 = vst [vmem:[%s8845_s6 + $0x50] sm:$0xff] %v4332_v5  ;;  %v5576_v8 = vpop.f32.mrb[84].mxu0 }
 0xe3a   : > { %v4347_v35 = vadd.f32 %v5576_v8, %v4689_v25  ;;  %v4341_v42 = vpop.f32.mrb[85].mxu0 }
 0xe3b   : > { %v4342_v29 = vadd.f32 %v4689_v25, %v4341_v42 }
 0xe3c   : > { %4373 = vst [vmem:[%s8845_s6 + $0x68] sm:$0xff] %v4347_v35 }
 0xe3d   : > { %4372 = vst [vmem:[%s8845_s6 + $0x60] sm:$0xff] %v4342_v29 }
 0xe3e   : > { %v5579_v0 = vpop.f32.mrb[86].mxu0 }
 0xe3f   : > { %v4357_v30 = vadd.f32 %v5579_v0, %v4689_v25  ;;  %v4351_v46 = vpop.f32.mrb[87].mxu0 }
 0xe40   : > { %v4352_v62 = vadd.f32 %v4689_v25, %v4351_v46 }
 0xe41   : > { %4375 = vst [vmem:[%s8845_s6 + $0x78] sm:$0xff] %v4357_v30 }
 0xe42   : > { %4374 = vst [vmem:[%s8845_s6 + $0x70] sm:$0xff] %v4352_v62 }
 0xe43   : > { %6804 = shalt.err (!%p6801_p2)
}
 0xe44   : > { %s6805_s25 = scalar_lea.hbm %s8866_s29, 2048  ;;  %s6809_s7 = scalar_lea.hbm %s8918_s4, 4096 }
 0xe45   : > { %p6806_p13 = scmp.ne.s32.totalorder %s8866_s29, %s6805_s25  ;;  %p6810_p4 = scmp.lt.u32.totalorder %s8866_s29, %s8918_s4 }
 0xe46   : > { %p6811_p7 = scmp.lt.u32.totalorder %s6809_s7, %s6805_s25  ;;  %p6813_p11 = scmp.lt.u32.totalorder %s6805_s25, %s8866_s29 }
 0xe47   : > { %p6807_p6 = pnand %p6806_p13, %p9088_p0 }
 0xe48   : > { %p6812_p8 = por %p6811_p7, %p6810_p4 }
 0xe49   : > { %p6808_p10 = pneg %p6807_p6 }
 0xe4a   : > { %p6814_p1 = por %p6813_p11, %p6812_p8 }
 0xe4c   : > { %p6815_p3 = pnand %p6814_p1, %p6808_p10 }
 0xe4e   : > { %6818 = shalt.err (!%p6815_p3)
}
 0xe4f   : > { %s6875_s6 = smov 128   ;;  %s6876_s9 = smov 8  }
 0xe50   : > { %6022 = dma.vmem_to_hbm [thread:$0]  (%p9088_p0), %s8868_s28, 2048, %s8866_s29, %s4377_s5, %s6875_s6, %s6875_s6, %s6876_s9  }
 0xe51 PF: > { %s4406_s27 = sand.u32 1, %s6849_s15   ;;  %p9089_p5 = scmp.ne.s32.totalorder %s8955_s22, 0 }
 0xe52   : > { %p9090_p9 = scmp.ge.s32.totalorder %s6861_s18, 2  ;;  %s4407_s20 = scalar_lea.sflag [#allocation4], %s4406_s27 }
 0xe54   : > { %p6036_p12 = pnand %p9090_p9, %p9089_p5 }
 0xe56   : > { %6844 = dma.done.wait (!%p6036_p12), %s4407_s20, 2048  }
 0xe57   : > { %6846 = vsyncadd (!%p6036_p12), %s4407_s20, 4294965248  ;;  %p18_p2 = scmp.ge.s32.totalorder %s7015_s11, 4   ;;  %s9091_s15 = smov %s6853_s16 }
 0xe58   : > { %s9092_s16 = smov %s6857_s17  ;;  %s9093_s17 = smov %s7024_s14 }
 0xe59   : > { %s9094_s18 = smov %s7015_s11  ;;  %20 = sbr.rel (!%p18_p2) target bundleno = 6 (0x6), region = 89 }
 0xe60   :  { %4412 = vsyncpa [#allocation3], 1 }
 0xe61   :  { %4414 = vsyncpa [#allocation3 + $0x1], 1 }
 0xe62   :  { %4415 = vsyncpa [#allocation6], 1 }
 0xe63   :  { %4416 = vsyncpa [#allocation4], 1 }
 0xe64   :  { %4418 = vsyncpa [#allocation4 + $0x1], 1 }

</bundles_post_ra>
